<compile_context>
chip_gen: v5e
topology: v5e:2x2
jax: 0.10.0
libtpu: 0.0.40
codegen_flags: <defaults>
</compile_context>

<pallas_src>
import math
import jax
import jax.numpy as jnp
import numpy as np
from jax.experimental import pallas as pl
from jax.experimental.pallas import tpu as pltpu

# ---- module config (defaults of DfTransform, shrunk num_bins for the test) ----
SR = 16000
VELOCITY = 343.0
NUM_BINS = 64            # F used by the test (PyTorch default is 257; the
                         # kernel derives omega from the actual F at call time)
R_MIC = 0.0425
INDEX_L = (1, 2, 3, 4, 5, 6)
INDEX_R = (0, 0, 0, 0, 0, 0)
NUM_CH = 7               # princeton circular array: 7 microphones
NUM_PAIRS = len(INDEX_L)

FS = 8                   # sublane strip height over F inside the kernel
TS = 512                 # lane strip width over T inside the kernel

# ---- bounded-range cosine -----------------------------------------------------
_INV_2PI = 0.15915494309189535
_TWO_PI_HI = float(np.float32(2.0 * math.pi))               # f32(2*pi)
_TWO_PI_LO = float(np.float64(2.0 * math.pi) - np.float64(_TWO_PI_HI))


def _fast_cos(x):
    """cos(x) for |x| <~ 30 rad: Cody-Waite fold to [-pi, pi], then
    cos(y) = 1 - 2*sin(y/2)^2 with a degree-11 odd polynomial for sin on
    [-pi/2, pi/2].  Pure VPU ops; max error vs exact cos ~2e-6."""
    k = jnp.floor(x * _INV_2PI + 0.5)
    y = x - k * _TWO_PI_HI
    y = y - k * _TWO_PI_LO
    u = 0.5 * y                                  # u in ~[-pi/2, pi/2]
    u2 = u * u
    s = -2.5052108385441718e-08                  # -1/11!
    s = s * u2 + 2.7557319223985893e-06          # +1/9!
    s = s * u2 - 1.984126984126984e-04           # -1/7!
    s = s * u2 + 8.333333333333333e-03           # +1/5!
    s = s * u2 - 1.6666666666666666e-01          # -1/3!
    s = s * u2 + 1.0
    s = s * u                                    # sin(u)
    return 1.0 - 2.0 * (s * s)


def _df_kernel(dif_ref, p_ref, o_ref):
    """One (T-tile, batch) grid step.

    dif_ref : (1, 6, F, 1)   VMEM  precomputed oracle phase diff per mic pair
    p_ref   : (1, 7, F, tT)  VMEM  phase block for this batch / time tile
    o_ref   : (1, F, tT)     VMEM  angle-feature output tile
    """
    F = o_ref.shape[1]
    tT = o_ref.shape[2]
    inv_m = 1.0 / NUM_PAIRS

    # Strip-mine over (FS, TS) tiles so the whole 6-pair chain (shared
    # reference-mic tile, accumulator, cosine temporaries) stays in vregs.
    for f0 in range(0, F, FS):
        fs = min(FS, F - f0)
        # per-pair oracle diff for this F strip: (fs, 1), broadcast over lanes
        d = [dif_ref[0, m, f0:f0 + fs, :] for m in range(NUM_PAIRS)]
        for t0 in range(0, tT, TS):
            ts = min(TS, tT - t0)
            # INDEX_R is all 0: load the shared reference-mic tile once per
            # (f, t) strip and reuse it across all 6 pairs.
            p0 = p_ref[0, 0, f0:f0 + fs, t0:t0 + ts].astype(jnp.float32)
            acc = None
            for m, l in enumerate(INDEX_L):
                pm = p_ref[0, l, f0:f0 + fs, t0:t0 + ts].astype(jnp.float32)
                c = _fast_cos((pm - p0) - d[m])
                acc = c if acc is None else acc + c
            o_ref[0, f0:f0 + fs, t0:t0 + ts] = acc * inv_m


def df_transform(p, doa, *, t_tile=None):
    """p: (N, 7, F, T) phase, doa: (N,) float32 -> af: (N, F, T) float32."""
    N, C, F, T = p.shape
    assert C == NUM_CH

    # --- lane-dense T tiling (multiple of 128); last block may be partial ----
    if t_tile is None:
        t_tile = min(1024, -(-T // 128) * 128)
    assert t_tile % 128 == 0
    n_t = pl.cdiv(T, t_tile)

    # --- geometry: precompute per-pair oracle phase difference (as reference) -
    omega = jnp.asarray(
        [math.pi * SR * f / (F - 1) for f in range(F)], dtype=jnp.float32)  # (F,)
    zero = jnp.zeros_like(doa)
    tau = R_MIC * jnp.stack(
        [zero,
         -jnp.cos(doa),
         -jnp.cos(math.pi / 3 - doa),
         -jnp.cos(2 * math.pi / 3 - doa),
         jnp.cos(doa),
         jnp.cos(math.pi / 3 - doa),
         jnp.cos(2 * math.pi / 3 - doa)],
        axis=-1,
    ) / VELOCITY                                            # (N, 7)
    phi = tau[:, :, None] * (-omega)[None, None, :]         # (N, 7, F)
    dif = (phi[:, list(INDEX_L)] - phi[:, list(INDEX_R)]).astype(jnp.float32)
    dif = dif[..., None]                                    # (N, 6, F, 1)

    # double-buffered p + out blocks, plus headroom; stays < v7x's 64 MiB
    blk_bytes = 4 * (NUM_CH + 1) * F * t_tile
    vmem_limit = int(min(max(2 * blk_bytes + (4 << 20), 16 << 20), 48 << 20))

    out = pl.pallas_call(
        _df_kernel,
        out_shape=jax.ShapeDtypeStruct((N, F, T), jnp.float32),
        grid_spec=pltpu.PrefetchScalarGridSpec(
            num_scalar_prefetch=0,
            grid=(n_t, N),
            in_specs=[
                pl.BlockSpec((1, NUM_PAIRS, F, 1), lambda t, b: (b, 0, 0, 0)),   # dif
                pl.BlockSpec((1, C, F, t_tile), lambda t, b: (b, 0, 0, t)),      # p
            ],
            out_specs=pl.BlockSpec((1, F, t_tile), lambda t, b: (b, 0, t)),
        ),
        compiler_params=pltpu.CompilerParams(
            dimension_semantics=("parallel", "parallel"),
            vmem_limit_bytes=vmem_limit),
        cost_estimate=pl.CostEstimate(
            flops=120 * N * F * T,
            transcendentals=0,
            bytes_accessed=(NUM_CH + 1) * 4 * N * F * T + 4 * N * NUM_PAIRS * F),
    )(dif, p)
    return out


def _reference(p, doa):
    """Pure-JAX reference mirroring the PyTorch forward."""
    F = p.shape[2]
    omega = jnp.asarray(
        [math.pi * SR * f / (F - 1) for f in range(F)], dtype=jnp.float32)
    zero = jnp.zeros_like(doa)
    tau = R_MIC * jnp.stack(
        [zero,
         -jnp.cos(doa), -jnp.cos(math.pi / 3 - doa), -jnp.cos(2 * math.pi / 3 - doa),
         jnp.cos(doa), jnp.cos(math.pi / 3 - doa), jnp.cos(2 * math.pi / 3 - doa)],
        axis=-1,
    ) / VELOCITY                                       # (N, 7)
    phi = tau[:, :, None] * (-omega)[None, None, :]    # (N, 7, F)
    d = phi[..., None]                                 # (N, 7, F, 1)
    ipd = p[:, list(INDEX_L)] - p[:, list(INDEX_R)]    # (N, 6, F, T)
    dif = d[:, list(INDEX_L)] - d[:, list(INDEX_R)]    # (N, 6, F, 1)
    return jnp.mean(jnp.cos(ipd - dif), axis=1)        # (N, F, T)


if __name__ == "__main__":
    key = jax.random.PRNGKey(0)
    kp, kd, kp2 = jax.random.split(key, 3)
    N, T = 2, 16
    p = jax.random.uniform(kp, (N, NUM_CH, NUM_BINS, T),
                           minval=-math.pi, maxval=math.pi, dtype=jnp.float32)
    doa = jax.random.uniform(kd, (N,), minval=0.0, maxval=2.0 * math.pi,
                             dtype=jnp.float32)

    af = jax.block_until_ready(df_transform(p, doa))
    ref = jax.block_until_ready(_reference(p, doa))
    assert af.shape == (N, NUM_BINS, T)
    np.testing.assert_allclose(np.asarray(af), np.asarray(ref),
                               rtol=1e-5, atol=1e-5)

    # also exercise the multi-tile + partial-last-tile path (no wrapper pad)
    T2 = 272
    p2 = jax.random.uniform(kp2, (N, NUM_CH, NUM_BINS, T2),
                            minval=-math.pi, maxval=math.pi, dtype=jnp.float32)
    af2 = jax.block_until_ready(df_transform(p2, doa, t_tile=128))
    np.testing.assert_allclose(np.asarray(af2), np.asarray(_reference(p2, doa)),
                               rtol=1e-5, atol=1e-5)

    print("KERNEL_OK")
</pallas_src>

<mosaic_0001>
module attributes {stable_mosaic.version = 11 : i64} {
  func.func @_df_kernel(%arg0: i32, %arg1: i32, %arg2: memref<1x6x64x1xf32, #tpu.memory_space<vmem>>, %arg3: memref<1x7x64x128xf32, #tpu.memory_space<vmem>>, %arg4: memref<1x64x128xf32, #tpu.memory_space<vmem>>) attributes {dimension_semantics = [#tpu.dimension_semantics<parallel>, #tpu.dimension_semantics<parallel>], iteration_bounds = array<i64: 1, 2>, scalar_prefetch = 0 : i64, scratch_operands = 0 : i64, tpu.core_type = #tpu.core_type<tc>, window_params = [{transform_indices = @transform_0, window_bounds = array<i64: 1, 6, 64, 1>}, {transform_indices = @transform_1, window_bounds = array<i64: 1, 7, 64, 128>}, {transform_indices = @transform_2, window_bounds = array<i64: 1, 64, 128>}]} {
    %c0 = arith.constant 0 : index
    %c0_0 = arith.constant 0 : index
    %c0_1 = arith.constant 0 : index
    %c0_2 = arith.constant 0 : index
    %0 = vector.load %arg2[%c0, %c0_0, %c0_1, %c0_2] : memref<1x6x64x1xf32, #tpu.memory_space<vmem>>, vector<1x1x8x1xf32>
    %1 = vector.shape_cast %0 : vector<1x1x8x1xf32> to vector<8x1xf32>
    %c0_3 = arith.constant 0 : index
    %c1 = arith.constant 1 : index
    %c0_4 = arith.constant 0 : index
    %c0_5 = arith.constant 0 : index
    %2 = vector.load %arg2[%c0_3, %c1, %c0_4, %c0_5] : memref<1x6x64x1xf32, #tpu.memory_space<vmem>>, vector<1x1x8x1xf32>
    %3 = vector.shape_cast %2 : vector<1x1x8x1xf32> to vector<8x1xf32>
    %c0_6 = arith.constant 0 : index
    %c2 = arith.constant 2 : index
    %c0_7 = arith.constant 0 : index
    %c0_8 = arith.constant 0 : index
    %4 = vector.load %arg2[%c0_6, %c2, %c0_7, %c0_8] : memref<1x6x64x1xf32, #tpu.memory_space<vmem>>, vector<1x1x8x1xf32>
    %5 = vector.shape_cast %4 : vector<1x1x8x1xf32> to vector<8x1xf32>
    %c0_9 = arith.constant 0 : index
    %c3 = arith.constant 3 : index
    %c0_10 = arith.constant 0 : index
    %c0_11 = arith.constant 0 : index
    %6 = vector.load %arg2[%c0_9, %c3, %c0_10, %c0_11] : memref<1x6x64x1xf32, #tpu.memory_space<vmem>>, vector<1x1x8x1xf32>
    %7 = vector.shape_cast %6 : vector<1x1x8x1xf32> to vector<8x1xf32>
    %c0_12 = arith.constant 0 : index
    %c4 = arith.constant 4 : index
    %c0_13 = arith.constant 0 : index
    %c0_14 = arith.constant 0 : index
    %8 = vector.load %arg2[%c0_12, %c4, %c0_13, %c0_14] : memref<1x6x64x1xf32, #tpu.memory_space<vmem>>, vector<1x1x8x1xf32>
    %9 = vector.shape_cast %8 : vector<1x1x8x1xf32> to vector<8x1xf32>
    %c0_15 = arith.constant 0 : index
    %c5 = arith.constant 5 : index
    %c0_16 = arith.constant 0 : index
    %c0_17 = arith.constant 0 : index
    %10 = vector.load %arg2[%c0_15, %c5, %c0_16, %c0_17] : memref<1x6x64x1xf32, #tpu.memory_space<vmem>>, vector<1x1x8x1xf32>
    %11 = vector.shape_cast %10 : vector<1x1x8x1xf32> to vector<8x1xf32>
    %c0_18 = arith.constant 0 : index
    %c0_19 = arith.constant 0 : index
    %c0_20 = arith.constant 0 : index
    %c0_21 = arith.constant 0 : index
    %12 = vector.load %arg3[%c0_18, %c0_19, %c0_20, %c0_21] : memref<1x7x64x128xf32, #tpu.memory_space<vmem>>, vector<1x1x8x128xf32>
    %13 = vector.shape_cast %12 : vector<1x1x8x128xf32> to vector<8x128xf32>
    %c0_22 = arith.constant 0 : index
    %c1_23 = arith.constant 1 : index
    %c0_24 = arith.constant 0 : index
    %c0_25 = arith.constant 0 : index
    %14 = vector.load %arg3[%c0_22, %c1_23, %c0_24, %c0_25] : memref<1x7x64x128xf32, #tpu.memory_space<vmem>>, vector<1x1x8x128xf32>
    %15 = vector.shape_cast %14 : vector<1x1x8x128xf32> to vector<8x128xf32>
    %16 = arith.subf %15, %13 : vector<8x128xf32>
    %17 = vector.broadcast %1 : vector<8x1xf32> to vector<8x128xf32>
    %18 = arith.subf %16, %17 : vector<8x128xf32>
    %cst = arith.constant 0.159154937 : f32
    %19 = vector.broadcast %cst : f32 to vector<8x128xf32>
    %20 = arith.mulf %18, %19 : vector<8x128xf32>
    %cst_26 = arith.constant 5.000000e-01 : f32
    %21 = vector.broadcast %cst_26 : f32 to vector<8x128xf32>
    %22 = arith.addf %20, %21 : vector<8x128xf32>
    %23 = math.floor %22 : vector<8x128xf32>
    %cst_27 = arith.constant 6.28318548 : f32
    %24 = vector.broadcast %cst_27 : f32 to vector<8x128xf32>
    %25 = arith.mulf %23, %24 : vector<8x128xf32>
    %26 = arith.subf %18, %25 : vector<8x128xf32>
    %cst_28 = arith.constant -1.74845553E-7 : f32
    %27 = vector.broadcast %cst_28 : f32 to vector<8x128xf32>
    %28 = arith.mulf %23, %27 : vector<8x128xf32>
    %29 = arith.subf %26, %28 : vector<8x128xf32>
    %cst_29 = arith.constant 5.000000e-01 : f32
    %30 = vector.broadcast %cst_29 : f32 to vector<8x128xf32>
    %31 = arith.mulf %30, %29 : vector<8x128xf32>
    %32 = arith.mulf %31, %31 : vector<8x128xf32>
    %cst_30 = arith.constant -2.50521079E-8 : f32
    %33 = vector.broadcast %cst_30 : f32 to vector<8x128xf32>
    %34 = arith.mulf %33, %32 : vector<8x128xf32>
    %cst_31 = arith.constant 2.75573188E-6 : f32
    %35 = vector.broadcast %cst_31 : f32 to vector<8x128xf32>
    %36 = arith.addf %34, %35 : vector<8x128xf32>
    %37 = arith.mulf %36, %32 : vector<8x128xf32>
    %cst_32 = arith.constant 1.98412701E-4 : f32
    %38 = vector.broadcast %cst_32 : f32 to vector<8x128xf32>
    %39 = arith.subf %37, %38 : vector<8x128xf32>
    %40 = arith.mulf %39, %32 : vector<8x128xf32>
    %cst_33 = arith.constant 0.00833333377 : f32
    %41 = vector.broadcast %cst_33 : f32 to vector<8x128xf32>
    %42 = arith.addf %40, %41 : vector<8x128xf32>
    %43 = arith.mulf %42, %32 : vector<8x128xf32>
    %cst_34 = arith.constant 0.166666672 : f32
    %44 = vector.broadcast %cst_34 : f32 to vector<8x128xf32>
    %45 = arith.subf %43, %44 : vector<8x128xf32>
    %46 = arith.mulf %45, %32 : vector<8x128xf32>
    %cst_35 = arith.constant 1.000000e+00 : f32
    %47 = vector.broadcast %cst_35 : f32 to vector<8x128xf32>
    %48 = arith.addf %46, %47 : vector<8x128xf32>
    %49 = arith.mulf %48, %31 : vector<8x128xf32>
    %50 = arith.mulf %49, %49 : vector<8x128xf32>
    %cst_36 = arith.constant 2.000000e+00 : f32
    %51 = vector.broadcast %cst_36 : f32 to vector<8x128xf32>
    %52 = arith.mulf %51, %50 : vector<8x128xf32>
    %cst_37 = arith.constant 1.000000e+00 : f32
    %53 = vector.broadcast %cst_37 : f32 to vector<8x128xf32>
    %54 = arith.subf %53, %52 : vector<8x128xf32>
    %c0_38 = arith.constant 0 : index
    %c2_39 = arith.constant 2 : index
    %c0_40 = arith.constant 0 : index
    %c0_41 = arith.constant 0 : index
    %55 = vector.load %arg3[%c0_38, %c2_39, %c0_40, %c0_41] : memref<1x7x64x128xf32, #tpu.memory_space<vmem>>, vector<1x1x8x128xf32>
    %56 = vector.shape_cast %55 : vector<1x1x8x128xf32> to vector<8x128xf32>
    %57 = arith.subf %56, %13 : vector<8x128xf32>
    %58 = vector.broadcast %3 : vector<8x1xf32> to vector<8x128xf32>
    %59 = arith.subf %57, %58 : vector<8x128xf32>
    %cst_42 = arith.constant 0.159154937 : f32
    %60 = vector.broadcast %cst_42 : f32 to vector<8x128xf32>
    %61 = arith.mulf %59, %60 : vector<8x128xf32>
    %cst_43 = arith.constant 5.000000e-01 : f32
    %62 = vector.broadcast %cst_43 : f32 to vector<8x128xf32>
    %63 = arith.addf %61, %62 : vector<8x128xf32>
    %64 = math.floor %63 : vector<8x128xf32>
    %cst_44 = arith.constant 6.28318548 : f32
    %65 = vector.broadcast %cst_44 : f32 to vector<8x128xf32>
    %66 = arith.mulf %64, %65 : vector<8x128xf32>
    %67 = arith.subf %59, %66 : vector<8x128xf32>
    %cst_45 = arith.constant -1.74845553E-7 : f32
    %68 = vector.broadcast %cst_45 : f32 to vector<8x128xf32>
    %69 = arith.mulf %64, %68 : vector<8x128xf32>
    %70 = arith.subf %67, %69 : vector<8x128xf32>
    %cst_46 = arith.constant 5.000000e-01 : f32
    %71 = vector.broadcast %cst_46 : f32 to vector<8x128xf32>
    %72 = arith.mulf %71, %70 : vector<8x128xf32>
    %73 = arith.mulf %72, %72 : vector<8x128xf32>
    %cst_47 = arith.constant -2.50521079E-8 : f32
    %74 = vector.broadcast %cst_47 : f32 to vector<8x128xf32>
    %75 = arith.mulf %74, %73 : vector<8x128xf32>
    %cst_48 = arith.constant 2.75573188E-6 : f32
    %76 = vector.broadcast %cst_48 : f32 to vector<8x128xf32>
    %77 = arith.addf %75, %76 : vector<8x128xf32>
    %78 = arith.mulf %77, %73 : vector<8x128xf32>
    %cst_49 = arith.constant 1.98412701E-4 : f32
    %79 = vector.broadcast %cst_49 : f32 to vector<8x128xf32>
    %80 = arith.subf %78, %79 : vector<8x128xf32>
    %81 = arith.mulf %80, %73 : vector<8x128xf32>
    %cst_50 = arith.constant 0.00833333377 : f32
    %82 = vector.broadcast %cst_50 : f32 to vector<8x128xf32>
    %83 = arith.addf %81, %82 : vector<8x128xf32>
    %84 = arith.mulf %83, %73 : vector<8x128xf32>
    %cst_51 = arith.constant 0.166666672 : f32
    %85 = vector.broadcast %cst_51 : f32 to vector<8x128xf32>
    %86 = arith.subf %84, %85 : vector<8x128xf32>
    %87 = arith.mulf %86, %73 : vector<8x128xf32>
    %cst_52 = arith.constant 1.000000e+00 : f32
    %88 = vector.broadcast %cst_52 : f32 to vector<8x128xf32>
    %89 = arith.addf %87, %88 : vector<8x128xf32>
    %90 = arith.mulf %89, %72 : vector<8x128xf32>
    %91 = arith.mulf %90, %90 : vector<8x128xf32>
    %cst_53 = arith.constant 2.000000e+00 : f32
    %92 = vector.broadcast %cst_53 : f32 to vector<8x128xf32>
    %93 = arith.mulf %92, %91 : vector<8x128xf32>
    %cst_54 = arith.constant 1.000000e+00 : f32
    %94 = vector.broadcast %cst_54 : f32 to vector<8x128xf32>
    %95 = arith.subf %94, %93 : vector<8x128xf32>
    %96 = arith.addf %54, %95 : vector<8x128xf32>
    %c0_55 = arith.constant 0 : index
    %c3_56 = arith.constant 3 : index
    %c0_57 = arith.constant 0 : index
    %c0_58 = arith.constant 0 : index
    %97 = vector.load %arg3[%c0_55, %c3_56, %c0_57, %c0_58] : memref<1x7x64x128xf32, #tpu.memory_space<vmem>>, vector<1x1x8x128xf32>
    %98 = vector.shape_cast %97 : vector<1x1x8x128xf32> to vector<8x128xf32>
    %99 = arith.subf %98, %13 : vector<8x128xf32>
    %100 = vector.broadcast %5 : vector<8x1xf32> to vector<8x128xf32>
    %101 = arith.subf %99, %100 : vector<8x128xf32>
    %cst_59 = arith.constant 0.159154937 : f32
    %102 = vector.broadcast %cst_59 : f32 to vector<8x128xf32>
    %103 = arith.mulf %101, %102 : vector<8x128xf32>
    %cst_60 = arith.constant 5.000000e-01 : f32
    %104 = vector.broadcast %cst_60 : f32 to vector<8x128xf32>
    %105 = arith.addf %103, %104 : vector<8x128xf32>
    %106 = math.floor %105 : vector<8x128xf32>
    %cst_61 = arith.constant 6.28318548 : f32
    %107 = vector.broadcast %cst_61 : f32 to vector<8x128xf32>
    %108 = arith.mulf %106, %107 : vector<8x128xf32>
    %109 = arith.subf %101, %108 : vector<8x128xf32>
    %cst_62 = arith.constant -1.74845553E-7 : f32
    %110 = vector.broadcast %cst_62 : f32 to vector<8x128xf32>
    %111 = arith.mulf %106, %110 : vector<8x128xf32>
    %112 = arith.subf %109, %111 : vector<8x128xf32>
    %cst_63 = arith.constant 5.000000e-01 : f32
    %113 = vector.broadcast %cst_63 : f32 to vector<8x128xf32>
    %114 = arith.mulf %113, %112 : vector<8x128xf32>
    %115 = arith.mulf %114, %114 : vector<8x128xf32>
    %cst_64 = arith.constant -2.50521079E-8 : f32
    %116 = vector.broadcast %cst_64 : f32 to vector<8x128xf32>
    %117 = arith.mulf %116, %115 : vector<8x128xf32>
    %cst_65 = arith.constant 2.75573188E-6 : f32
    %118 = vector.broadcast %cst_65 : f32 to vector<8x128xf32>
    %119 = arith.addf %117, %118 : vector<8x128xf32>
    %120 = arith.mulf %119, %115 : vector<8x128xf32>
    %cst_66 = arith.constant 1.98412701E-4 : f32
    %121 = vector.broadcast %cst_66 : f32 to vector<8x128xf32>
    %122 = arith.subf %120, %121 : vector<8x128xf32>
    %123 = arith.mulf %122, %115 : vector<8x128xf32>
    %cst_67 = arith.constant 0.00833333377 : f32
    %124 = vector.broadcast %cst_67 : f32 to vector<8x128xf32>
    %125 = arith.addf %123, %124 : vector<8x128xf32>
    %126 = arith.mulf %125, %115 : vector<8x128xf32>
    %cst_68 = arith.constant 0.166666672 : f32
    %127 = vector.broadcast %cst_68 : f32 to vector<8x128xf32>
    %128 = arith.subf %126, %127 : vector<8x128xf32>
    %129 = arith.mulf %128, %115 : vector<8x128xf32>
    %cst_69 = arith.constant 1.000000e+00 : f32
    %130 = vector.broadcast %cst_69 : f32 to vector<8x128xf32>
    %131 = arith.addf %129, %130 : vector<8x128xf32>
    %132 = arith.mulf %131, %114 : vector<8x128xf32>
    %133 = arith.mulf %132, %132 : vector<8x128xf32>
    %cst_70 = arith.constant 2.000000e+00 : f32
    %134 = vector.broadcast %cst_70 : f32 to vector<8x128xf32>
    %135 = arith.mulf %134, %133 : vector<8x128xf32>
    %cst_71 = arith.constant 1.000000e+00 : f32
    %136 = vector.broadcast %cst_71 : f32 to vector<8x128xf32>
    %137 = arith.subf %136, %135 : vector<8x128xf32>
    %138 = arith.addf %96, %137 : vector<8x128xf32>
    %c0_72 = arith.constant 0 : index
    %c4_73 = arith.constant 4 : index
    %c0_74 = arith.constant 0 : index
    %c0_75 = arith.constant 0 : index
    %139 = vector.load %arg3[%c0_72, %c4_73, %c0_74, %c0_75] : memref<1x7x64x128xf32, #tpu.memory_space<vmem>>, vector<1x1x8x128xf32>
    %140 = vector.shape_cast %139 : vector<1x1x8x128xf32> to vector<8x128xf32>
    %141 = arith.subf %140, %13 : vector<8x128xf32>
    %142 = vector.broadcast %7 : vector<8x1xf32> to vector<8x128xf32>
    %143 = arith.subf %141, %142 : vector<8x128xf32>
    %cst_76 = arith.constant 0.159154937 : f32
    %144 = vector.broadcast %cst_76 : f32 to vector<8x128xf32>
    %145 = arith.mulf %143, %144 : vector<8x128xf32>
    %cst_77 = arith.constant 5.000000e-01 : f32
    %146 = vector.broadcast %cst_77 : f32 to vector<8x128xf32>
    %147 = arith.addf %145, %146 : vector<8x128xf32>
    %148 = math.floor %147 : vector<8x128xf32>
    %cst_78 = arith.constant 6.28318548 : f32
    %149 = vector.broadcast %cst_78 : f32 to vector<8x128xf32>
    %150 = arith.mulf %148, %149 : vector<8x128xf32>
    %151 = arith.subf %143, %150 : vector<8x128xf32>
    %cst_79 = arith.constant -1.74845553E-7 : f32
    %152 = vector.broadcast %cst_79 : f32 to vector<8x128xf32>
    %153 = arith.mulf %148, %152 : vector<8x128xf32>
    %154 = arith.subf %151, %153 : vector<8x128xf32>
    %cst_80 = arith.constant 5.000000e-01 : f32
    %155 = vector.broadcast %cst_80 : f32 to vector<8x128xf32>
    %156 = arith.mulf %155, %154 : vector<8x128xf32>
    %157 = arith.mulf %156, %156 : vector<8x128xf32>
    %cst_81 = arith.constant -2.50521079E-8 : f32
    %158 = vector.broadcast %cst_81 : f32 to vector<8x128xf32>
    %159 = arith.mulf %158, %157 : vector<8x128xf32>
    %cst_82 = arith.constant 2.75573188E-6 : f32
    %160 = vector.broadcast %cst_82 : f32 to vector<8x128xf32>
    %161 = arith.addf %159, %160 : vector<8x128xf32>
    %162 = arith.mulf %161, %157 : vector<8x128xf32>
    %cst_83 = arith.constant 1.98412701E-4 : f32
    %163 = vector.broadcast %cst_83 : f32 to vector<8x128xf32>
    %164 = arith.subf %162, %163 : vector<8x128xf32>
    %165 = arith.mulf %164, %157 : vector<8x128xf32>
    %cst_84 = arith.constant 0.00833333377 : f32
    %166 = vector.broadcast %cst_84 : f32 to vector<8x128xf32>
    %167 = arith.addf %165, %166 : vector<8x128xf32>
    %168 = arith.mulf %167, %157 : vector<8x128xf32>
    %cst_85 = arith.constant 0.166666672 : f32
    %169 = vector.broadcast %cst_85 : f32 to vector<8x128xf32>
    %170 = arith.subf %168, %169 : vector<8x128xf32>
    %171 = arith.mulf %170, %157 : vector<8x128xf32>
    %cst_86 = arith.constant 1.000000e+00 : f32
    %172 = vector.broadcast %cst_86 : f32 to vector<8x128xf32>
    %173 = arith.addf %171, %172 : vector<8x128xf32>
    %174 = arith.mulf %173, %156 : vector<8x128xf32>
    %175 = arith.mulf %174, %174 : vector<8x128xf32>
    %cst_87 = arith.constant 2.000000e+00 : f32
    %176 = vector.broadcast %cst_87 : f32 to vector<8x128xf32>
    %177 = arith.mulf %176, %175 : vector<8x128xf32>
    %cst_88 = arith.constant 1.000000e+00 : f32
    %178 = vector.broadcast %cst_88 : f32 to vector<8x128xf32>
    %179 = arith.subf %178, %177 : vector<8x128xf32>
    %180 = arith.addf %138, %179 : vector<8x128xf32>
    %c0_89 = arith.constant 0 : index
    %c5_90 = arith.constant 5 : index
    %c0_91 = arith.constant 0 : index
    %c0_92 = arith.constant 0 : index
    %181 = vector.load %arg3[%c0_89, %c5_90, %c0_91, %c0_92] : memref<1x7x64x128xf32, #tpu.memory_space<vmem>>, vector<1x1x8x128xf32>
    %182 = vector.shape_cast %181 : vector<1x1x8x128xf32> to vector<8x128xf32>
    %183 = arith.subf %182, %13 : vector<8x128xf32>
    %184 = vector.broadcast %9 : vector<8x1xf32> to vector<8x128xf32>
    %185 = arith.subf %183, %184 : vector<8x128xf32>
    %cst_93 = arith.constant 0.159154937 : f32
    %186 = vector.broadcast %cst_93 : f32 to vector<8x128xf32>
    %187 = arith.mulf %185, %186 : vector<8x128xf32>
    %cst_94 = arith.constant 5.000000e-01 : f32
    %188 = vector.broadcast %cst_94 : f32 to vector<8x128xf32>
    %189 = arith.addf %187, %188 : vector<8x128xf32>
    %190 = math.floor %189 : vector<8x128xf32>
    %cst_95 = arith.constant 6.28318548 : f32
    %191 = vector.broadcast %cst_95 : f32 to vector<8x128xf32>
    %192 = arith.mulf %190, %191 : vector<8x128xf32>
    %193 = arith.subf %185, %192 : vector<8x128xf32>
    %cst_96 = arith.constant -1.74845553E-7 : f32
    %194 = vector.broadcast %cst_96 : f32 to vector<8x128xf32>
    %195 = arith.mulf %190, %194 : vector<8x128xf32>
    %196 = arith.subf %193, %195 : vector<8x128xf32>
    %cst_97 = arith.constant 5.000000e-01 : f32
    %197 = vector.broadcast %cst_97 : f32 to vector<8x128xf32>
    %198 = arith.mulf %197, %196 : vector<8x128xf32>
    %199 = arith.mulf %198, %198 : vector<8x128xf32>
    %cst_98 = arith.constant -2.50521079E-8 : f32
    %200 = vector.broadcast %cst_98 : f32 to vector<8x128xf32>
    %201 = arith.mulf %200, %199 : vector<8x128xf32>
    %cst_99 = arith.constant 2.75573188E-6 : f32
    %202 = vector.broadcast %cst_99 : f32 to vector<8x128xf32>
    %203 = arith.addf %201, %202 : vector<8x128xf32>
    %204 = arith.mulf %203, %199 : vector<8x128xf32>
    %cst_100 = arith.constant 1.98412701E-4 : f32
    %205 = vector.broadcast %cst_100 : f32 to vector<8x128xf32>
    %206 = arith.subf %204, %205 : vector<8x128xf32>
    %207 = arith.mulf %206, %199 : vector<8x128xf32>
    %cst_101 = arith.constant 0.00833333377 : f32
    %208 = vector.broadcast %cst_101 : f32 to vector<8x128xf32>
    %209 = arith.addf %207, %208 : vector<8x128xf32>
    %210 = arith.mulf %209, %199 : vector<8x128xf32>
    %cst_102 = arith.constant 0.166666672 : f32
    %211 = vector.broadcast %cst_102 : f32 to vector<8x128xf32>
    %212 = arith.subf %210, %211 : vector<8x128xf32>
    %213 = arith.mulf %212, %199 : vector<8x128xf32>
    %cst_103 = arith.constant 1.000000e+00 : f32
    %214 = vector.broadcast %cst_103 : f32 to vector<8x128xf32>
    %215 = arith.addf %213, %214 : vector<8x128xf32>
    %216 = arith.mulf %215, %198 : vector<8x128xf32>
    %217 = arith.mulf %216, %216 : vector<8x128xf32>
    %cst_104 = arith.constant 2.000000e+00 : f32
    %218 = vector.broadcast %cst_104 : f32 to vector<8x128xf32>
    %219 = arith.mulf %218, %217 : vector<8x128xf32>
    %cst_105 = arith.constant 1.000000e+00 : f32
    %220 = vector.broadcast %cst_105 : f32 to vector<8x128xf32>
    %221 = arith.subf %220, %219 : vector<8x128xf32>
    %222 = arith.addf %180, %221 : vector<8x128xf32>
    %c0_106 = arith.constant 0 : index
    %c6 = arith.constant 6 : index
    %c0_107 = arith.constant 0 : index
    %c0_108 = arith.constant 0 : index
    %223 = vector.load %arg3[%c0_106, %c6, %c0_107, %c0_108] : memref<1x7x64x128xf32, #tpu.memory_space<vmem>>, vector<1x1x8x128xf32>
    %224 = vector.shape_cast %223 : vector<1x1x8x128xf32> to vector<8x128xf32>
    %225 = arith.subf %224, %13 : vector<8x128xf32>
    %226 = vector.broadcast %11 : vector<8x1xf32> to vector<8x128xf32>
    %227 = arith.subf %225, %226 : vector<8x128xf32>
    %cst_109 = arith.constant 0.159154937 : f32
    %228 = vector.broadcast %cst_109 : f32 to vector<8x128xf32>
    %229 = arith.mulf %227, %228 : vector<8x128xf32>
    %cst_110 = arith.constant 5.000000e-01 : f32
    %230 = vector.broadcast %cst_110 : f32 to vector<8x128xf32>
    %231 = arith.addf %229, %230 : vector<8x128xf32>
    %232 = math.floor %231 : vector<8x128xf32>
    %cst_111 = arith.constant 6.28318548 : f32
    %233 = vector.broadcast %cst_111 : f32 to vector<8x128xf32>
    %234 = arith.mulf %232, %233 : vector<8x128xf32>
    %235 = arith.subf %227, %234 : vector<8x128xf32>
    %cst_112 = arith.constant -1.74845553E-7 : f32
    %236 = vector.broadcast %cst_112 : f32 to vector<8x128xf32>
    %237 = arith.mulf %232, %236 : vector<8x128xf32>
    %238 = arith.subf %235, %237 : vector<8x128xf32>
    %cst_113 = arith.constant 5.000000e-01 : f32
    %239 = vector.broadcast %cst_113 : f32 to vector<8x128xf32>
    %240 = arith.mulf %239, %238 : vector<8x128xf32>
    %241 = arith.mulf %240, %240 : vector<8x128xf32>
    %cst_114 = arith.constant -2.50521079E-8 : f32
    %242 = vector.broadcast %cst_114 : f32 to vector<8x128xf32>
    %243 = arith.mulf %242, %241 : vector<8x128xf32>
    %cst_115 = arith.constant 2.75573188E-6 : f32
    %244 = vector.broadcast %cst_115 : f32 to vector<8x128xf32>
    %245 = arith.addf %243, %244 : vector<8x128xf32>
    %246 = arith.mulf %245, %241 : vector<8x128xf32>
    %cst_116 = arith.constant 1.98412701E-4 : f32
    %247 = vector.broadcast %cst_116 : f32 to vector<8x128xf32>
    %248 = arith.subf %246, %247 : vector<8x128xf32>
    %249 = arith.mulf %248, %241 : vector<8x128xf32>
    %cst_117 = arith.constant 0.00833333377 : f32
    %250 = vector.broadcast %cst_117 : f32 to vector<8x128xf32>
    %251 = arith.addf %249, %250 : vector<8x128xf32>
    %252 = arith.mulf %251, %241 : vector<8x128xf32>
    %cst_118 = arith.constant 0.166666672 : f32
    %253 = vector.broadcast %cst_118 : f32 to vector<8x128xf32>
    %254 = arith.subf %252, %253 : vector<8x128xf32>
    %255 = arith.mulf %254, %241 : vector<8x128xf32>
    %cst_119 = arith.constant 1.000000e+00 : f32
    %256 = vector.broadcast %cst_119 : f32 to vector<8x128xf32>
    %257 = arith.addf %255, %256 : vector<8x128xf32>
    %258 = arith.mulf %257, %240 : vector<8x128xf32>
    %259 = arith.mulf %258, %258 : vector<8x128xf32>
    %cst_120 = arith.constant 2.000000e+00 : f32
    %260 = vector.broadcast %cst_120 : f32 to vector<8x128xf32>
    %261 = arith.mulf %260, %259 : vector<8x128xf32>
    %cst_121 = arith.constant 1.000000e+00 : f32
    %262 = vector.broadcast %cst_121 : f32 to vector<8x128xf32>
    %263 = arith.subf %262, %261 : vector<8x128xf32>
    %264 = arith.addf %222, %263 : vector<8x128xf32>
    %cst_122 = arith.constant 0.166666672 : f32
    %265 = vector.broadcast %cst_122 : f32 to vector<8x128xf32>
    %266 = arith.mulf %264, %265 : vector<8x128xf32>
    %c0_123 = arith.constant 0 : index
    %c0_124 = arith.constant 0 : index
    %c0_125 = arith.constant 0 : index
    %267 = vector.load %arg4[%c0_123, %c0_124, %c0_125] : memref<1x64x128xf32, #tpu.memory_space<vmem>>, vector<1x8x128xf32>
    %268 = vector.shape_cast %267 : vector<1x8x128xf32> to vector<8x128xf32>
    %269 = vector.shape_cast %266 : vector<8x128xf32> to vector<1x8x128xf32>
    tpu.vector_store %arg4[%c0_123, %c0_124, %c0_125], %269 {strides = array<i32>} : memref<1x64x128xf32, #tpu.memory_space<vmem>>, vector<1x8x128xf32>,
    %c0_126 = arith.constant 0 : index
    %c0_127 = arith.constant 0 : index
    %c8 = arith.constant 8 : index
    %c0_128 = arith.constant 0 : index
    %270 = vector.load %arg2[%c0_126, %c0_127, %c8, %c0_128] : memref<1x6x64x1xf32, #tpu.memory_space<vmem>>, vector<1x1x8x1xf32>
    %271 = vector.shape_cast %270 : vector<1x1x8x1xf32> to vector<8x1xf32>
    %c0_129 = arith.constant 0 : index
    %c1_130 = arith.constant 1 : index
    %c8_131 = arith.constant 8 : index
    %c0_132 = arith.constant 0 : index
    %272 = vector.load %arg2[%c0_129, %c1_130, %c8_131, %c0_132] : memref<1x6x64x1xf32, #tpu.memory_space<vmem>>, vector<1x1x8x1xf32>
    %273 = vector.shape_cast %272 : vector<1x1x8x1xf32> to vector<8x1xf32>
    %c0_133 = arith.constant 0 : index
    %c2_134 = arith.constant 2 : index
    %c8_135 = arith.constant 8 : index
    %c0_136 = arith.constant 0 : index
    %274 = vector.load %arg2[%c0_133, %c2_134, %c8_135, %c0_136] : memref<1x6x64x1xf32, #tpu.memory_space<vmem>>, vector<1x1x8x1xf32>
    %275 = vector.shape_cast %274 : vector<1x1x8x1xf32> to vector<8x1xf32>
    %c0_137 = arith.constant 0 : index
    %c3_138 = arith.constant 3 : index
    %c8_139 = arith.constant 8 : index
    %c0_140 = arith.constant 0 : index
    %276 = vector.load %arg2[%c0_137, %c3_138, %c8_139, %c0_140] : memref<1x6x64x1xf32, #tpu.memory_space<vmem>>, vector<1x1x8x1xf32>
    %277 = vector.shape_cast %276 : vector<1x1x8x1xf32> to vector<8x1xf32>
    %c0_141 = arith.constant 0 : index
    %c4_142 = arith.constant 4 : index
    %c8_143 = arith.constant 8 : index
    %c0_144 = arith.constant 0 : index
    %278 = vector.load %arg2[%c0_141, %c4_142, %c8_143, %c0_144] : memref<1x6x64x1xf32, #tpu.memory_space<vmem>>, vector<1x1x8x1xf32>
    %279 = vector.shape_cast %278 : vector<1x1x8x1xf32> to vector<8x1xf32>
    %c0_145 = arith.constant 0 : index
    %c5_146 = arith.constant 5 : index
    %c8_147 = arith.constant 8 : index
    %c0_148 = arith.constant 0 : index
    %280 = vector.load %arg2[%c0_145, %c5_146, %c8_147, %c0_148] : memref<1x6x64x1xf32, #tpu.memory_space<vmem>>, vector<1x1x8x1xf32>
    %281 = vector.shape_cast %280 : vector<1x1x8x1xf32> to vector<8x1xf32>
    %c0_149 = arith.constant 0 : index
    %c0_150 = arith.constant 0 : index
    %c8_151 = arith.constant 8 : index
    %c0_152 = arith.constant 0 : index
    %282 = vector.load %arg3[%c0_149, %c0_150, %c8_151, %c0_152] : memref<1x7x64x128xf32, #tpu.memory_space<vmem>>, vector<1x1x8x128xf32>
    %283 = vector.shape_cast %282 : vector<1x1x8x128xf32> to vector<8x128xf32>
    %c0_153 = arith.constant 0 : index
    %c1_154 = arith.constant 1 : index
    %c8_155 = arith.constant 8 : index
    %c0_156 = arith.constant 0 : index
    %284 = vector.load %arg3[%c0_153, %c1_154, %c8_155, %c0_156] : memref<1x7x64x128xf32, #tpu.memory_space<vmem>>, vector<1x1x8x128xf32>
    %285 = vector.shape_cast %284 : vector<1x1x8x128xf32> to vector<8x128xf32>
    %286 = arith.subf %285, %283 : vector<8x128xf32>
    %287 = vector.broadcast %271 : vector<8x1xf32> to vector<8x128xf32>
    %288 = arith.subf %286, %287 : vector<8x128xf32>
    %cst_157 = arith.constant 0.159154937 : f32
    %289 = vector.broadcast %cst_157 : f32 to vector<8x128xf32>
    %290 = arith.mulf %288, %289 : vector<8x128xf32>
    %cst_158 = arith.constant 5.000000e-01 : f32
    %291 = vector.broadcast %cst_158 : f32 to vector<8x128xf32>
    %292 = arith.addf %290, %291 : vector<8x128xf32>
    %293 = math.floor %292 : vector<8x128xf32>
    %cst_159 = arith.constant 6.28318548 : f32
    %294 = vector.broadcast %cst_159 : f32 to vector<8x128xf32>
    %295 = arith.mulf %293, %294 : vector<8x128xf32>
    %296 = arith.subf %288, %295 : vector<8x128xf32>
    %cst_160 = arith.constant -1.74845553E-7 : f32
    %297 = vector.broadcast %cst_160 : f32 to vector<8x128xf32>
    %298 = arith.mulf %293, %297 : vector<8x128xf32>
    %299 = arith.subf %296, %298 : vector<8x128xf32>
    %cst_161 = arith.constant 5.000000e-01 : f32
    %300 = vector.broadcast %cst_161 : f32 to vector<8x128xf32>
    %301 = arith.mulf %300, %299 : vector<8x128xf32>
    %302 = arith.mulf %301, %301 : vector<8x128xf32>
    %cst_162 = arith.constant -2.50521079E-8 : f32
    %303 = vector.broadcast %cst_162 : f32 to vector<8x128xf32>
    %304 = arith.mulf %303, %302 : vector<8x128xf32>
    %cst_163 = arith.constant 2.75573188E-6 : f32
    %305 = vector.broadcast %cst_163 : f32 to vector<8x128xf32>
    %306 = arith.addf %304, %305 : vector<8x128xf32>
    %307 = arith.mulf %306, %302 : vector<8x128xf32>
    %cst_164 = arith.constant 1.98412701E-4 : f32
    %308 = vector.broadcast %cst_164 : f32 to vector<8x128xf32>
    %309 = arith.subf %307, %308 : vector<8x128xf32>
    %310 = arith.mulf %309, %302 : vector<8x128xf32>
    %cst_165 = arith.constant 0.00833333377 : f32
    %311 = vector.broadcast %cst_165 : f32 to vector<8x128xf32>
    %312 = arith.addf %310, %311 : vector<8x128xf32>
    %313 = arith.mulf %312, %302 : vector<8x128xf32>
    %cst_166 = arith.constant 0.166666672 : f32
    %314 = vector.broadcast %cst_166 : f32 to vector<8x128xf32>
    %315 = arith.subf %313, %314 : vector<8x128xf32>
    %316 = arith.mulf %315, %302 : vector<8x128xf32>
    %cst_167 = arith.constant 1.000000e+00 : f32
    %317 = vector.broadcast %cst_167 : f32 to vector<8x128xf32>
    %318 = arith.addf %316, %317 : vector<8x128xf32>
    %319 = arith.mulf %318, %301 : vector<8x128xf32>
    %320 = arith.mulf %319, %319 : vector<8x128xf32>
    %cst_168 = arith.constant 2.000000e+00 : f32
    %321 = vector.broadcast %cst_168 : f32 to vector<8x128xf32>
    %322 = arith.mulf %321, %320 : vector<8x128xf32>
    %cst_169 = arith.constant 1.000000e+00 : f32
    %323 = vector.broadcast %cst_169 : f32 to vector<8x128xf32>
    %324 = arith.subf %323, %322 : vector<8x128xf32>
    %c0_170 = arith.constant 0 : index
    %c2_171 = arith.constant 2 : index
    %c8_172 = arith.constant 8 : index
    %c0_173 = arith.constant 0 : index
    %325 = vector.load %arg3[%c0_170, %c2_171, %c8_172, %c0_173] : memref<1x7x64x128xf32, #tpu.memory_space<vmem>>, vector<1x1x8x128xf32>
    %326 = vector.shape_cast %325 : vector<1x1x8x128xf32> to vector<8x128xf32>
    %327 = arith.subf %326, %283 : vector<8x128xf32>
    %328 = vector.broadcast %273 : vector<8x1xf32> to vector<8x128xf32>
    %329 = arith.subf %327, %328 : vector<8x128xf32>
    %cst_174 = arith.constant 0.159154937 : f32
    %330 = vector.broadcast %cst_174 : f32 to vector<8x128xf32>
    %331 = arith.mulf %329, %330 : vector<8x128xf32>
    %cst_175 = arith.constant 5.000000e-01 : f32
    %332 = vector.broadcast %cst_175 : f32 to vector<8x128xf32>
    %333 = arith.addf %331, %332 : vector<8x128xf32>
    %334 = math.floor %333 : vector<8x128xf32>
    %cst_176 = arith.constant 6.28318548 : f32
    %335 = vector.broadcast %cst_176 : f32 to vector<8x128xf32>
    %336 = arith.mulf %334, %335 : vector<8x128xf32>
    %337 = arith.subf %329, %336 : vector<8x128xf32>
    %cst_177 = arith.constant -1.74845553E-7 : f32
    %338 = vector.broadcast %cst_177 : f32 to vector<8x128xf32>
    %339 = arith.mulf %334, %338 : vector<8x128xf32>
    %340 = arith.subf %337, %339 : vector<8x128xf32>
    %cst_178 = arith.constant 5.000000e-01 : f32
    %341 = vector.broadcast %cst_178 : f32 to vector<8x128xf32>
    %342 = arith.mulf %341, %340 : vector<8x128xf32>
    %343 = arith.mulf %342, %342 : vector<8x128xf32>
    %cst_179 = arith.constant -2.50521079E-8 : f32
    %344 = vector.broadcast %cst_179 : f32 to vector<8x128xf32>
    %345 = arith.mulf %344, %343 : vector<8x128xf32>
    %cst_180 = arith.constant 2.75573188E-6 : f32
    %346 = vector.broadcast %cst_180 : f32 to vector<8x128xf32>
    %347 = arith.addf %345, %346 : vector<8x128xf32>
    %348 = arith.mulf %347, %343 : vector<8x128xf32>
    %cst_181 = arith.constant 1.98412701E-4 : f32
    %349 = vector.broadcast %cst_181 : f32 to vector<8x128xf32>
    %350 = arith.subf %348, %349 : vector<8x128xf32>
    %351 = arith.mulf %350, %343 : vector<8x128xf32>
    %cst_182 = arith.constant 0.00833333377 : f32
    %352 = vector.broadcast %cst_182 : f32 to vector<8x128xf32>
    %353 = arith.addf %351, %352 : vector<8x128xf32>
    %354 = arith.mulf %353, %343 : vector<8x128xf32>
    %cst_183 = arith.constant 0.166666672 : f32
    %355 = vector.broadcast %cst_183 : f32 to vector<8x128xf32>
    %356 = arith.subf %354, %355 : vector<8x128xf32>
    %357 = arith.mulf %356, %343 : vector<8x128xf32>
    %cst_184 = arith.constant 1.000000e+00 : f32
    %358 = vector.broadcast %cst_184 : f32 to vector<8x128xf32>
    %359 = arith.addf %357, %358 : vector<8x128xf32>
    %360 = arith.mulf %359, %342 : vector<8x128xf32>
    %361 = arith.mulf %360, %360 : vector<8x128xf32>
    %cst_185 = arith.constant 2.000000e+00 : f32
    %362 = vector.broadcast %cst_185 : f32 to vector<8x128xf32>
    %363 = arith.mulf %362, %361 : vector<8x128xf32>
    %cst_186 = arith.constant 1.000000e+00 : f32
    %364 = vector.broadcast %cst_186 : f32 to vector<8x128xf32>
    %365 = arith.subf %364, %363 : vector<8x128xf32>
    %366 = arith.addf %324, %365 : vector<8x128xf32>
    %c0_187 = arith.constant 0 : index
    %c3_188 = arith.constant 3 : index
    %c8_189 = arith.constant 8 : index
    %c0_190 = arith.constant 0 : index
    %367 = vector.load %arg3[%c0_187, %c3_188, %c8_189, %c0_190] : memref<1x7x64x128xf32, #tpu.memory_space<vmem>>, vector<1x1x8x128xf32>
    %368 = vector.shape_cast %367 : vector<1x1x8x128xf32> to vector<8x128xf32>
    %369 = arith.subf %368, %283 : vector<8x128xf32>
    %370 = vector.broadcast %275 : vector<8x1xf32> to vector<8x128xf32>
    %371 = arith.subf %369, %370 : vector<8x128xf32>
    %cst_191 = arith.constant 0.159154937 : f32
    %372 = vector.broadcast %cst_191 : f32 to vector<8x128xf32>
    %373 = arith.mulf %371, %372 : vector<8x128xf32>
    %cst_192 = arith.constant 5.000000e-01 : f32
    %374 = vector.broadcast %cst_192 : f32 to vector<8x128xf32>
    %375 = arith.addf %373, %374 : vector<8x128xf32>
    %376 = math.floor %375 : vector<8x128xf32>
    %cst_193 = arith.constant 6.28318548 : f32
    %377 = vector.broadcast %cst_193 : f32 to vector<8x128xf32>
    %378 = arith.mulf %376, %377 : vector<8x128xf32>
    %379 = arith.subf %371, %378 : vector<8x128xf32>
    %cst_194 = arith.constant -1.74845553E-7 : f32
    %380 = vector.broadcast %cst_194 : f32 to vector<8x128xf32>
    %381 = arith.mulf %376, %380 : vector<8x128xf32>
    %382 = arith.subf %379, %381 : vector<8x128xf32>
    %cst_195 = arith.constant 5.000000e-01 : f32
    %383 = vector.broadcast %cst_195 : f32 to vector<8x128xf32>
    %384 = arith.mulf %383, %382 : vector<8x128xf32>
    %385 = arith.mulf %384, %384 : vector<8x128xf32>
    %cst_196 = arith.constant -2.50521079E-8 : f32
    %386 = vector.broadcast %cst_196 : f32 to vector<8x128xf32>
    %387 = arith.mulf %386, %385 : vector<8x128xf32>
    %cst_197 = arith.constant 2.75573188E-6 : f32
    %388 = vector.broadcast %cst_197 : f32 to vector<8x128xf32>
    %389 = arith.addf %387, %388 : vector<8x128xf32>
    %390 = arith.mulf %389, %385 : vector<8x128xf32>
    %cst_198 = arith.constant 1.98412701E-4 : f32
    %391 = vector.broadcast %cst_198 : f32 to vector<8x128xf32>
    %392 = arith.subf %390, %391 : vector<8x128xf32>
    %393 = arith.mulf %392, %385 : vector<8x128xf32>
    %cst_199 = arith.constant 0.00833333377 : f32
    %394 = vector.broadcast %cst_199 : f32 to vector<8x128xf32>
    %395 = arith.addf %393, %394 : vector<8x128xf32>
    %396 = arith.mulf %395, %385 : vector<8x128xf32>
    %cst_200 = arith.constant 0.166666672 : f32
    %397 = vector.broadcast %cst_200 : f32 to vector<8x128xf32>
    %398 = arith.subf %396, %397 : vector<8x128xf32>
    %399 = arith.mulf %398, %385 : vector<8x128xf32>
    %cst_201 = arith.constant 1.000000e+00 : f32
    %400 = vector.broadcast %cst_201 : f32 to vector<8x128xf32>
    %401 = arith.addf %399, %400 : vector<8x128xf32>
    %402 = arith.mulf %401, %384 : vector<8x128xf32>
    %403 = arith.mulf %402, %402 : vector<8x128xf32>
    %cst_202 = arith.constant 2.000000e+00 : f32
    %404 = vector.broadcast %cst_202 : f32 to vector<8x128xf32>
    %405 = arith.mulf %404, %403 : vector<8x128xf32>
    %cst_203 = arith.constant 1.000000e+00 : f32
    %406 = vector.broadcast %cst_203 : f32 to vector<8x128xf32>
    %407 = arith.subf %406, %405 : vector<8x128xf32>
    %408 = arith.addf %366, %407 : vector<8x128xf32>
    %c0_204 = arith.constant 0 : index
    %c4_205 = arith.constant 4 : index
    %c8_206 = arith.constant 8 : index
    %c0_207 = arith.constant 0 : index
    %409 = vector.load %arg3[%c0_204, %c4_205, %c8_206, %c0_207] : memref<1x7x64x128xf32, #tpu.memory_space<vmem>>, vector<1x1x8x128xf32>
    %410 = vector.shape_cast %409 : vector<1x1x8x128xf32> to vector<8x128xf32>
    %411 = arith.subf %410, %283 : vector<8x128xf32>
    %412 = vector.broadcast %277 : vector<8x1xf32> to vector<8x128xf32>
    %413 = arith.subf %411, %412 : vector<8x128xf32>
    %cst_208 = arith.constant 0.159154937 : f32
    %414 = vector.broadcast %cst_208 : f32 to vector<8x128xf32>
    %415 = arith.mulf %413, %414 : vector<8x128xf32>
    %cst_209 = arith.constant 5.000000e-01 : f32
    %416 = vector.broadcast %cst_209 : f32 to vector<8x128xf32>
    %417 = arith.addf %415, %416 : vector<8x128xf32>
    %418 = math.floor %417 : vector<8x128xf32>
    %cst_210 = arith.constant 6.28318548 : f32
    %419 = vector.broadcast %cst_210 : f32 to vector<8x128xf32>
    %420 = arith.mulf %418, %419 : vector<8x128xf32>
    %421 = arith.subf %413, %420 : vector<8x128xf32>
    %cst_211 = arith.constant -1.74845553E-7 : f32
    %422 = vector.broadcast %cst_211 : f32 to vector<8x128xf32>
    %423 = arith.mulf %418, %422 : vector<8x128xf32>
    %424 = arith.subf %421, %423 : vector<8x128xf32>
    %cst_212 = arith.constant 5.000000e-01 : f32
    %425 = vector.broadcast %cst_212 : f32 to vector<8x128xf32>
    %426 = arith.mulf %425, %424 : vector<8x128xf32>
    %427 = arith.mulf %426, %426 : vector<8x128xf32>
    %cst_213 = arith.constant -2.50521079E-8 : f32
    %428 = vector.broadcast %cst_213 : f32 to vector<8x128xf32>
    %429 = arith.mulf %428, %427 : vector<8x128xf32>
    %cst_214 = arith.constant 2.75573188E-6 : f32
    %430 = vector.broadcast %cst_214 : f32 to vector<8x128xf32>
    %431 = arith.addf %429, %430 : vector<8x128xf32>
    %432 = arith.mulf %431, %427 : vector<8x128xf32>
    %cst_215 = arith.constant 1.98412701E-4 : f32
    %433 = vector.broadcast %cst_215 : f32 to vector<8x128xf32>
    %434 = arith.subf %432, %433 : vector<8x128xf32>
    %435 = arith.mulf %434, %427 : vector<8x128xf32>
    %cst_216 = arith.constant 0.00833333377 : f32
    %436 = vector.broadcast %cst_216 : f32 to vector<8x128xf32>
    %437 = arith.addf %435, %436 : vector<8x128xf32>
    %438 = arith.mulf %437, %427 : vector<8x128xf32>
    %cst_217 = arith.constant 0.166666672 : f32
    %439 = vector.broadcast %cst_217 : f32 to vector<8x128xf32>
    %440 = arith.subf %438, %439 : vector<8x128xf32>
    %441 = arith.mulf %440, %427 : vector<8x128xf32>
    %cst_218 = arith.constant 1.000000e+00 : f32
    %442 = vector.broadcast %cst_218 : f32 to vector<8x128xf32>
    %443 = arith.addf %441, %442 : vector<8x128xf32>
    %444 = arith.mulf %443, %426 : vector<8x128xf32>
    %445 = arith.mulf %444, %444 : vector<8x128xf32>
    %cst_219 = arith.constant 2.000000e+00 : f32
    %446 = vector.broadcast %cst_219 : f32 to vector<8x128xf32>
    %447 = arith.mulf %446, %445 : vector<8x128xf32>
    %cst_220 = arith.constant 1.000000e+00 : f32
    %448 = vector.broadcast %cst_220 : f32 to vector<8x128xf32>
    %449 = arith.subf %448, %447 : vector<8x128xf32>
    %450 = arith.addf %408, %449 : vector<8x128xf32>
    %c0_221 = arith.constant 0 : index
    %c5_222 = arith.constant 5 : index
    %c8_223 = arith.constant 8 : index
    %c0_224 = arith.constant 0 : index
    %451 = vector.load %arg3[%c0_221, %c5_222, %c8_223, %c0_224] : memref<1x7x64x128xf32, #tpu.memory_space<vmem>>, vector<1x1x8x128xf32>
    %452 = vector.shape_cast %451 : vector<1x1x8x128xf32> to vector<8x128xf32>
    %453 = arith.subf %452, %283 : vector<8x128xf32>
    %454 = vector.broadcast %279 : vector<8x1xf32> to vector<8x128xf32>
    %455 = arith.subf %453, %454 : vector<8x128xf32>
    %cst_225 = arith.constant 0.159154937 : f32
    %456 = vector.broadcast %cst_225 : f32 to vector<8x128xf32>
    %457 = arith.mulf %455, %456 : vector<8x128xf32>
    %cst_226 = arith.constant 5.000000e-01 : f32
    %458 = vector.broadcast %cst_226 : f32 to vector<8x128xf32>
    %459 = arith.addf %457, %458 : vector<8x128xf32>
    %460 = math.floor %459 : vector<8x128xf32>
    %cst_227 = arith.constant 6.28318548 : f32
    %461 = vector.broadcast %cst_227 : f32 to vector<8x128xf32>
    %462 = arith.mulf %460, %461 : vector<8x128xf32>
    %463 = arith.subf %455, %462 : vector<8x128xf32>
    %cst_228 = arith.constant -1.74845553E-7 : f32
    %464 = vector.broadcast %cst_228 : f32 to vector<8x128xf32>
    %465 = arith.mulf %460, %464 : vector<8x128xf32>
    %466 = arith.subf %463, %465 : vector<8x128xf32>
    %cst_229 = arith.constant 5.000000e-01 : f32
    %467 = vector.broadcast %cst_229 : f32 to vector<8x128xf32>
    %468 = arith.mulf %467, %466 : vector<8x128xf32>
    %469 = arith.mulf %468, %468 : vector<8x128xf32>
    %cst_230 = arith.constant -2.50521079E-8 : f32
    %470 = vector.broadcast %cst_230 : f32 to vector<8x128xf32>
    %471 = arith.mulf %470, %469 : vector<8x128xf32>
    %cst_231 = arith.constant 2.75573188E-6 : f32
    %472 = vector.broadcast %cst_231 : f32 to vector<8x128xf32>
    %473 = arith.addf %471, %472 : vector<8x128xf32>
    %474 = arith.mulf %473, %469 : vector<8x128xf32>
    %cst_232 = arith.constant 1.98412701E-4 : f32
    %475 = vector.broadcast %cst_232 : f32 to vector<8x128xf32>
    %476 = arith.subf %474, %475 : vector<8x128xf32>
    %477 = arith.mulf %476, %469 : vector<8x128xf32>
    %cst_233 = arith.constant 0.00833333377 : f32
    %478 = vector.broadcast %cst_233 : f32 to vector<8x128xf32>
    %479 = arith.addf %477, %478 : vector<8x128xf32>
    %480 = arith.mulf %479, %469 : vector<8x128xf32>
    %cst_234 = arith.constant 0.166666672 : f32
    %481 = vector.broadcast %cst_234 : f32 to vector<8x128xf32>
    %482 = arith.subf %480, %481 : vector<8x128xf32>
    %483 = arith.mulf %482, %469 : vector<8x128xf32>
    %cst_235 = arith.constant 1.000000e+00 : f32
    %484 = vector.broadcast %cst_235 : f32 to vector<8x128xf32>
    %485 = arith.addf %483, %484 : vector<8x128xf32>
    %486 = arith.mulf %485, %468 : vector<8x128xf32>
    %487 = arith.mulf %486, %486 : vector<8x128xf32>
    %cst_236 = arith.constant 2.000000e+00 : f32
    %488 = vector.broadcast %cst_236 : f32 to vector<8x128xf32>
    %489 = arith.mulf %488, %487 : vector<8x128xf32>
    %cst_237 = arith.constant 1.000000e+00 : f32
    %490 = vector.broadcast %cst_237 : f32 to vector<8x128xf32>
    %491 = arith.subf %490, %489 : vector<8x128xf32>
    %492 = arith.addf %450, %491 : vector<8x128xf32>
    %c0_238 = arith.constant 0 : index
    %c6_239 = arith.constant 6 : index
    %c8_240 = arith.constant 8 : index
    %c0_241 = arith.constant 0 : index
    %493 = vector.load %arg3[%c0_238, %c6_239, %c8_240, %c0_241] : memref<1x7x64x128xf32, #tpu.memory_space<vmem>>, vector<1x1x8x128xf32>
    %494 = vector.shape_cast %493 : vector<1x1x8x128xf32> to vector<8x128xf32>
    %495 = arith.subf %494, %283 : vector<8x128xf32>
    %496 = vector.broadcast %281 : vector<8x1xf32> to vector<8x128xf32>
    %497 = arith.subf %495, %496 : vector<8x128xf32>
    %cst_242 = arith.constant 0.159154937 : f32
    %498 = vector.broadcast %cst_242 : f32 to vector<8x128xf32>
    %499 = arith.mulf %497, %498 : vector<8x128xf32>
    %cst_243 = arith.constant 5.000000e-01 : f32
    %500 = vector.broadcast %cst_243 : f32 to vector<8x128xf32>
    %501 = arith.addf %499, %500 : vector<8x128xf32>
    %502 = math.floor %501 : vector<8x128xf32>
    %cst_244 = arith.constant 6.28318548 : f32
    %503 = vector.broadcast %cst_244 : f32 to vector<8x128xf32>
    %504 = arith.mulf %502, %503 : vector<8x128xf32>
    %505 = arith.subf %497, %504 : vector<8x128xf32>
    %cst_245 = arith.constant -1.74845553E-7 : f32
    %506 = vector.broadcast %cst_245 : f32 to vector<8x128xf32>
    %507 = arith.mulf %502, %506 : vector<8x128xf32>
    %508 = arith.subf %505, %507 : vector<8x128xf32>
    %cst_246 = arith.constant 5.000000e-01 : f32
    %509 = vector.broadcast %cst_246 : f32 to vector<8x128xf32>
    %510 = arith.mulf %509, %508 : vector<8x128xf32>
    %511 = arith.mulf %510, %510 : vector<8x128xf32>
    %cst_247 = arith.constant -2.50521079E-8 : f32
    %512 = vector.broadcast %cst_247 : f32 to vector<8x128xf32>
    %513 = arith.mulf %512, %511 : vector<8x128xf32>
    %cst_248 = arith.constant 2.75573188E-6 : f32
    %514 = vector.broadcast %cst_248 : f32 to vector<8x128xf32>
    %515 = arith.addf %513, %514 : vector<8x128xf32>
    %516 = arith.mulf %515, %511 : vector<8x128xf32>
    %cst_249 = arith.constant 1.98412701E-4 : f32
    %517 = vector.broadcast %cst_249 : f32 to vector<8x128xf32>
    %518 = arith.subf %516, %517 : vector<8x128xf32>
    %519 = arith.mulf %518, %511 : vector<8x128xf32>
    %cst_250 = arith.constant 0.00833333377 : f32
    %520 = vector.broadcast %cst_250 : f32 to vector<8x128xf32>
    %521 = arith.addf %519, %520 : vector<8x128xf32>
    %522 = arith.mulf %521, %511 : vector<8x128xf32>
    %cst_251 = arith.constant 0.166666672 : f32
    %523 = vector.broadcast %cst_251 : f32 to vector<8x128xf32>
    %524 = arith.subf %522, %523 : vector<8x128xf32>
    %525 = arith.mulf %524, %511 : vector<8x128xf32>
    %cst_252 = arith.constant 1.000000e+00 : f32
    %526 = vector.broadcast %cst_252 : f32 to vector<8x128xf32>
    %527 = arith.addf %525, %526 : vector<8x128xf32>
    %528 = arith.mulf %527, %510 : vector<8x128xf32>
    %529 = arith.mulf %528, %528 : vector<8x128xf32>
    %cst_253 = arith.constant 2.000000e+00 : f32
    %530 = vector.broadcast %cst_253 : f32 to vector<8x128xf32>
    %531 = arith.mulf %530, %529 : vector<8x128xf32>
    %cst_254 = arith.constant 1.000000e+00 : f32
    %532 = vector.broadcast %cst_254 : f32 to vector<8x128xf32>
    %533 = arith.subf %532, %531 : vector<8x128xf32>
    %534 = arith.addf %492, %533 : vector<8x128xf32>
    %cst_255 = arith.constant 0.166666672 : f32
    %535 = vector.broadcast %cst_255 : f32 to vector<8x128xf32>
    %536 = arith.mulf %534, %535 : vector<8x128xf32>
    %c0_256 = arith.constant 0 : index
    %c8_257 = arith.constant 8 : index
    %c0_258 = arith.constant 0 : index
    %537 = vector.load %arg4[%c0_256, %c8_257, %c0_258] : memref<1x64x128xf32, #tpu.memory_space<vmem>>, vector<1x8x128xf32>
    %538 = vector.shape_cast %537 : vector<1x8x128xf32> to vector<8x128xf32>
    %539 = vector.shape_cast %536 : vector<8x128xf32> to vector<1x8x128xf32>
    tpu.vector_store %arg4[%c0_256, %c8_257, %c0_258], %539 {strides = array<i32>} : memref<1x64x128xf32, #tpu.memory_space<vmem>>, vector<1x8x128xf32>,
    %c0_259 = arith.constant 0 : index
    %c0_260 = arith.constant 0 : index
    %c16 = arith.constant 16 : index
    %c0_261 = arith.constant 0 : index
    %540 = vector.load %arg2[%c0_259, %c0_260, %c16, %c0_261] : memref<1x6x64x1xf32, #tpu.memory_space<vmem>>, vector<1x1x8x1xf32>
    %541 = vector.shape_cast %540 : vector<1x1x8x1xf32> to vector<8x1xf32>
    %c0_262 = arith.constant 0 : index
    %c1_263 = arith.constant 1 : index
    %c16_264 = arith.constant 16 : index
    %c0_265 = arith.constant 0 : index
    %542 = vector.load %arg2[%c0_262, %c1_263, %c16_264, %c0_265] : memref<1x6x64x1xf32, #tpu.memory_space<vmem>>, vector<1x1x8x1xf32>
    %543 = vector.shape_cast %542 : vector<1x1x8x1xf32> to vector<8x1xf32>
    %c0_266 = arith.constant 0 : index
    %c2_267 = arith.constant 2 : index
    %c16_268 = arith.constant 16 : index
    %c0_269 = arith.constant 0 : index
    %544 = vector.load %arg2[%c0_266, %c2_267, %c16_268, %c0_269] : memref<1x6x64x1xf32, #tpu.memory_space<vmem>>, vector<1x1x8x1xf32>
    %545 = vector.shape_cast %544 : vector<1x1x8x1xf32> to vector<8x1xf32>
    %c0_270 = arith.constant 0 : index
    %c3_271 = arith.constant 3 : index
    %c16_272 = arith.constant 16 : index
    %c0_273 = arith.constant 0 : index
    %546 = vector.load %arg2[%c0_270, %c3_271, %c16_272, %c0_273] : memref<1x6x64x1xf32, #tpu.memory_space<vmem>>, vector<1x1x8x1xf32>
    %547 = vector.shape_cast %546 : vector<1x1x8x1xf32> to vector<8x1xf32>
    %c0_274 = arith.constant 0 : index
    %c4_275 = arith.constant 4 : index
    %c16_276 = arith.constant 16 : index
    %c0_277 = arith.constant 0 : index
    %548 = vector.load %arg2[%c0_274, %c4_275, %c16_276, %c0_277] : memref<1x6x64x1xf32, #tpu.memory_space<vmem>>, vector<1x1x8x1xf32>
    %549 = vector.shape_cast %548 : vector<1x1x8x1xf32> to vector<8x1xf32>
    %c0_278 = arith.constant 0 : index
    %c5_279 = arith.constant 5 : index
    %c16_280 = arith.constant 16 : index
    %c0_281 = arith.constant 0 : index
    %550 = vector.load %arg2[%c0_278, %c5_279, %c16_280, %c0_281] : memref<1x6x64x1xf32, #tpu.memory_space<vmem>>, vector<1x1x8x1xf32>
    %551 = vector.shape_cast %550 : vector<1x1x8x1xf32> to vector<8x1xf32>
    %c0_282 = arith.constant 0 : index
    %c0_283 = arith.constant 0 : index
    %c16_284 = arith.constant 16 : index
    %c0_285 = arith.constant 0 : index
    %552 = vector.load %arg3[%c0_282, %c0_283, %c16_284, %c0_285] : memref<1x7x64x128xf32, #tpu.memory_space<vmem>>, vector<1x1x8x128xf32>
    %553 = vector.shape_cast %552 : vector<1x1x8x128xf32> to vector<8x128xf32>
    %c0_286 = arith.constant 0 : index
    %c1_287 = arith.constant 1 : index
    %c16_288 = arith.constant 16 : index
    %c0_289 = arith.constant 0 : index
    %554 = vector.load %arg3[%c0_286, %c1_287, %c16_288, %c0_289] : memref<1x7x64x128xf32, #tpu.memory_space<vmem>>, vector<1x1x8x128xf32>
    %555 = vector.shape_cast %554 : vector<1x1x8x128xf32> to vector<8x128xf32>
    %556 = arith.subf %555, %553 : vector<8x128xf32>
    %557 = vector.broadcast %541 : vector<8x1xf32> to vector<8x128xf32>
    %558 = arith.subf %556, %557 : vector<8x128xf32>
    %cst_290 = arith.constant 0.159154937 : f32
    %559 = vector.broadcast %cst_290 : f32 to vector<8x128xf32>
    %560 = arith.mulf %558, %559 : vector<8x128xf32>
    %cst_291 = arith.constant 5.000000e-01 : f32
    %561 = vector.broadcast %cst_291 : f32 to vector<8x128xf32>
    %562 = arith.addf %560, %561 : vector<8x128xf32>
    %563 = math.floor %562 : vector<8x128xf32>
    %cst_292 = arith.constant 6.28318548 : f32
    %564 = vector.broadcast %cst_292 : f32 to vector<8x128xf32>
    %565 = arith.mulf %563, %564 : vector<8x128xf32>
    %566 = arith.subf %558, %565 : vector<8x128xf32>
    %cst_293 = arith.constant -1.74845553E-7 : f32
    %567 = vector.broadcast %cst_293 : f32 to vector<8x128xf32>
    %568 = arith.mulf %563, %567 : vector<8x128xf32>
    %569 = arith.subf %566, %568 : vector<8x128xf32>
    %cst_294 = arith.constant 5.000000e-01 : f32
    %570 = vector.broadcast %cst_294 : f32 to vector<8x128xf32>
    %571 = arith.mulf %570, %569 : vector<8x128xf32>
    %572 = arith.mulf %571, %571 : vector<8x128xf32>
    %cst_295 = arith.constant -2.50521079E-8 : f32
    %573 = vector.broadcast %cst_295 : f32 to vector<8x128xf32>
    %574 = arith.mulf %573, %572 : vector<8x128xf32>
    %cst_296 = arith.constant 2.75573188E-6 : f32
    %575 = vector.broadcast %cst_296 : f32 to vector<8x128xf32>
    %576 = arith.addf %574, %575 : vector<8x128xf32>
    %577 = arith.mulf %576, %572 : vector<8x128xf32>
    %cst_297 = arith.constant 1.98412701E-4 : f32
    %578 = vector.broadcast %cst_297 : f32 to vector<8x128xf32>
    %579 = arith.subf %577, %578 : vector<8x128xf32>
    %580 = arith.mulf %579, %572 : vector<8x128xf32>
    %cst_298 = arith.constant 0.00833333377 : f32
    %581 = vector.broadcast %cst_298 : f32 to vector<8x128xf32>
    %582 = arith.addf %580, %581 : vector<8x128xf32>
    %583 = arith.mulf %582, %572 : vector<8x128xf32>
    %cst_299 = arith.constant 0.166666672 : f32
    %584 = vector.broadcast %cst_299 : f32 to vector<8x128xf32>
    %585 = arith.subf %583, %584 : vector<8x128xf32>
    %586 = arith.mulf %585, %572 : vector<8x128xf32>
    %cst_300 = arith.constant 1.000000e+00 : f32
    %587 = vector.broadcast %cst_300 : f32 to vector<8x128xf32>
    %588 = arith.addf %586, %587 : vector<8x128xf32>
    %589 = arith.mulf %588, %571 : vector<8x128xf32>
    %590 = arith.mulf %589, %589 : vector<8x128xf32>
    %cst_301 = arith.constant 2.000000e+00 : f32
    %591 = vector.broadcast %cst_301 : f32 to vector<8x128xf32>
    %592 = arith.mulf %591, %590 : vector<8x128xf32>
    %cst_302 = arith.constant 1.000000e+00 : f32
    %593 = vector.broadcast %cst_302 : f32 to vector<8x128xf32>
    %594 = arith.subf %593, %592 : vector<8x128xf32>
    %c0_303 = arith.constant 0 : index
    %c2_304 = arith.constant 2 : index
    %c16_305 = arith.constant 16 : index
    %c0_306 = arith.constant 0 : index
    %595 = vector.load %arg3[%c0_303, %c2_304, %c16_305, %c0_306] : memref<1x7x64x128xf32, #tpu.memory_space<vmem>>, vector<1x1x8x128xf32>
    %596 = vector.shape_cast %595 : vector<1x1x8x128xf32> to vector<8x128xf32>
    %597 = arith.subf %596, %553 : vector<8x128xf32>
    %598 = vector.broadcast %543 : vector<8x1xf32> to vector<8x128xf32>
    %599 = arith.subf %597, %598 : vector<8x128xf32>
    %cst_307 = arith.constant 0.159154937 : f32
    %600 = vector.broadcast %cst_307 : f32 to vector<8x128xf32>
    %601 = arith.mulf %599, %600 : vector<8x128xf32>
    %cst_308 = arith.constant 5.000000e-01 : f32
    %602 = vector.broadcast %cst_308 : f32 to vector<8x128xf32>
    %603 = arith.addf %601, %602 : vector<8x128xf32>
    %604 = math.floor %603 : vector<8x128xf32>
    %cst_309 = arith.constant 6.28318548 : f32
    %605 = vector.broadcast %cst_309 : f32 to vector<8x128xf32>
    %606 = arith.mulf %604, %605 : vector<8x128xf32>
    %607 = arith.subf %599, %606 : vector<8x128xf32>
    %cst_310 = arith.constant -1.74845553E-7 : f32
    %608 = vector.broadcast %cst_310 : f32 to vector<8x128xf32>
    %609 = arith.mulf %604, %608 : vector<8x128xf32>
    %610 = arith.subf %607, %609 : vector<8x128xf32>
    %cst_311 = arith.constant 5.000000e-01 : f32
    %611 = vector.broadcast %cst_311 : f32 to vector<8x128xf32>
    %612 = arith.mulf %611, %610 : vector<8x128xf32>
    %613 = arith.mulf %612, %612 : vector<8x128xf32>
    %cst_312 = arith.constant -2.50521079E-8 : f32
    %614 = vector.broadcast %cst_312 : f32 to vector<8x128xf32>
    %615 = arith.mulf %614, %613 : vector<8x128xf32>
    %cst_313 = arith.constant 2.75573188E-6 : f32
    %616 = vector.broadcast %cst_313 : f32 to vector<8x128xf32>
    %617 = arith.addf %615, %616 : vector<8x128xf32>
    %618 = arith.mulf %617, %613 : vector<8x128xf32>
    %cst_314 = arith.constant 1.98412701E-4 : f32
    %619 = vector.broadcast %cst_314 : f32 to vector<8x128xf32>
    %620 = arith.subf %618, %619 : vector<8x128xf32>
    %621 = arith.mulf %620, %613 : vector<8x128xf32>
    %cst_315 = arith.constant 0.00833333377 : f32
    %622 = vector.broadcast %cst_315 : f32 to vector<8x128xf32>
    %623 = arith.addf %621, %622 : vector<8x128xf32>
    %624 = arith.mulf %623, %613 : vector<8x128xf32>
    %cst_316 = arith.constant 0.166666672 : f32
    %625 = vector.broadcast %cst_316 : f32 to vector<8x128xf32>
    %626 = arith.subf %624, %625 : vector<8x128xf32>
    %627 = arith.mulf %626, %613 : vector<8x128xf32>
    %cst_317 = arith.constant 1.000000e+00 : f32
    %628 = vector.broadcast %cst_317 : f32 to vector<8x128xf32>
    %629 = arith.addf %627, %628 : vector<8x128xf32>
    %630 = arith.mulf %629, %612 : vector<8x128xf32>
    %631 = arith.mulf %630, %630 : vector<8x128xf32>
    %cst_318 = arith.constant 2.000000e+00 : f32
    %632 = vector.broadcast %cst_318 : f32 to vector<8x128xf32>
    %633 = arith.mulf %632, %631 : vector<8x128xf32>
    %cst_319 = arith.constant 1.000000e+00 : f32
    %634 = vector.broadcast %cst_319 : f32 to vector<8x128xf32>
    %635 = arith.subf %634, %633 : vector<8x128xf32>
    %636 = arith.addf %594, %635 : vector<8x128xf32>
    %c0_320 = arith.constant 0 : index
    %c3_321 = arith.constant 3 : index
    %c16_322 = arith.constant 16 : index
    %c0_323 = arith.constant 0 : index
    %637 = vector.load %arg3[%c0_320, %c3_321, %c16_322, %c0_323] : memref<1x7x64x128xf32, #tpu.memory_space<vmem>>, vector<1x1x8x128xf32>
    %638 = vector.shape_cast %637 : vector<1x1x8x128xf32> to vector<8x128xf32>
    %639 = arith.subf %638, %553 : vector<8x128xf32>
    %640 = vector.broadcast %545 : vector<8x1xf32> to vector<8x128xf32>
    %641 = arith.subf %639, %640 : vector<8x128xf32>
    %cst_324 = arith.constant 0.159154937 : f32
    %642 = vector.broadcast %cst_324 : f32 to vector<8x128xf32>
    %643 = arith.mulf %641, %642 : vector<8x128xf32>
    %cst_325 = arith.constant 5.000000e-01 : f32
    %644 = vector.broadcast %cst_325 : f32 to vector<8x128xf32>
    %645 = arith.addf %643, %644 : vector<8x128xf32>
    %646 = math.floor %645 : vector<8x128xf32>
    %cst_326 = arith.constant 6.28318548 : f32
    %647 = vector.broadcast %cst_326 : f32 to vector<8x128xf32>
    %648 = arith.mulf %646, %647 : vector<8x128xf32>
    %649 = arith.subf %641, %648 : vector<8x128xf32>
    %cst_327 = arith.constant -1.74845553E-7 : f32
    %650 = vector.broadcast %cst_327 : f32 to vector<8x128xf32>
    %651 = arith.mulf %646, %650 : vector<8x128xf32>
    %652 = arith.subf %649, %651 : vector<8x128xf32>
    %cst_328 = arith.constant 5.000000e-01 : f32
    %653 = vector.broadcast %cst_328 : f32 to vector<8x128xf32>
    %654 = arith.mulf %653, %652 : vector<8x128xf32>
    %655 = arith.mulf %654, %654 : vector<8x128xf32>
    %cst_329 = arith.constant -2.50521079E-8 : f32
    %656 = vector.broadcast %cst_329 : f32 to vector<8x128xf32>
    %657 = arith.mulf %656, %655 : vector<8x128xf32>
    %cst_330 = arith.constant 2.75573188E-6 : f32
    %658 = vector.broadcast %cst_330 : f32 to vector<8x128xf32>
    %659 = arith.addf %657, %658 : vector<8x128xf32>
    %660 = arith.mulf %659, %655 : vector<8x128xf32>
    %cst_331 = arith.constant 1.98412701E-4 : f32
    %661 = vector.broadcast %cst_331 : f32 to vector<8x128xf32>
    %662 = arith.subf %660, %661 : vector<8x128xf32>
    %663 = arith.mulf %662, %655 : vector<8x128xf32>
    %cst_332 = arith.constant 0.00833333377 : f32
    %664 = vector.broadcast %cst_332 : f32 to vector<8x128xf32>
    %665 = arith.addf %663, %664 : vector<8x128xf32>
    %666 = arith.mulf %665, %655 : vector<8x128xf32>
    %cst_333 = arith.constant 0.166666672 : f32
    %667 = vector.broadcast %cst_333 : f32 to vector<8x128xf32>
    %668 = arith.subf %666, %667 : vector<8x128xf32>
    %669 = arith.mulf %668, %655 : vector<8x128xf32>
    %cst_334 = arith.constant 1.000000e+00 : f32
    %670 = vector.broadcast %cst_334 : f32 to vector<8x128xf32>
    %671 = arith.addf %669, %670 : vector<8x128xf32>
    %672 = arith.mulf %671, %654 : vector<8x128xf32>
    %673 = arith.mulf %672, %672 : vector<8x128xf32>
    %cst_335 = arith.constant 2.000000e+00 : f32
    %674 = vector.broadcast %cst_335 : f32 to vector<8x128xf32>
    %675 = arith.mulf %674, %673 : vector<8x128xf32>
    %cst_336 = arith.constant 1.000000e+00 : f32
    %676 = vector.broadcast %cst_336 : f32 to vector<8x128xf32>
    %677 = arith.subf %676, %675 : vector<8x128xf32>
    %678 = arith.addf %636, %677 : vector<8x128xf32>
    %c0_337 = arith.constant 0 : index
    %c4_338 = arith.constant 4 : index
    %c16_339 = arith.constant 16 : index
    %c0_340 = arith.constant 0 : index
    %679 = vector.load %arg3[%c0_337, %c4_338, %c16_339, %c0_340] : memref<1x7x64x128xf32, #tpu.memory_space<vmem>>, vector<1x1x8x128xf32>
    %680 = vector.shape_cast %679 : vector<1x1x8x128xf32> to vector<8x128xf32>
    %681 = arith.subf %680, %553 : vector<8x128xf32>
    %682 = vector.broadcast %547 : vector<8x1xf32> to vector<8x128xf32>
    %683 = arith.subf %681, %682 : vector<8x128xf32>
    %cst_341 = arith.constant 0.159154937 : f32
    %684 = vector.broadcast %cst_341 : f32 to vector<8x128xf32>
    %685 = arith.mulf %683, %684 : vector<8x128xf32>
    %cst_342 = arith.constant 5.000000e-01 : f32
    %686 = vector.broadcast %cst_342 : f32 to vector<8x128xf32>
    %687 = arith.addf %685, %686 : vector<8x128xf32>
    %688 = math.floor %687 : vector<8x128xf32>
    %cst_343 = arith.constant 6.28318548 : f32
    %689 = vector.broadcast %cst_343 : f32 to vector<8x128xf32>
    %690 = arith.mulf %688, %689 : vector<8x128xf32>
    %691 = arith.subf %683, %690 : vector<8x128xf32>
    %cst_344 = arith.constant -1.74845553E-7 : f32
    %692 = vector.broadcast %cst_344 : f32 to vector<8x128xf32>
    %693 = arith.mulf %688, %692 : vector<8x128xf32>
    %694 = arith.subf %691, %693 : vector<8x128xf32>
    %cst_345 = arith.constant 5.000000e-01 : f32
    %695 = vector.broadcast %cst_345 : f32 to vector<8x128xf32>
    %696 = arith.mulf %695, %694 : vector<8x128xf32>
    %697 = arith.mulf %696, %696 : vector<8x128xf32>
    %cst_346 = arith.constant -2.50521079E-8 : f32
    %698 = vector.broadcast %cst_346 : f32 to vector<8x128xf32>
    %699 = arith.mulf %698, %697 : vector<8x128xf32>
    %cst_347 = arith.constant 2.75573188E-6 : f32
    %700 = vector.broadcast %cst_347 : f32 to vector<8x128xf32>
    %701 = arith.addf %699, %700 : vector<8x128xf32>
    %702 = arith.mulf %701, %697 : vector<8x128xf32>
    %cst_348 = arith.constant 1.98412701E-4 : f32
    %703 = vector.broadcast %cst_348 : f32 to vector<8x128xf32>
    %704 = arith.subf %702, %703 : vector<8x128xf32>
    %705 = arith.mulf %704, %697 : vector<8x128xf32>
    %cst_349 = arith.constant 0.00833333377 : f32
    %706 = vector.broadcast %cst_349 : f32 to vector<8x128xf32>
    %707 = arith.addf %705, %706 : vector<8x128xf32>
    %708 = arith.mulf %707, %697 : vector<8x128xf32>
    %cst_350 = arith.constant 0.166666672 : f32
    %709 = vector.broadcast %cst_350 : f32 to vector<8x128xf32>
    %710 = arith.subf %708, %709 : vector<8x128xf32>
    %711 = arith.mulf %710, %697 : vector<8x128xf32>
    %cst_351 = arith.constant 1.000000e+00 : f32
    %712 = vector.broadcast %cst_351 : f32 to vector<8x128xf32>
    %713 = arith.addf %711, %712 : vector<8x128xf32>
    %714 = arith.mulf %713, %696 : vector<8x128xf32>
    %715 = arith.mulf %714, %714 : vector<8x128xf32>
    %cst_352 = arith.constant 2.000000e+00 : f32
    %716 = vector.broadcast %cst_352 : f32 to vector<8x128xf32>
    %717 = arith.mulf %716, %715 : vector<8x128xf32>
    %cst_353 = arith.constant 1.000000e+00 : f32
    %718 = vector.broadcast %cst_353 : f32 to vector<8x128xf32>
    %719 = arith.subf %718, %717 : vector<8x128xf32>
    %720 = arith.addf %678, %719 : vector<8x128xf32>
    %c0_354 = arith.constant 0 : index
    %c5_355 = arith.constant 5 : index
    %c16_356 = arith.constant 16 : index
    %c0_357 = arith.constant 0 : index
    %721 = vector.load %arg3[%c0_354, %c5_355, %c16_356, %c0_357] : memref<1x7x64x128xf32, #tpu.memory_space<vmem>>, vector<1x1x8x128xf32>
    %722 = vector.shape_cast %721 : vector<1x1x8x128xf32> to vector<8x128xf32>
    %723 = arith.subf %722, %553 : vector<8x128xf32>
    %724 = vector.broadcast %549 : vector<8x1xf32> to vector<8x128xf32>
    %725 = arith.subf %723, %724 : vector<8x128xf32>
    %cst_358 = arith.constant 0.159154937 : f32
    %726 = vector.broadcast %cst_358 : f32 to vector<8x128xf32>
    %727 = arith.mulf %725, %726 : vector<8x128xf32>
    %cst_359 = arith.constant 5.000000e-01 : f32
    %728 = vector.broadcast %cst_359 : f32 to vector<8x128xf32>
    %729 = arith.addf %727, %728 : vector<8x128xf32>
    %730 = math.floor %729 : vector<8x128xf32>
    %cst_360 = arith.constant 6.28318548 : f32
    %731 = vector.broadcast %cst_360 : f32 to vector<8x128xf32>
    %732 = arith.mulf %730, %731 : vector<8x128xf32>
    %733 = arith.subf %725, %732 : vector<8x128xf32>
    %cst_361 = arith.constant -1.74845553E-7 : f32
    %734 = vector.broadcast %cst_361 : f32 to vector<8x128xf32>
    %735 = arith.mulf %730, %734 : vector<8x128xf32>
    %736 = arith.subf %733, %735 : vector<8x128xf32>
    %cst_362 = arith.constant 5.000000e-01 : f32
    %737 = vector.broadcast %cst_362 : f32 to vector<8x128xf32>
    %738 = arith.mulf %737, %736 : vector<8x128xf32>
    %739 = arith.mulf %738, %738 : vector<8x128xf32>
    %cst_363 = arith.constant -2.50521079E-8 : f32
    %740 = vector.broadcast %cst_363 : f32 to vector<8x128xf32>
    %741 = arith.mulf %740, %739 : vector<8x128xf32>
    %cst_364 = arith.constant 2.75573188E-6 : f32
    %742 = vector.broadcast %cst_364 : f32 to vector<8x128xf32>
    %743 = arith.addf %741, %742 : vector<8x128xf32>
    %744 = arith.mulf %743, %739 : vector<8x128xf32>
    %cst_365 = arith.constant 1.98412701E-4 : f32
    %745 = vector.broadcast %cst_365 : f32 to vector<8x128xf32>
    %746 = arith.subf %744, %745 : vector<8x128xf32>
    %747 = arith.mulf %746, %739 : vector<8x128xf32>
    %cst_366 = arith.constant 0.00833333377 : f32
    %748 = vector.broadcast %cst_366 : f32 to vector<8x128xf32>
    %749 = arith.addf %747, %748 : vector<8x128xf32>
    %750 = arith.mulf %749, %739 : vector<8x128xf32>
    %cst_367 = arith.constant 0.166666672 : f32
    %751 = vector.broadcast %cst_367 : f32 to vector<8x128xf32>
    %752 = arith.subf %750, %751 : vector<8x128xf32>
    %753 = arith.mulf %752, %739 : vector<8x128xf32>
    %cst_368 = arith.constant 1.000000e+00 : f32
    %754 = vector.broadcast %cst_368 : f32 to vector<8x128xf32>
    %755 = arith.addf %753, %754 : vector<8x128xf32>
    %756 = arith.mulf %755, %738 : vector<8x128xf32>
    %757 = arith.mulf %756, %756 : vector<8x128xf32>
    %cst_369 = arith.constant 2.000000e+00 : f32
    %758 = vector.broadcast %cst_369 : f32 to vector<8x128xf32>
    %759 = arith.mulf %758, %757 : vector<8x128xf32>
    %cst_370 = arith.constant 1.000000e+00 : f32
    %760 = vector.broadcast %cst_370 : f32 to vector<8x128xf32>
    %761 = arith.subf %760, %759 : vector<8x128xf32>
    %762 = arith.addf %720, %761 : vector<8x128xf32>
    %c0_371 = arith.constant 0 : index
    %c6_372 = arith.constant 6 : index
    %c16_373 = arith.constant 16 : index
    %c0_374 = arith.constant 0 : index
    %763 = vector.load %arg3[%c0_371, %c6_372, %c16_373, %c0_374] : memref<1x7x64x128xf32, #tpu.memory_space<vmem>>, vector<1x1x8x128xf32>
    %764 = vector.shape_cast %763 : vector<1x1x8x128xf32> to vector<8x128xf32>
    %765 = arith.subf %764, %553 : vector<8x128xf32>
    %766 = vector.broadcast %551 : vector<8x1xf32> to vector<8x128xf32>
    %767 = arith.subf %765, %766 : vector<8x128xf32>
    %cst_375 = arith.constant 0.159154937 : f32
    %768 = vector.broadcast %cst_375 : f32 to vector<8x128xf32>
    %769 = arith.mulf %767, %768 : vector<8x128xf32>
    %cst_376 = arith.constant 5.000000e-01 : f32
    %770 = vector.broadcast %cst_376 : f32 to vector<8x128xf32>
    %771 = arith.addf %769, %770 : vector<8x128xf32>
    %772 = math.floor %771 : vector<8x128xf32>
    %cst_377 = arith.constant 6.28318548 : f32
    %773 = vector.broadcast %cst_377 : f32 to vector<8x128xf32>
    %774 = arith.mulf %772, %773 : vector<8x128xf32>
    %775 = arith.subf %767, %774 : vector<8x128xf32>
    %cst_378 = arith.constant -1.74845553E-7 : f32
    %776 = vector.broadcast %cst_378 : f32 to vector<8x128xf32>
    %777 = arith.mulf %772, %776 : vector<8x128xf32>
    %778 = arith.subf %775, %777 : vector<8x128xf32>
    %cst_379 = arith.constant 5.000000e-01 : f32
    %779 = vector.broadcast %cst_379 : f32 to vector<8x128xf32>
    %780 = arith.mulf %779, %778 : vector<8x128xf32>
    %781 = arith.mulf %780, %780 : vector<8x128xf32>
    %cst_380 = arith.constant -2.50521079E-8 : f32
    %782 = vector.broadcast %cst_380 : f32 to vector<8x128xf32>
    %783 = arith.mulf %782, %781 : vector<8x128xf32>
    %cst_381 = arith.constant 2.75573188E-6 : f32
    %784 = vector.broadcast %cst_381 : f32 to vector<8x128xf32>
    %785 = arith.addf %783, %784 : vector<8x128xf32>
    %786 = arith.mulf %785, %781 : vector<8x128xf32>
    %cst_382 = arith.constant 1.98412701E-4 : f32
    %787 = vector.broadcast %cst_382 : f32 to vector<8x128xf32>
    %788 = arith.subf %786, %787 : vector<8x128xf32>
    %789 = arith.mulf %788, %781 : vector<8x128xf32>
    %cst_383 = arith.constant 0.00833333377 : f32
    %790 = vector.broadcast %cst_383 : f32 to vector<8x128xf32>
    %791 = arith.addf %789, %790 : vector<8x128xf32>
    %792 = arith.mulf %791, %781 : vector<8x128xf32>
    %cst_384 = arith.constant 0.166666672 : f32
    %793 = vector.broadcast %cst_384 : f32 to vector<8x128xf32>
    %794 = arith.subf %792, %793 : vector<8x128xf32>
    %795 = arith.mulf %794, %781 : vector<8x128xf32>
    %cst_385 = arith.constant 1.000000e+00 : f32
    %796 = vector.broadcast %cst_385 : f32 to vector<8x128xf32>
    %797 = arith.addf %795, %796 : vector<8x128xf32>
    %798 = arith.mulf %797, %780 : vector<8x128xf32>
    %799 = arith.mulf %798, %798 : vector<8x128xf32>
    %cst_386 = arith.constant 2.000000e+00 : f32
    %800 = vector.broadcast %cst_386 : f32 to vector<8x128xf32>
    %801 = arith.mulf %800, %799 : vector<8x128xf32>
    %cst_387 = arith.constant 1.000000e+00 : f32
    %802 = vector.broadcast %cst_387 : f32 to vector<8x128xf32>
    %803 = arith.subf %802, %801 : vector<8x128xf32>
    %804 = arith.addf %762, %803 : vector<8x128xf32>
    %cst_388 = arith.constant 0.166666672 : f32
    %805 = vector.broadcast %cst_388 : f32 to vector<8x128xf32>
    %806 = arith.mulf %804, %805 : vector<8x128xf32>
    %c0_389 = arith.constant 0 : index
    %c16_390 = arith.constant 16 : index
    %c0_391 = arith.constant 0 : index
    %807 = vector.load %arg4[%c0_389, %c16_390, %c0_391] : memref<1x64x128xf32, #tpu.memory_space<vmem>>, vector<1x8x128xf32>
    %808 = vector.shape_cast %807 : vector<1x8x128xf32> to vector<8x128xf32>
    %809 = vector.shape_cast %806 : vector<8x128xf32> to vector<1x8x128xf32>
    tpu.vector_store %arg4[%c0_389, %c16_390, %c0_391], %809 {strides = array<i32>} : memref<1x64x128xf32, #tpu.memory_space<vmem>>, vector<1x8x128xf32>,
    %c0_392 = arith.constant 0 : index
    %c0_393 = arith.constant 0 : index
    %c24 = arith.constant 24 : index
    %c0_394 = arith.constant 0 : index
    %810 = vector.load %arg2[%c0_392, %c0_393, %c24, %c0_394] : memref<1x6x64x1xf32, #tpu.memory_space<vmem>>, vector<1x1x8x1xf32>
    %811 = vector.shape_cast %810 : vector<1x1x8x1xf32> to vector<8x1xf32>
    %c0_395 = arith.constant 0 : index
    %c1_396 = arith.constant 1 : index
    %c24_397 = arith.constant 24 : index
    %c0_398 = arith.constant 0 : index
    %812 = vector.load %arg2[%c0_395, %c1_396, %c24_397, %c0_398] : memref<1x6x64x1xf32, #tpu.memory_space<vmem>>, vector<1x1x8x1xf32>
    %813 = vector.shape_cast %812 : vector<1x1x8x1xf32> to vector<8x1xf32>
    %c0_399 = arith.constant 0 : index
    %c2_400 = arith.constant 2 : index
    %c24_401 = arith.constant 24 : index
    %c0_402 = arith.constant 0 : index
    %814 = vector.load %arg2[%c0_399, %c2_400, %c24_401, %c0_402] : memref<1x6x64x1xf32, #tpu.memory_space<vmem>>, vector<1x1x8x1xf32>
    %815 = vector.shape_cast %814 : vector<1x1x8x1xf32> to vector<8x1xf32>
    %c0_403 = arith.constant 0 : index
    %c3_404 = arith.constant 3 : index
    %c24_405 = arith.constant 24 : index
    %c0_406 = arith.constant 0 : index
    %816 = vector.load %arg2[%c0_403, %c3_404, %c24_405, %c0_406] : memref<1x6x64x1xf32, #tpu.memory_space<vmem>>, vector<1x1x8x1xf32>
    %817 = vector.shape_cast %816 : vector<1x1x8x1xf32> to vector<8x1xf32>
    %c0_407 = arith.constant 0 : index
    %c4_408 = arith.constant 4 : index
    %c24_409 = arith.constant 24 : index
    %c0_410 = arith.constant 0 : index
    %818 = vector.load %arg2[%c0_407, %c4_408, %c24_409, %c0_410] : memref<1x6x64x1xf32, #tpu.memory_space<vmem>>, vector<1x1x8x1xf32>
    %819 = vector.shape_cast %818 : vector<1x1x8x1xf32> to vector<8x1xf32>
    %c0_411 = arith.constant 0 : index
    %c5_412 = arith.constant 5 : index
    %c24_413 = arith.constant 24 : index
    %c0_414 = arith.constant 0 : index
    %820 = vector.load %arg2[%c0_411, %c5_412, %c24_413, %c0_414] : memref<1x6x64x1xf32, #tpu.memory_space<vmem>>, vector<1x1x8x1xf32>
    %821 = vector.shape_cast %820 : vector<1x1x8x1xf32> to vector<8x1xf32>
    %c0_415 = arith.constant 0 : index
    %c0_416 = arith.constant 0 : index
    %c24_417 = arith.constant 24 : index
    %c0_418 = arith.constant 0 : index
    %822 = vector.load %arg3[%c0_415, %c0_416, %c24_417, %c0_418] : memref<1x7x64x128xf32, #tpu.memory_space<vmem>>, vector<1x1x8x128xf32>
    %823 = vector.shape_cast %822 : vector<1x1x8x128xf32> to vector<8x128xf32>
    %c0_419 = arith.constant 0 : index
    %c1_420 = arith.constant 1 : index
    %c24_421 = arith.constant 24 : index
    %c0_422 = arith.constant 0 : index
    %824 = vector.load %arg3[%c0_419, %c1_420, %c24_421, %c0_422] : memref<1x7x64x128xf32, #tpu.memory_space<vmem>>, vector<1x1x8x128xf32>
    %825 = vector.shape_cast %824 : vector<1x1x8x128xf32> to vector<8x128xf32>
    %826 = arith.subf %825, %823 : vector<8x128xf32>
    %827 = vector.broadcast %811 : vector<8x1xf32> to vector<8x128xf32>
    %828 = arith.subf %826, %827 : vector<8x128xf32>
    %cst_423 = arith.constant 0.159154937 : f32
    %829 = vector.broadcast %cst_423 : f32 to vector<8x128xf32>
    %830 = arith.mulf %828, %829 : vector<8x128xf32>
    %cst_424 = arith.constant 5.000000e-01 : f32
    %831 = vector.broadcast %cst_424 : f32 to vector<8x128xf32>
    %832 = arith.addf %830, %831 : vector<8x128xf32>
    %833 = math.floor %832 : vector<8x128xf32>
    %cst_425 = arith.constant 6.28318548 : f32
    %834 = vector.broadcast %cst_425 : f32 to vector<8x128xf32>
    %835 = arith.mulf %833, %834 : vector<8x128xf32>
    %836 = arith.subf %828, %835 : vector<8x128xf32>
    %cst_426 = arith.constant -1.74845553E-7 : f32
    %837 = vector.broadcast %cst_426 : f32 to vector<8x128xf32>
    %838 = arith.mulf %833, %837 : vector<8x128xf32>
    %839 = arith.subf %836, %838 : vector<8x128xf32>
    %cst_427 = arith.constant 5.000000e-01 : f32
    %840 = vector.broadcast %cst_427 : f32 to vector<8x128xf32>
    %841 = arith.mulf %840, %839 : vector<8x128xf32>
    %842 = arith.mulf %841, %841 : vector<8x128xf32>
    %cst_428 = arith.constant -2.50521079E-8 : f32
    %843 = vector.broadcast %cst_428 : f32 to vector<8x128xf32>
    %844 = arith.mulf %843, %842 : vector<8x128xf32>
    %cst_429 = arith.constant 2.75573188E-6 : f32
    %845 = vector.broadcast %cst_429 : f32 to vector<8x128xf32>
    %846 = arith.addf %844, %845 : vector<8x128xf32>
    %847 = arith.mulf %846, %842 : vector<8x128xf32>
    %cst_430 = arith.constant 1.98412701E-4 : f32
    %848 = vector.broadcast %cst_430 : f32 to vector<8x128xf32>
    %849 = arith.subf %847, %848 : vector<8x128xf32>
    %850 = arith.mulf %849, %842 : vector<8x128xf32>
    %cst_431 = arith.constant 0.00833333377 : f32
    %851 = vector.broadcast %cst_431 : f32 to vector<8x128xf32>
    %852 = arith.addf %850, %851 : vector<8x128xf32>
    %853 = arith.mulf %852, %842 : vector<8x128xf32>
    %cst_432 = arith.constant 0.166666672 : f32
    %854 = vector.broadcast %cst_432 : f32 to vector<8x128xf32>
    %855 = arith.subf %853, %854 : vector<8x128xf32>
    %856 = arith.mulf %855, %842 : vector<8x128xf32>
    %cst_433 = arith.constant 1.000000e+00 : f32
    %857 = vector.broadcast %cst_433 : f32 to vector<8x128xf32>
    %858 = arith.addf %856, %857 : vector<8x128xf32>
    %859 = arith.mulf %858, %841 : vector<8x128xf32>
    %860 = arith.mulf %859, %859 : vector<8x128xf32>
    %cst_434 = arith.constant 2.000000e+00 : f32
    %861 = vector.broadcast %cst_434 : f32 to vector<8x128xf32>
    %862 = arith.mulf %861, %860 : vector<8x128xf32>
    %cst_435 = arith.constant 1.000000e+00 : f32
    %863 = vector.broadcast %cst_435 : f32 to vector<8x128xf32>
    %864 = arith.subf %863, %862 : vector<8x128xf32>
    %c0_436 = arith.constant 0 : index
    %c2_437 = arith.constant 2 : index
    %c24_438 = arith.constant 24 : index
    %c0_439 = arith.constant 0 : index
    %865 = vector.load %arg3[%c0_436, %c2_437, %c24_438, %c0_439] : memref<1x7x64x128xf32, #tpu.memory_space<vmem>>, vector<1x1x8x128xf32>
    %866 = vector.shape_cast %865 : vector<1x1x8x128xf32> to vector<8x128xf32>
    %867 = arith.subf %866, %823 : vector<8x128xf32>
    %868 = vector.broadcast %813 : vector<8x1xf32> to vector<8x128xf32>
    %869 = arith.subf %867, %868 : vector<8x128xf32>
    %cst_440 = arith.constant 0.159154937 : f32
    %870 = vector.broadcast %cst_440 : f32 to vector<8x128xf32>
    %871 = arith.mulf %869, %870 : vector<8x128xf32>
    %cst_441 = arith.constant 5.000000e-01 : f32
    %872 = vector.broadcast %cst_441 : f32 to vector<8x128xf32>
    %873 = arith.addf %871, %872 : vector<8x128xf32>
    %874 = math.floor %873 : vector<8x128xf32>
    %cst_442 = arith.constant 6.28318548 : f32
    %875 = vector.broadcast %cst_442 : f32 to vector<8x128xf32>
    %876 = arith.mulf %874, %875 : vector<8x128xf32>
    %877 = arith.subf %869, %876 : vector<8x128xf32>
    %cst_443 = arith.constant -1.74845553E-7 : f32
    %878 = vector.broadcast %cst_443 : f32 to vector<8x128xf32>
    %879 = arith.mulf %874, %878 : vector<8x128xf32>
    %880 = arith.subf %877, %879 : vector<8x128xf32>
    %cst_444 = arith.constant 5.000000e-01 : f32
    %881 = vector.broadcast %cst_444 : f32 to vector<8x128xf32>
    %882 = arith.mulf %881, %880 : vector<8x128xf32>
    %883 = arith.mulf %882, %882 : vector<8x128xf32>
    %cst_445 = arith.constant -2.50521079E-8 : f32
    %884 = vector.broadcast %cst_445 : f32 to vector<8x128xf32>
    %885 = arith.mulf %884, %883 : vector<8x128xf32>
    %cst_446 = arith.constant 2.75573188E-6 : f32
    %886 = vector.broadcast %cst_446 : f32 to vector<8x128xf32>
    %887 = arith.addf %885, %886 : vector<8x128xf32>
    %888 = arith.mulf %887, %883 : vector<8x128xf32>
    %cst_447 = arith.constant 1.98412701E-4 : f32
    %889 = vector.broadcast %cst_447 : f32 to vector<8x128xf32>
    %890 = arith.subf %888, %889 : vector<8x128xf32>
    %891 = arith.mulf %890, %883 : vector<8x128xf32>
    %cst_448 = arith.constant 0.00833333377 : f32
    %892 = vector.broadcast %cst_448 : f32 to vector<8x128xf32>
    %893 = arith.addf %891, %892 : vector<8x128xf32>
    %894 = arith.mulf %893, %883 : vector<8x128xf32>
    %cst_449 = arith.constant 0.166666672 : f32
    %895 = vector.broadcast %cst_449 : f32 to vector<8x128xf32>
    %896 = arith.subf %894, %895 : vector<8x128xf32>
    %897 = arith.mulf %896, %883 : vector<8x128xf32>
    %cst_450 = arith.constant 1.000000e+00 : f32
    %898 = vector.broadcast %cst_450 : f32 to vector<8x128xf32>
    %899 = arith.addf %897, %898 : vector<8x128xf32>
    %900 = arith.mulf %899, %882 : vector<8x128xf32>
    %901 = arith.mulf %900, %900 : vector<8x128xf32>
    %cst_451 = arith.constant 2.000000e+00 : f32
    %902 = vector.broadcast %cst_451 : f32 to vector<8x128xf32>
    %903 = arith.mulf %902, %901 : vector<8x128xf32>
    %cst_452 = arith.constant 1.000000e+00 : f32
    %904 = vector.broadcast %cst_452 : f32 to vector<8x128xf32>
    %905 = arith.subf %904, %903 : vector<8x128xf32>
    %906 = arith.addf %864, %905 : vector<8x128xf32>
    %c0_453 = arith.constant 0 : index
    %c3_454 = arith.constant 3 : index
    %c24_455 = arith.constant 24 : index
    %c0_456 = arith.constant 0 : index
    %907 = vector.load %arg3[%c0_453, %c3_454, %c24_455, %c0_456] : memref<1x7x64x128xf32, #tpu.memory_space<vmem>>, vector<1x1x8x128xf32>
    %908 = vector.shape_cast %907 : vector<1x1x8x128xf32> to vector<8x128xf32>
    %909 = arith.subf %908, %823 : vector<8x128xf32>
    %910 = vector.broadcast %815 : vector<8x1xf32> to vector<8x128xf32>
    %911 = arith.subf %909, %910 : vector<8x128xf32>
    %cst_457 = arith.constant 0.159154937 : f32
    %912 = vector.broadcast %cst_457 : f32 to vector<8x128xf32>
    %913 = arith.mulf %911, %912 : vector<8x128xf32>
    %cst_458 = arith.constant 5.000000e-01 : f32
    %914 = vector.broadcast %cst_458 : f32 to vector<8x128xf32>
    %915 = arith.addf %913, %914 : vector<8x128xf32>
    %916 = math.floor %915 : vector<8x128xf32>
    %cst_459 = arith.constant 6.28318548 : f32
    %917 = vector.broadcast %cst_459 : f32 to vector<8x128xf32>
    %918 = arith.mulf %916, %917 : vector<8x128xf32>
    %919 = arith.subf %911, %918 : vector<8x128xf32>
    %cst_460 = arith.constant -1.74845553E-7 : f32
    %920 = vector.broadcast %cst_460 : f32 to vector<8x128xf32>
    %921 = arith.mulf %916, %920 : vector<8x128xf32>
    %922 = arith.subf %919, %921 : vector<8x128xf32>
    %cst_461 = arith.constant 5.000000e-01 : f32
    %923 = vector.broadcast %cst_461 : f32 to vector<8x128xf32>
    %924 = arith.mulf %923, %922 : vector<8x128xf32>
    %925 = arith.mulf %924, %924 : vector<8x128xf32>
    %cst_462 = arith.constant -2.50521079E-8 : f32
    %926 = vector.broadcast %cst_462 : f32 to vector<8x128xf32>
    %927 = arith.mulf %926, %925 : vector<8x128xf32>
    %cst_463 = arith.constant 2.75573188E-6 : f32
    %928 = vector.broadcast %cst_463 : f32 to vector<8x128xf32>
    %929 = arith.addf %927, %928 : vector<8x128xf32>
    %930 = arith.mulf %929, %925 : vector<8x128xf32>
    %cst_464 = arith.constant 1.98412701E-4 : f32
    %931 = vector.broadcast %cst_464 : f32 to vector<8x128xf32>
    %932 = arith.subf %930, %931 : vector<8x128xf32>
    %933 = arith.mulf %932, %925 : vector<8x128xf32>
    %cst_465 = arith.constant 0.00833333377 : f32
    %934 = vector.broadcast %cst_465 : f32 to vector<8x128xf32>
    %935 = arith.addf %933, %934 : vector<8x128xf32>
    %936 = arith.mulf %935, %925 : vector<8x128xf32>
    %cst_466 = arith.constant 0.166666672 : f32
    %937 = vector.broadcast %cst_466 : f32 to vector<8x128xf32>
    %938 = arith.subf %936, %937 : vector<8x128xf32>
    %939 = arith.mulf %938, %925 : vector<8x128xf32>
    %cst_467 = arith.constant 1.000000e+00 : f32
    %940 = vector.broadcast %cst_467 : f32 to vector<8x128xf32>
    %941 = arith.addf %939, %940 : vector<8x128xf32>
    %942 = arith.mulf %941, %924 : vector<8x128xf32>
    %943 = arith.mulf %942, %942 : vector<8x128xf32>
    %cst_468 = arith.constant 2.000000e+00 : f32
    %944 = vector.broadcast %cst_468 : f32 to vector<8x128xf32>
    %945 = arith.mulf %944, %943 : vector<8x128xf32>
    %cst_469 = arith.constant 1.000000e+00 : f32
    %946 = vector.broadcast %cst_469 : f32 to vector<8x128xf32>
    %947 = arith.subf %946, %945 : vector<8x128xf32>
    %948 = arith.addf %906, %947 : vector<8x128xf32>
    %c0_470 = arith.constant 0 : index
    %c4_471 = arith.constant 4 : index
    %c24_472 = arith.constant 24 : index
    %c0_473 = arith.constant 0 : index
    %949 = vector.load %arg3[%c0_470, %c4_471, %c24_472, %c0_473] : memref<1x7x64x128xf32, #tpu.memory_space<vmem>>, vector<1x1x8x128xf32>
    %950 = vector.shape_cast %949 : vector<1x1x8x128xf32> to vector<8x128xf32>
    %951 = arith.subf %950, %823 : vector<8x128xf32>
    %952 = vector.broadcast %817 : vector<8x1xf32> to vector<8x128xf32>
    %953 = arith.subf %951, %952 : vector<8x128xf32>
    %cst_474 = arith.constant 0.159154937 : f32
    %954 = vector.broadcast %cst_474 : f32 to vector<8x128xf32>
    %955 = arith.mulf %953, %954 : vector<8x128xf32>
    %cst_475 = arith.constant 5.000000e-01 : f32
    %956 = vector.broadcast %cst_475 : f32 to vector<8x128xf32>
    %957 = arith.addf %955, %956 : vector<8x128xf32>
    %958 = math.floor %957 : vector<8x128xf32>
    %cst_476 = arith.constant 6.28318548 : f32
    %959 = vector.broadcast %cst_476 : f32 to vector<8x128xf32>
    %960 = arith.mulf %958, %959 : vector<8x128xf32>
    %961 = arith.subf %953, %960 : vector<8x128xf32>
    %cst_477 = arith.constant -1.74845553E-7 : f32
    %962 = vector.broadcast %cst_477 : f32 to vector<8x128xf32>
    %963 = arith.mulf %958, %962 : vector<8x128xf32>
    %964 = arith.subf %961, %963 : vector<8x128xf32>
    %cst_478 = arith.constant 5.000000e-01 : f32
    %965 = vector.broadcast %cst_478 : f32 to vector<8x128xf32>
    %966 = arith.mulf %965, %964 : vector<8x128xf32>
    %967 = arith.mulf %966, %966 : vector<8x128xf32>
    %cst_479 = arith.constant -2.50521079E-8 : f32
    %968 = vector.broadcast %cst_479 : f32 to vector<8x128xf32>
    %969 = arith.mulf %968, %967 : vector<8x128xf32>
    %cst_480 = arith.constant 2.75573188E-6 : f32
    %970 = vector.broadcast %cst_480 : f32 to vector<8x128xf32>
    %971 = arith.addf %969, %970 : vector<8x128xf32>
    %972 = arith.mulf %971, %967 : vector<8x128xf32>
    %cst_481 = arith.constant 1.98412701E-4 : f32
    %973 = vector.broadcast %cst_481 : f32 to vector<8x128xf32>
    %974 = arith.subf %972, %973 : vector<8x128xf32>
    %975 = arith.mulf %974, %967 : vector<8x128xf32>
    %cst_482 = arith.constant 0.00833333377 : f32
    %976 = vector.broadcast %cst_482 : f32 to vector<8x128xf32>
    %977 = arith.addf %975, %976 : vector<8x128xf32>
    %978 = arith.mulf %977, %967 : vector<8x128xf32>
    %cst_483 = arith.constant 0.166666672 : f32
    %979 = vector.broadcast %cst_483 : f32 to vector<8x128xf32>
    %980 = arith.subf %978, %979 : vector<8x128xf32>
    %981 = arith.mulf %980, %967 : vector<8x128xf32>
    %cst_484 = arith.constant 1.000000e+00 : f32
    %982 = vector.broadcast %cst_484 : f32 to vector<8x128xf32>
    %983 = arith.addf %981, %982 : vector<8x128xf32>
    %984 = arith.mulf %983, %966 : vector<8x128xf32>
    %985 = arith.mulf %984, %984 : vector<8x128xf32>
    %cst_485 = arith.constant 2.000000e+00 : f32
    %986 = vector.broadcast %cst_485 : f32 to vector<8x128xf32>
    %987 = arith.mulf %986, %985 : vector<8x128xf32>
    %cst_486 = arith.constant 1.000000e+00 : f32
    %988 = vector.broadcast %cst_486 : f32 to vector<8x128xf32>
    %989 = arith.subf %988, %987 : vector<8x128xf32>
    %990 = arith.addf %948, %989 : vector<8x128xf32>
    %c0_487 = arith.constant 0 : index
    %c5_488 = arith.constant 5 : index
    %c24_489 = arith.constant 24 : index
    %c0_490 = arith.constant 0 : index
    %991 = vector.load %arg3[%c0_487, %c5_488, %c24_489, %c0_490] : memref<1x7x64x128xf32, #tpu.memory_space<vmem>>, vector<1x1x8x128xf32>
    %992 = vector.shape_cast %991 : vector<1x1x8x128xf32> to vector<8x128xf32>
    %993 = arith.subf %992, %823 : vector<8x128xf32>
    %994 = vector.broadcast %819 : vector<8x1xf32> to vector<8x128xf32>
    %995 = arith.subf %993, %994 : vector<8x128xf32>
    %cst_491 = arith.constant 0.159154937 : f32
    %996 = vector.broadcast %cst_491 : f32 to vector<8x128xf32>
    %997 = arith.mulf %995, %996 : vector<8x128xf32>
    %cst_492 = arith.constant 5.000000e-01 : f32
    %998 = vector.broadcast %cst_492 : f32 to vector<8x128xf32>
    %999 = arith.addf %997, %998 : vector<8x128xf32>
    %1000 = math.floor %999 : vector<8x128xf32>
    %cst_493 = arith.constant 6.28318548 : f32
    %1001 = vector.broadcast %cst_493 : f32 to vector<8x128xf32>
    %1002 = arith.mulf %1000, %1001 : vector<8x128xf32>
    %1003 = arith.subf %995, %1002 : vector<8x128xf32>
    %cst_494 = arith.constant -1.74845553E-7 : f32
    %1004 = vector.broadcast %cst_494 : f32 to vector<8x128xf32>
    %1005 = arith.mulf %1000, %1004 : vector<8x128xf32>
    %1006 = arith.subf %1003, %1005 : vector<8x128xf32>
    %cst_495 = arith.constant 5.000000e-01 : f32
    %1007 = vector.broadcast %cst_495 : f32 to vector<8x128xf32>
    %1008 = arith.mulf %1007, %1006 : vector<8x128xf32>
    %1009 = arith.mulf %1008, %1008 : vector<8x128xf32>
    %cst_496 = arith.constant -2.50521079E-8 : f32
    %1010 = vector.broadcast %cst_496 : f32 to vector<8x128xf32>
    %1011 = arith.mulf %1010, %1009 : vector<8x128xf32>
    %cst_497 = arith.constant 2.75573188E-6 : f32
    %1012 = vector.broadcast %cst_497 : f32 to vector<8x128xf32>
    %1013 = arith.addf %1011, %1012 : vector<8x128xf32>
    %1014 = arith.mulf %1013, %1009 : vector<8x128xf32>
    %cst_498 = arith.constant 1.98412701E-4 : f32
    %1015 = vector.broadcast %cst_498 : f32 to vector<8x128xf32>
    %1016 = arith.subf %1014, %1015 : vector<8x128xf32>
    %1017 = arith.mulf %1016, %1009 : vector<8x128xf32>
    %cst_499 = arith.constant 0.00833333377 : f32
    %1018 = vector.broadcast %cst_499 : f32 to vector<8x128xf32>
    %1019 = arith.addf %1017, %1018 : vector<8x128xf32>
    %1020 = arith.mulf %1019, %1009 : vector<8x128xf32>
    %cst_500 = arith.constant 0.166666672 : f32
    %1021 = vector.broadcast %cst_500 : f32 to vector<8x128xf32>
    %1022 = arith.subf %1020, %1021 : vector<8x128xf32>
    %1023 = arith.mulf %1022, %1009 : vector<8x128xf32>
    %cst_501 = arith.constant 1.000000e+00 : f32
    %1024 = vector.broadcast %cst_501 : f32 to vector<8x128xf32>
    %1025 = arith.addf %1023, %1024 : vector<8x128xf32>
    %1026 = arith.mulf %1025, %1008 : vector<8x128xf32>
    %1027 = arith.mulf %1026, %1026 : vector<8x128xf32>
    %cst_502 = arith.constant 2.000000e+00 : f32
    %1028 = vector.broadcast %cst_502 : f32 to vector<8x128xf32>
    %1029 = arith.mulf %1028, %1027 : vector<8x128xf32>
    %cst_503 = arith.constant 1.000000e+00 : f32
    %1030 = vector.broadcast %cst_503 : f32 to vector<8x128xf32>
    %1031 = arith.subf %1030, %1029 : vector<8x128xf32>
    %1032 = arith.addf %990, %1031 : vector<8x128xf32>
    %c0_504 = arith.constant 0 : index
    %c6_505 = arith.constant 6 : index
    %c24_506 = arith.constant 24 : index
    %c0_507 = arith.constant 0 : index
    %1033 = vector.load %arg3[%c0_504, %c6_505, %c24_506, %c0_507] : memref<1x7x64x128xf32, #tpu.memory_space<vmem>>, vector<1x1x8x128xf32>
    %1034 = vector.shape_cast %1033 : vector<1x1x8x128xf32> to vector<8x128xf32>
    %1035 = arith.subf %1034, %823 : vector<8x128xf32>
    %1036 = vector.broadcast %821 : vector<8x1xf32> to vector<8x128xf32>
    %1037 = arith.subf %1035, %1036 : vector<8x128xf32>
    %cst_508 = arith.constant 0.159154937 : f32
    %1038 = vector.broadcast %cst_508 : f32 to vector<8x128xf32>
    %1039 = arith.mulf %1037, %1038 : vector<8x128xf32>
    %cst_509 = arith.constant 5.000000e-01 : f32
    %1040 = vector.broadcast %cst_509 : f32 to vector<8x128xf32>
    %1041 = arith.addf %1039, %1040 : vector<8x128xf32>
    %1042 = math.floor %1041 : vector<8x128xf32>
    %cst_510 = arith.constant 6.28318548 : f32
    %1043 = vector.broadcast %cst_510 : f32 to vector<8x128xf32>
    %1044 = arith.mulf %1042, %1043 : vector<8x128xf32>
    %1045 = arith.subf %1037, %1044 : vector<8x128xf32>
    %cst_511 = arith.constant -1.74845553E-7 : f32
    %1046 = vector.broadcast %cst_511 : f32 to vector<8x128xf32>
    %1047 = arith.mulf %1042, %1046 : vector<8x128xf32>
    %1048 = arith.subf %1045, %1047 : vector<8x128xf32>
    %cst_512 = arith.constant 5.000000e-01 : f32
    %1049 = vector.broadcast %cst_512 : f32 to vector<8x128xf32>
    %1050 = arith.mulf %1049, %1048 : vector<8x128xf32>
    %1051 = arith.mulf %1050, %1050 : vector<8x128xf32>
    %cst_513 = arith.constant -2.50521079E-8 : f32
    %1052 = vector.broadcast %cst_513 : f32 to vector<8x128xf32>
    %1053 = arith.mulf %1052, %1051 : vector<8x128xf32>
    %cst_514 = arith.constant 2.75573188E-6 : f32
    %1054 = vector.broadcast %cst_514 : f32 to vector<8x128xf32>
    %1055 = arith.addf %1053, %1054 : vector<8x128xf32>
    %1056 = arith.mulf %1055, %1051 : vector<8x128xf32>
    %cst_515 = arith.constant 1.98412701E-4 : f32
    %1057 = vector.broadcast %cst_515 : f32 to vector<8x128xf32>
    %1058 = arith.subf %1056, %1057 : vector<8x128xf32>
    %1059 = arith.mulf %1058, %1051 : vector<8x128xf32>
    %cst_516 = arith.constant 0.00833333377 : f32
    %1060 = vector.broadcast %cst_516 : f32 to vector<8x128xf32>
    %1061 = arith.addf %1059, %1060 : vector<8x128xf32>
    %1062 = arith.mulf %1061, %1051 : vector<8x128xf32>
    %cst_517 = arith.constant 0.166666672 : f32
    %1063 = vector.broadcast %cst_517 : f32 to vector<8x128xf32>
    %1064 = arith.subf %1062, %1063 : vector<8x128xf32>
    %1065 = arith.mulf %1064, %1051 : vector<8x128xf32>
    %cst_518 = arith.constant 1.000000e+00 : f32
    %1066 = vector.broadcast %cst_518 : f32 to vector<8x128xf32>
    %1067 = arith.addf %1065, %1066 : vector<8x128xf32>
    %1068 = arith.mulf %1067, %1050 : vector<8x128xf32>
    %1069 = arith.mulf %1068, %1068 : vector<8x128xf32>
    %cst_519 = arith.constant 2.000000e+00 : f32
    %1070 = vector.broadcast %cst_519 : f32 to vector<8x128xf32>
    %1071 = arith.mulf %1070, %1069 : vector<8x128xf32>
    %cst_520 = arith.constant 1.000000e+00 : f32
    %1072 = vector.broadcast %cst_520 : f32 to vector<8x128xf32>
    %1073 = arith.subf %1072, %1071 : vector<8x128xf32>
    %1074 = arith.addf %1032, %1073 : vector<8x128xf32>
    %cst_521 = arith.constant 0.166666672 : f32
    %1075 = vector.broadcast %cst_521 : f32 to vector<8x128xf32>
    %1076 = arith.mulf %1074, %1075 : vector<8x128xf32>
    %c0_522 = arith.constant 0 : index
    %c24_523 = arith.constant 24 : index
    %c0_524 = arith.constant 0 : index
    %1077 = vector.load %arg4[%c0_522, %c24_523, %c0_524] : memref<1x64x128xf32, #tpu.memory_space<vmem>>, vector<1x8x128xf32>
    %1078 = vector.shape_cast %1077 : vector<1x8x128xf32> to vector<8x128xf32>
    %1079 = vector.shape_cast %1076 : vector<8x128xf32> to vector<1x8x128xf32>
    tpu.vector_store %arg4[%c0_522, %c24_523, %c0_524], %1079 {strides = array<i32>} : memref<1x64x128xf32, #tpu.memory_space<vmem>>, vector<1x8x128xf32>,
    %c0_525 = arith.constant 0 : index
    %c0_526 = arith.constant 0 : index
    %c32 = arith.constant 32 : index
    %c0_527 = arith.constant 0 : index
    %1080 = vector.load %arg2[%c0_525, %c0_526, %c32, %c0_527] : memref<1x6x64x1xf32, #tpu.memory_space<vmem>>, vector<1x1x8x1xf32>
    %1081 = vector.shape_cast %1080 : vector<1x1x8x1xf32> to vector<8x1xf32>
    %c0_528 = arith.constant 0 : index
    %c1_529 = arith.constant 1 : index
    %c32_530 = arith.constant 32 : index
    %c0_531 = arith.constant 0 : index
    %1082 = vector.load %arg2[%c0_528, %c1_529, %c32_530, %c0_531] : memref<1x6x64x1xf32, #tpu.memory_space<vmem>>, vector<1x1x8x1xf32>
    %1083 = vector.shape_cast %1082 : vector<1x1x8x1xf32> to vector<8x1xf32>
    %c0_532 = arith.constant 0 : index
    %c2_533 = arith.constant 2 : index
    %c32_534 = arith.constant 32 : index
    %c0_535 = arith.constant 0 : index
    %1084 = vector.load %arg2[%c0_532, %c2_533, %c32_534, %c0_535] : memref<1x6x64x1xf32, #tpu.memory_space<vmem>>, vector<1x1x8x1xf32>
    %1085 = vector.shape_cast %1084 : vector<1x1x8x1xf32> to vector<8x1xf32>
    %c0_536 = arith.constant 0 : index
    %c3_537 = arith.constant 3 : index
    %c32_538 = arith.constant 32 : index
    %c0_539 = arith.constant 0 : index
    %1086 = vector.load %arg2[%c0_536, %c3_537, %c32_538, %c0_539] : memref<1x6x64x1xf32, #tpu.memory_space<vmem>>, vector<1x1x8x1xf32>
    %1087 = vector.shape_cast %1086 : vector<1x1x8x1xf32> to vector<8x1xf32>
    %c0_540 = arith.constant 0 : index
    %c4_541 = arith.constant 4 : index
    %c32_542 = arith.constant 32 : index
    %c0_543 = arith.constant 0 : index
    %1088 = vector.load %arg2[%c0_540, %c4_541, %c32_542, %c0_543] : memref<1x6x64x1xf32, #tpu.memory_space<vmem>>, vector<1x1x8x1xf32>
    %1089 = vector.shape_cast %1088 : vector<1x1x8x1xf32> to vector<8x1xf32>
    %c0_544 = arith.constant 0 : index
    %c5_545 = arith.constant 5 : index
    %c32_546 = arith.constant 32 : index
    %c0_547 = arith.constant 0 : index
    %1090 = vector.load %arg2[%c0_544, %c5_545, %c32_546, %c0_547] : memref<1x6x64x1xf32, #tpu.memory_space<vmem>>, vector<1x1x8x1xf32>
    %1091 = vector.shape_cast %1090 : vector<1x1x8x1xf32> to vector<8x1xf32>
    %c0_548 = arith.constant 0 : index
    %c0_549 = arith.constant 0 : index
    %c32_550 = arith.constant 32 : index
    %c0_551 = arith.constant 0 : index
    %1092 = vector.load %arg3[%c0_548, %c0_549, %c32_550, %c0_551] : memref<1x7x64x128xf32, #tpu.memory_space<vmem>>, vector<1x1x8x128xf32>
    %1093 = vector.shape_cast %1092 : vector<1x1x8x128xf32> to vector<8x128xf32>
    %c0_552 = arith.constant 0 : index
    %c1_553 = arith.constant 1 : index
    %c32_554 = arith.constant 32 : index
    %c0_555 = arith.constant 0 : index
    %1094 = vector.load %arg3[%c0_552, %c1_553, %c32_554, %c0_555] : memref<1x7x64x128xf32, #tpu.memory_space<vmem>>, vector<1x1x8x128xf32>
    %1095 = vector.shape_cast %1094 : vector<1x1x8x128xf32> to vector<8x128xf32>
    %1096 = arith.subf %1095, %1093 : vector<8x128xf32>
    %1097 = vector.broadcast %1081 : vector<8x1xf32> to vector<8x128xf32>
    %1098 = arith.subf %1096, %1097 : vector<8x128xf32>
    %cst_556 = arith.constant 0.159154937 : f32
    %1099 = vector.broadcast %cst_556 : f32 to vector<8x128xf32>
    %1100 = arith.mulf %1098, %1099 : vector<8x128xf32>
    %cst_557 = arith.constant 5.000000e-01 : f32
    %1101 = vector.broadcast %cst_557 : f32 to vector<8x128xf32>
    %1102 = arith.addf %1100, %1101 : vector<8x128xf32>
    %1103 = math.floor %1102 : vector<8x128xf32>
    %cst_558 = arith.constant 6.28318548 : f32
    %1104 = vector.broadcast %cst_558 : f32 to vector<8x128xf32>
    %1105 = arith.mulf %1103, %1104 : vector<8x128xf32>
    %1106 = arith.subf %1098, %1105 : vector<8x128xf32>
    %cst_559 = arith.constant -1.74845553E-7 : f32
    %1107 = vector.broadcast %cst_559 : f32 to vector<8x128xf32>
    %1108 = arith.mulf %1103, %1107 : vector<8x128xf32>
    %1109 = arith.subf %1106, %1108 : vector<8x128xf32>
    %cst_560 = arith.constant 5.000000e-01 : f32
    %1110 = vector.broadcast %cst_560 : f32 to vector<8x128xf32>
    %1111 = arith.mulf %1110, %1109 : vector<8x128xf32>
    %1112 = arith.mulf %1111, %1111 : vector<8x128xf32>
    %cst_561 = arith.constant -2.50521079E-8 : f32
    %1113 = vector.broadcast %cst_561 : f32 to vector<8x128xf32>
    %1114 = arith.mulf %1113, %1112 : vector<8x128xf32>
    %cst_562 = arith.constant 2.75573188E-6 : f32
    %1115 = vector.broadcast %cst_562 : f32 to vector<8x128xf32>
    %1116 = arith.addf %1114, %1115 : vector<8x128xf32>
    %1117 = arith.mulf %1116, %1112 : vector<8x128xf32>
    %cst_563 = arith.constant 1.98412701E-4 : f32
    %1118 = vector.broadcast %cst_563 : f32 to vector<8x128xf32>
    %1119 = arith.subf %1117, %1118 : vector<8x128xf32>
    %1120 = arith.mulf %1119, %1112 : vector<8x128xf32>
    %cst_564 = arith.constant 0.00833333377 : f32
    %1121 = vector.broadcast %cst_564 : f32 to vector<8x128xf32>
    %1122 = arith.addf %1120, %1121 : vector<8x128xf32>
    %1123 = arith.mulf %1122, %1112 : vector<8x128xf32>
    %cst_565 = arith.constant 0.166666672 : f32
    %1124 = vector.broadcast %cst_565 : f32 to vector<8x128xf32>
    %1125 = arith.subf %1123, %1124 : vector<8x128xf32>
    %1126 = arith.mulf %1125, %1112 : vector<8x128xf32>
    %cst_566 = arith.constant 1.000000e+00 : f32
    %1127 = vector.broadcast %cst_566 : f32 to vector<8x128xf32>
    %1128 = arith.addf %1126, %1127 : vector<8x128xf32>
    %1129 = arith.mulf %1128, %1111 : vector<8x128xf32>
    %1130 = arith.mulf %1129, %1129 : vector<8x128xf32>
    %cst_567 = arith.constant 2.000000e+00 : f32
    %1131 = vector.broadcast %cst_567 : f32 to vector<8x128xf32>
    %1132 = arith.mulf %1131, %1130 : vector<8x128xf32>
    %cst_568 = arith.constant 1.000000e+00 : f32
    %1133 = vector.broadcast %cst_568 : f32 to vector<8x128xf32>
    %1134 = arith.subf %1133, %1132 : vector<8x128xf32>
    %c0_569 = arith.constant 0 : index
    %c2_570 = arith.constant 2 : index
    %c32_571 = arith.constant 32 : index
    %c0_572 = arith.constant 0 : index
    %1135 = vector.load %arg3[%c0_569, %c2_570, %c32_571, %c0_572] : memref<1x7x64x128xf32, #tpu.memory_space<vmem>>, vector<1x1x8x128xf32>
    %1136 = vector.shape_cast %1135 : vector<1x1x8x128xf32> to vector<8x128xf32>
    %1137 = arith.subf %1136, %1093 : vector<8x128xf32>
    %1138 = vector.broadcast %1083 : vector<8x1xf32> to vector<8x128xf32>
    %1139 = arith.subf %1137, %1138 : vector<8x128xf32>
    %cst_573 = arith.constant 0.159154937 : f32
    %1140 = vector.broadcast %cst_573 : f32 to vector<8x128xf32>
    %1141 = arith.mulf %1139, %1140 : vector<8x128xf32>
    %cst_574 = arith.constant 5.000000e-01 : f32
    %1142 = vector.broadcast %cst_574 : f32 to vector<8x128xf32>
    %1143 = arith.addf %1141, %1142 : vector<8x128xf32>
    %1144 = math.floor %1143 : vector<8x128xf32>
    %cst_575 = arith.constant 6.28318548 : f32
    %1145 = vector.broadcast %cst_575 : f32 to vector<8x128xf32>
    %1146 = arith.mulf %1144, %1145 : vector<8x128xf32>
    %1147 = arith.subf %1139, %1146 : vector<8x128xf32>
    %cst_576 = arith.constant -1.74845553E-7 : f32
    %1148 = vector.broadcast %cst_576 : f32 to vector<8x128xf32>
    %1149 = arith.mulf %1144, %1148 : vector<8x128xf32>
    %1150 = arith.subf %1147, %1149 : vector<8x128xf32>
    %cst_577 = arith.constant 5.000000e-01 : f32
    %1151 = vector.broadcast %cst_577 : f32 to vector<8x128xf32>
    %1152 = arith.mulf %1151, %1150 : vector<8x128xf32>
    %1153 = arith.mulf %1152, %1152 : vector<8x128xf32>
    %cst_578 = arith.constant -2.50521079E-8 : f32
    %1154 = vector.broadcast %cst_578 : f32 to vector<8x128xf32>
    %1155 = arith.mulf %1154, %1153 : vector<8x128xf32>
    %cst_579 = arith.constant 2.75573188E-6 : f32
    %1156 = vector.broadcast %cst_579 : f32 to vector<8x128xf32>
    %1157 = arith.addf %1155, %1156 : vector<8x128xf32>
    %1158 = arith.mulf %1157, %1153 : vector<8x128xf32>
    %cst_580 = arith.constant 1.98412701E-4 : f32
    %1159 = vector.broadcast %cst_580 : f32 to vector<8x128xf32>
    %1160 = arith.subf %1158, %1159 : vector<8x128xf32>
    %1161 = arith.mulf %1160, %1153 : vector<8x128xf32>
    %cst_581 = arith.constant 0.00833333377 : f32
    %1162 = vector.broadcast %cst_581 : f32 to vector<8x128xf32>
    %1163 = arith.addf %1161, %1162 : vector<8x128xf32>
    %1164 = arith.mulf %1163, %1153 : vector<8x128xf32>
    %cst_582 = arith.constant 0.166666672 : f32
    %1165 = vector.broadcast %cst_582 : f32 to vector<8x128xf32>
    %1166 = arith.subf %1164, %1165 : vector<8x128xf32>
    %1167 = arith.mulf %1166, %1153 : vector<8x128xf32>
    %cst_583 = arith.constant 1.000000e+00 : f32
    %1168 = vector.broadcast %cst_583 : f32 to vector<8x128xf32>
    %1169 = arith.addf %1167, %1168 : vector<8x128xf32>
    %1170 = arith.mulf %1169, %1152 : vector<8x128xf32>
    %1171 = arith.mulf %1170, %1170 : vector<8x128xf32>
    %cst_584 = arith.constant 2.000000e+00 : f32
    %1172 = vector.broadcast %cst_584 : f32 to vector<8x128xf32>
    %1173 = arith.mulf %1172, %1171 : vector<8x128xf32>
    %cst_585 = arith.constant 1.000000e+00 : f32
    %1174 = vector.broadcast %cst_585 : f32 to vector<8x128xf32>
    %1175 = arith.subf %1174, %1173 : vector<8x128xf32>
    %1176 = arith.addf %1134, %1175 : vector<8x128xf32>
    %c0_586 = arith.constant 0 : index
    %c3_587 = arith.constant 3 : index
    %c32_588 = arith.constant 32 : index
    %c0_589 = arith.constant 0 : index
    %1177 = vector.load %arg3[%c0_586, %c3_587, %c32_588, %c0_589] : memref<1x7x64x128xf32, #tpu.memory_space<vmem>>, vector<1x1x8x128xf32>
    %1178 = vector.shape_cast %1177 : vector<1x1x8x128xf32> to vector<8x128xf32>
    %1179 = arith.subf %1178, %1093 : vector<8x128xf32>
    %1180 = vector.broadcast %1085 : vector<8x1xf32> to vector<8x128xf32>
    %1181 = arith.subf %1179, %1180 : vector<8x128xf32>
    %cst_590 = arith.constant 0.159154937 : f32
    %1182 = vector.broadcast %cst_590 : f32 to vector<8x128xf32>
    %1183 = arith.mulf %1181, %1182 : vector<8x128xf32>
    %cst_591 = arith.constant 5.000000e-01 : f32
    %1184 = vector.broadcast %cst_591 : f32 to vector<8x128xf32>
    %1185 = arith.addf %1183, %1184 : vector<8x128xf32>
    %1186 = math.floor %1185 : vector<8x128xf32>
    %cst_592 = arith.constant 6.28318548 : f32
    %1187 = vector.broadcast %cst_592 : f32 to vector<8x128xf32>
    %1188 = arith.mulf %1186, %1187 : vector<8x128xf32>
    %1189 = arith.subf %1181, %1188 : vector<8x128xf32>
    %cst_593 = arith.constant -1.74845553E-7 : f32
    %1190 = vector.broadcast %cst_593 : f32 to vector<8x128xf32>
    %1191 = arith.mulf %1186, %1190 : vector<8x128xf32>
    %1192 = arith.subf %1189, %1191 : vector<8x128xf32>
    %cst_594 = arith.constant 5.000000e-01 : f32
    %1193 = vector.broadcast %cst_594 : f32 to vector<8x128xf32>
    %1194 = arith.mulf %1193, %1192 : vector<8x128xf32>
    %1195 = arith.mulf %1194, %1194 : vector<8x128xf32>
    %cst_595 = arith.constant -2.50521079E-8 : f32
    %1196 = vector.broadcast %cst_595 : f32 to vector<8x128xf32>
    %1197 = arith.mulf %1196, %1195 : vector<8x128xf32>
    %cst_596 = arith.constant 2.75573188E-6 : f32
    %1198 = vector.broadcast %cst_596 : f32 to vector<8x128xf32>
    %1199 = arith.addf %1197, %1198 : vector<8x128xf32>
    %1200 = arith.mulf %1199, %1195 : vector<8x128xf32>
    %cst_597 = arith.constant 1.98412701E-4 : f32
    %1201 = vector.broadcast %cst_597 : f32 to vector<8x128xf32>
    %1202 = arith.subf %1200, %1201 : vector<8x128xf32>
    %1203 = arith.mulf %1202, %1195 : vector<8x128xf32>
    %cst_598 = arith.constant 0.00833333377 : f32
    %1204 = vector.broadcast %cst_598 : f32 to vector<8x128xf32>
    %1205 = arith.addf %1203, %1204 : vector<8x128xf32>
    %1206 = arith.mulf %1205, %1195 : vector<8x128xf32>
    %cst_599 = arith.constant 0.166666672 : f32
    %1207 = vector.broadcast %cst_599 : f32 to vector<8x128xf32>
    %1208 = arith.subf %1206, %1207 : vector<8x128xf32>
    %1209 = arith.mulf %1208, %1195 : vector<8x128xf32>
    %cst_600 = arith.constant 1.000000e+00 : f32
    %1210 = vector.broadcast %cst_600 : f32 to vector<8x128xf32>
    %1211 = arith.addf %1209, %1210 : vector<8x128xf32>
    %1212 = arith.mulf %1211, %1194 : vector<8x128xf32>
    %1213 = arith.mulf %1212, %1212 : vector<8x128xf32>
    %cst_601 = arith.constant 2.000000e+00 : f32
    %1214 = vector.broadcast %cst_601 : f32 to vector<8x128xf32>
    %1215 = arith.mulf %1214, %1213 : vector<8x128xf32>
    %cst_602 = arith.constant 1.000000e+00 : f32
    %1216 = vector.broadcast %cst_602 : f32 to vector<8x128xf32>
    %1217 = arith.subf %1216, %1215 : vector<8x128xf32>
    %1218 = arith.addf %1176, %1217 : vector<8x128xf32>
    %c0_603 = arith.constant 0 : index
    %c4_604 = arith.constant 4 : index
    %c32_605 = arith.constant 32 : index
    %c0_606 = arith.constant 0 : index
    %1219 = vector.load %arg3[%c0_603, %c4_604, %c32_605, %c0_606] : memref<1x7x64x128xf32, #tpu.memory_space<vmem>>, vector<1x1x8x128xf32>
    %1220 = vector.shape_cast %1219 : vector<1x1x8x128xf32> to vector<8x128xf32>
    %1221 = arith.subf %1220, %1093 : vector<8x128xf32>
    %1222 = vector.broadcast %1087 : vector<8x1xf32> to vector<8x128xf32>
    %1223 = arith.subf %1221, %1222 : vector<8x128xf32>
    %cst_607 = arith.constant 0.159154937 : f32
    %1224 = vector.broadcast %cst_607 : f32 to vector<8x128xf32>
    %1225 = arith.mulf %1223, %1224 : vector<8x128xf32>
    %cst_608 = arith.constant 5.000000e-01 : f32
    %1226 = vector.broadcast %cst_608 : f32 to vector<8x128xf32>
    %1227 = arith.addf %1225, %1226 : vector<8x128xf32>
    %1228 = math.floor %1227 : vector<8x128xf32>
    %cst_609 = arith.constant 6.28318548 : f32
    %1229 = vector.broadcast %cst_609 : f32 to vector<8x128xf32>
    %1230 = arith.mulf %1228, %1229 : vector<8x128xf32>
    %1231 = arith.subf %1223, %1230 : vector<8x128xf32>
    %cst_610 = arith.constant -1.74845553E-7 : f32
    %1232 = vector.broadcast %cst_610 : f32 to vector<8x128xf32>
    %1233 = arith.mulf %1228, %1232 : vector<8x128xf32>
    %1234 = arith.subf %1231, %1233 : vector<8x128xf32>
    %cst_611 = arith.constant 5.000000e-01 : f32
    %1235 = vector.broadcast %cst_611 : f32 to vector<8x128xf32>
    %1236 = arith.mulf %1235, %1234 : vector<8x128xf32>
    %1237 = arith.mulf %1236, %1236 : vector<8x128xf32>
    %cst_612 = arith.constant -2.50521079E-8 : f32
    %1238 = vector.broadcast %cst_612 : f32 to vector<8x128xf32>
    %1239 = arith.mulf %1238, %1237 : vector<8x128xf32>
    %cst_613 = arith.constant 2.75573188E-6 : f32
    %1240 = vector.broadcast %cst_613 : f32 to vector<8x128xf32>
    %1241 = arith.addf %1239, %1240 : vector<8x128xf32>
    %1242 = arith.mulf %1241, %1237 : vector<8x128xf32>
    %cst_614 = arith.constant 1.98412701E-4 : f32
    %1243 = vector.broadcast %cst_614 : f32 to vector<8x128xf32>
    %1244 = arith.subf %1242, %1243 : vector<8x128xf32>
    %1245 = arith.mulf %1244, %1237 : vector<8x128xf32>
    %cst_615 = arith.constant 0.00833333377 : f32
    %1246 = vector.broadcast %cst_615 : f32 to vector<8x128xf32>
    %1247 = arith.addf %1245, %1246 : vector<8x128xf32>
    %1248 = arith.mulf %1247, %1237 : vector<8x128xf32>
    %cst_616 = arith.constant 0.166666672 : f32
    %1249 = vector.broadcast %cst_616 : f32 to vector<8x128xf32>
    %1250 = arith.subf %1248, %1249 : vector<8x128xf32>
    %1251 = arith.mulf %1250, %1237 : vector<8x128xf32>
    %cst_617 = arith.constant 1.000000e+00 : f32
    %1252 = vector.broadcast %cst_617 : f32 to vector<8x128xf32>
    %1253 = arith.addf %1251, %1252 : vector<8x128xf32>
    %1254 = arith.mulf %1253, %1236 : vector<8x128xf32>
    %1255 = arith.mulf %1254, %1254 : vector<8x128xf32>
    %cst_618 = arith.constant 2.000000e+00 : f32
    %1256 = vector.broadcast %cst_618 : f32 to vector<8x128xf32>
    %1257 = arith.mulf %1256, %1255 : vector<8x128xf32>
    %cst_619 = arith.constant 1.000000e+00 : f32
    %1258 = vector.broadcast %cst_619 : f32 to vector<8x128xf32>
    %1259 = arith.subf %1258, %1257 : vector<8x128xf32>
    %1260 = arith.addf %1218, %1259 : vector<8x128xf32>
    %c0_620 = arith.constant 0 : index
    %c5_621 = arith.constant 5 : index
    %c32_622 = arith.constant 32 : index
    %c0_623 = arith.constant 0 : index
    %1261 = vector.load %arg3[%c0_620, %c5_621, %c32_622, %c0_623] : memref<1x7x64x128xf32, #tpu.memory_space<vmem>>, vector<1x1x8x128xf32>
    %1262 = vector.shape_cast %1261 : vector<1x1x8x128xf32> to vector<8x128xf32>
    %1263 = arith.subf %1262, %1093 : vector<8x128xf32>
    %1264 = vector.broadcast %1089 : vector<8x1xf32> to vector<8x128xf32>
    %1265 = arith.subf %1263, %1264 : vector<8x128xf32>
    %cst_624 = arith.constant 0.159154937 : f32
    %1266 = vector.broadcast %cst_624 : f32 to vector<8x128xf32>
    %1267 = arith.mulf %1265, %1266 : vector<8x128xf32>
    %cst_625 = arith.constant 5.000000e-01 : f32
    %1268 = vector.broadcast %cst_625 : f32 to vector<8x128xf32>
    %1269 = arith.addf %1267, %1268 : vector<8x128xf32>
    %1270 = math.floor %1269 : vector<8x128xf32>
    %cst_626 = arith.constant 6.28318548 : f32
    %1271 = vector.broadcast %cst_626 : f32 to vector<8x128xf32>
    %1272 = arith.mulf %1270, %1271 : vector<8x128xf32>
    %1273 = arith.subf %1265, %1272 : vector<8x128xf32>
    %cst_627 = arith.constant -1.74845553E-7 : f32
    %1274 = vector.broadcast %cst_627 : f32 to vector<8x128xf32>
    %1275 = arith.mulf %1270, %1274 : vector<8x128xf32>
    %1276 = arith.subf %1273, %1275 : vector<8x128xf32>
    %cst_628 = arith.constant 5.000000e-01 : f32
    %1277 = vector.broadcast %cst_628 : f32 to vector<8x128xf32>
    %1278 = arith.mulf %1277, %1276 : vector<8x128xf32>
    %1279 = arith.mulf %1278, %1278 : vector<8x128xf32>
    %cst_629 = arith.constant -2.50521079E-8 : f32
    %1280 = vector.broadcast %cst_629 : f32 to vector<8x128xf32>
    %1281 = arith.mulf %1280, %1279 : vector<8x128xf32>
    %cst_630 = arith.constant 2.75573188E-6 : f32
    %1282 = vector.broadcast %cst_630 : f32 to vector<8x128xf32>
    %1283 = arith.addf %1281, %1282 : vector<8x128xf32>
    %1284 = arith.mulf %1283, %1279 : vector<8x128xf32>
    %cst_631 = arith.constant 1.98412701E-4 : f32
    %1285 = vector.broadcast %cst_631 : f32 to vector<8x128xf32>
    %1286 = arith.subf %1284, %1285 : vector<8x128xf32>
    %1287 = arith.mulf %1286, %1279 : vector<8x128xf32>
    %cst_632 = arith.constant 0.00833333377 : f32
    %1288 = vector.broadcast %cst_632 : f32 to vector<8x128xf32>
    %1289 = arith.addf %1287, %1288 : vector<8x128xf32>
    %1290 = arith.mulf %1289, %1279 : vector<8x128xf32>
    %cst_633 = arith.constant 0.166666672 : f32
    %1291 = vector.broadcast %cst_633 : f32 to vector<8x128xf32>
    %1292 = arith.subf %1290, %1291 : vector<8x128xf32>
    %1293 = arith.mulf %1292, %1279 : vector<8x128xf32>
    %cst_634 = arith.constant 1.000000e+00 : f32
    %1294 = vector.broadcast %cst_634 : f32 to vector<8x128xf32>
    %1295 = arith.addf %1293, %1294 : vector<8x128xf32>
    %1296 = arith.mulf %1295, %1278 : vector<8x128xf32>
    %1297 = arith.mulf %1296, %1296 : vector<8x128xf32>
    %cst_635 = arith.constant 2.000000e+00 : f32
    %1298 = vector.broadcast %cst_635 : f32 to vector<8x128xf32>
    %1299 = arith.mulf %1298, %1297 : vector<8x128xf32>
    %cst_636 = arith.constant 1.000000e+00 : f32
    %1300 = vector.broadcast %cst_636 : f32 to vector<8x128xf32>
    %1301 = arith.subf %1300, %1299 : vector<8x128xf32>
    %1302 = arith.addf %1260, %1301 : vector<8x128xf32>
    %c0_637 = arith.constant 0 : index
    %c6_638 = arith.constant 6 : index
    %c32_639 = arith.constant 32 : index
    %c0_640 = arith.constant 0 : index
    %1303 = vector.load %arg3[%c0_637, %c6_638, %c32_639, %c0_640] : memref<1x7x64x128xf32, #tpu.memory_space<vmem>>, vector<1x1x8x128xf32>
    %1304 = vector.shape_cast %1303 : vector<1x1x8x128xf32> to vector<8x128xf32>
    %1305 = arith.subf %1304, %1093 : vector<8x128xf32>
    %1306 = vector.broadcast %1091 : vector<8x1xf32> to vector<8x128xf32>
    %1307 = arith.subf %1305, %1306 : vector<8x128xf32>
    %cst_641 = arith.constant 0.159154937 : f32
    %1308 = vector.broadcast %cst_641 : f32 to vector<8x128xf32>
    %1309 = arith.mulf %1307, %1308 : vector<8x128xf32>
    %cst_642 = arith.constant 5.000000e-01 : f32
    %1310 = vector.broadcast %cst_642 : f32 to vector<8x128xf32>
    %1311 = arith.addf %1309, %1310 : vector<8x128xf32>
    %1312 = math.floor %1311 : vector<8x128xf32>
    %cst_643 = arith.constant 6.28318548 : f32
    %1313 = vector.broadcast %cst_643 : f32 to vector<8x128xf32>
    %1314 = arith.mulf %1312, %1313 : vector<8x128xf32>
    %1315 = arith.subf %1307, %1314 : vector<8x128xf32>
    %cst_644 = arith.constant -1.74845553E-7 : f32
    %1316 = vector.broadcast %cst_644 : f32 to vector<8x128xf32>
    %1317 = arith.mulf %1312, %1316 : vector<8x128xf32>
    %1318 = arith.subf %1315, %1317 : vector<8x128xf32>
    %cst_645 = arith.constant 5.000000e-01 : f32
    %1319 = vector.broadcast %cst_645 : f32 to vector<8x128xf32>
    %1320 = arith.mulf %1319, %1318 : vector<8x128xf32>
    %1321 = arith.mulf %1320, %1320 : vector<8x128xf32>
    %cst_646 = arith.constant -2.50521079E-8 : f32
    %1322 = vector.broadcast %cst_646 : f32 to vector<8x128xf32>
    %1323 = arith.mulf %1322, %1321 : vector<8x128xf32>
    %cst_647 = arith.constant 2.75573188E-6 : f32
    %1324 = vector.broadcast %cst_647 : f32 to vector<8x128xf32>
    %1325 = arith.addf %1323, %1324 : vector<8x128xf32>
    %1326 = arith.mulf %1325, %1321 : vector<8x128xf32>
    %cst_648 = arith.constant 1.98412701E-4 : f32
    %1327 = vector.broadcast %cst_648 : f32 to vector<8x128xf32>
    %1328 = arith.subf %1326, %1327 : vector<8x128xf32>
    %1329 = arith.mulf %1328, %1321 : vector<8x128xf32>
    %cst_649 = arith.constant 0.00833333377 : f32
    %1330 = vector.broadcast %cst_649 : f32 to vector<8x128xf32>
    %1331 = arith.addf %1329, %1330 : vector<8x128xf32>
    %1332 = arith.mulf %1331, %1321 : vector<8x128xf32>
    %cst_650 = arith.constant 0.166666672 : f32
    %1333 = vector.broadcast %cst_650 : f32 to vector<8x128xf32>
    %1334 = arith.subf %1332, %1333 : vector<8x128xf32>
    %1335 = arith.mulf %1334, %1321 : vector<8x128xf32>
    %cst_651 = arith.constant 1.000000e+00 : f32
    %1336 = vector.broadcast %cst_651 : f32 to vector<8x128xf32>
    %1337 = arith.addf %1335, %1336 : vector<8x128xf32>
    %1338 = arith.mulf %1337, %1320 : vector<8x128xf32>
    %1339 = arith.mulf %1338, %1338 : vector<8x128xf32>
    %cst_652 = arith.constant 2.000000e+00 : f32
    %1340 = vector.broadcast %cst_652 : f32 to vector<8x128xf32>
    %1341 = arith.mulf %1340, %1339 : vector<8x128xf32>
    %cst_653 = arith.constant 1.000000e+00 : f32
    %1342 = vector.broadcast %cst_653 : f32 to vector<8x128xf32>
    %1343 = arith.subf %1342, %1341 : vector<8x128xf32>
    %1344 = arith.addf %1302, %1343 : vector<8x128xf32>
    %cst_654 = arith.constant 0.166666672 : f32
    %1345 = vector.broadcast %cst_654 : f32 to vector<8x128xf32>
    %1346 = arith.mulf %1344, %1345 : vector<8x128xf32>
    %c0_655 = arith.constant 0 : index
    %c32_656 = arith.constant 32 : index
    %c0_657 = arith.constant 0 : index
    %1347 = vector.load %arg4[%c0_655, %c32_656, %c0_657] : memref<1x64x128xf32, #tpu.memory_space<vmem>>, vector<1x8x128xf32>
    %1348 = vector.shape_cast %1347 : vector<1x8x128xf32> to vector<8x128xf32>
    %1349 = vector.shape_cast %1346 : vector<8x128xf32> to vector<1x8x128xf32>
    tpu.vector_store %arg4[%c0_655, %c32_656, %c0_657], %1349 {strides = array<i32>} : memref<1x64x128xf32, #tpu.memory_space<vmem>>, vector<1x8x128xf32>,
    %c0_658 = arith.constant 0 : index
    %c0_659 = arith.constant 0 : index
    %c40 = arith.constant 40 : index
    %c0_660 = arith.constant 0 : index
    %1350 = vector.load %arg2[%c0_658, %c0_659, %c40, %c0_660] : memref<1x6x64x1xf32, #tpu.memory_space<vmem>>, vector<1x1x8x1xf32>
    %1351 = vector.shape_cast %1350 : vector<1x1x8x1xf32> to vector<8x1xf32>
    %c0_661 = arith.constant 0 : index
    %c1_662 = arith.constant 1 : index
    %c40_663 = arith.constant 40 : index
    %c0_664 = arith.constant 0 : index
    %1352 = vector.load %arg2[%c0_661, %c1_662, %c40_663, %c0_664] : memref<1x6x64x1xf32, #tpu.memory_space<vmem>>, vector<1x1x8x1xf32>
    %1353 = vector.shape_cast %1352 : vector<1x1x8x1xf32> to vector<8x1xf32>
    %c0_665 = arith.constant 0 : index
    %c2_666 = arith.constant 2 : index
    %c40_667 = arith.constant 40 : index
    %c0_668 = arith.constant 0 : index
    %1354 = vector.load %arg2[%c0_665, %c2_666, %c40_667, %c0_668] : memref<1x6x64x1xf32, #tpu.memory_space<vmem>>, vector<1x1x8x1xf32>
    %1355 = vector.shape_cast %1354 : vector<1x1x8x1xf32> to vector<8x1xf32>
    %c0_669 = arith.constant 0 : index
    %c3_670 = arith.constant 3 : index
    %c40_671 = arith.constant 40 : index
    %c0_672 = arith.constant 0 : index
    %1356 = vector.load %arg2[%c0_669, %c3_670, %c40_671, %c0_672] : memref<1x6x64x1xf32, #tpu.memory_space<vmem>>, vector<1x1x8x1xf32>
    %1357 = vector.shape_cast %1356 : vector<1x1x8x1xf32> to vector<8x1xf32>
    %c0_673 = arith.constant 0 : index
    %c4_674 = arith.constant 4 : index
    %c40_675 = arith.constant 40 : index
    %c0_676 = arith.constant 0 : index
    %1358 = vector.load %arg2[%c0_673, %c4_674, %c40_675, %c0_676] : memref<1x6x64x1xf32, #tpu.memory_space<vmem>>, vector<1x1x8x1xf32>
    %1359 = vector.shape_cast %1358 : vector<1x1x8x1xf32> to vector<8x1xf32>
    %c0_677 = arith.constant 0 : index
    %c5_678 = arith.constant 5 : index
    %c40_679 = arith.constant 40 : index
    %c0_680 = arith.constant 0 : index
    %1360 = vector.load %arg2[%c0_677, %c5_678, %c40_679, %c0_680] : memref<1x6x64x1xf32, #tpu.memory_space<vmem>>, vector<1x1x8x1xf32>
    %1361 = vector.shape_cast %1360 : vector<1x1x8x1xf32> to vector<8x1xf32>
    %c0_681 = arith.constant 0 : index
    %c0_682 = arith.constant 0 : index
    %c40_683 = arith.constant 40 : index
    %c0_684 = arith.constant 0 : index
    %1362 = vector.load %arg3[%c0_681, %c0_682, %c40_683, %c0_684] : memref<1x7x64x128xf32, #tpu.memory_space<vmem>>, vector<1x1x8x128xf32>
    %1363 = vector.shape_cast %1362 : vector<1x1x8x128xf32> to vector<8x128xf32>
    %c0_685 = arith.constant 0 : index
    %c1_686 = arith.constant 1 : index
    %c40_687 = arith.constant 40 : index
    %c0_688 = arith.constant 0 : index
    %1364 = vector.load %arg3[%c0_685, %c1_686, %c40_687, %c0_688] : memref<1x7x64x128xf32, #tpu.memory_space<vmem>>, vector<1x1x8x128xf32>
    %1365 = vector.shape_cast %1364 : vector<1x1x8x128xf32> to vector<8x128xf32>
    %1366 = arith.subf %1365, %1363 : vector<8x128xf32>
    %1367 = vector.broadcast %1351 : vector<8x1xf32> to vector<8x128xf32>
    %1368 = arith.subf %1366, %1367 : vector<8x128xf32>
    %cst_689 = arith.constant 0.159154937 : f32
    %1369 = vector.broadcast %cst_689 : f32 to vector<8x128xf32>
    %1370 = arith.mulf %1368, %1369 : vector<8x128xf32>
    %cst_690 = arith.constant 5.000000e-01 : f32
    %1371 = vector.broadcast %cst_690 : f32 to vector<8x128xf32>
    %1372 = arith.addf %1370, %1371 : vector<8x128xf32>
    %1373 = math.floor %1372 : vector<8x128xf32>
    %cst_691 = arith.constant 6.28318548 : f32
    %1374 = vector.broadcast %cst_691 : f32 to vector<8x128xf32>
    %1375 = arith.mulf %1373, %1374 : vector<8x128xf32>
    %1376 = arith.subf %1368, %1375 : vector<8x128xf32>
    %cst_692 = arith.constant -1.74845553E-7 : f32
    %1377 = vector.broadcast %cst_692 : f32 to vector<8x128xf32>
    %1378 = arith.mulf %1373, %1377 : vector<8x128xf32>
    %1379 = arith.subf %1376, %1378 : vector<8x128xf32>
    %cst_693 = arith.constant 5.000000e-01 : f32
    %1380 = vector.broadcast %cst_693 : f32 to vector<8x128xf32>
    %1381 = arith.mulf %1380, %1379 : vector<8x128xf32>
    %1382 = arith.mulf %1381, %1381 : vector<8x128xf32>
    %cst_694 = arith.constant -2.50521079E-8 : f32
    %1383 = vector.broadcast %cst_694 : f32 to vector<8x128xf32>
    %1384 = arith.mulf %1383, %1382 : vector<8x128xf32>
    %cst_695 = arith.constant 2.75573188E-6 : f32
    %1385 = vector.broadcast %cst_695 : f32 to vector<8x128xf32>
    %1386 = arith.addf %1384, %1385 : vector<8x128xf32>
    %1387 = arith.mulf %1386, %1382 : vector<8x128xf32>
    %cst_696 = arith.constant 1.98412701E-4 : f32
    %1388 = vector.broadcast %cst_696 : f32 to vector<8x128xf32>
    %1389 = arith.subf %1387, %1388 : vector<8x128xf32>
    %1390 = arith.mulf %1389, %1382 : vector<8x128xf32>
    %cst_697 = arith.constant 0.00833333377 : f32
    %1391 = vector.broadcast %cst_697 : f32 to vector<8x128xf32>
    %1392 = arith.addf %1390, %1391 : vector<8x128xf32>
    %1393 = arith.mulf %1392, %1382 : vector<8x128xf32>
    %cst_698 = arith.constant 0.166666672 : f32
    %1394 = vector.broadcast %cst_698 : f32 to vector<8x128xf32>
    %1395 = arith.subf %1393, %1394 : vector<8x128xf32>
    %1396 = arith.mulf %1395, %1382 : vector<8x128xf32>
    %cst_699 = arith.constant 1.000000e+00 : f32
    %1397 = vector.broadcast %cst_699 : f32 to vector<8x128xf32>
    %1398 = arith.addf %1396, %1397 : vector<8x128xf32>
    %1399 = arith.mulf %1398, %1381 : vector<8x128xf32>
    %1400 = arith.mulf %1399, %1399 : vector<8x128xf32>
    %cst_700 = arith.constant 2.000000e+00 : f32
    %1401 = vector.broadcast %cst_700 : f32 to vector<8x128xf32>
    %1402 = arith.mulf %1401, %1400 : vector<8x128xf32>
    %cst_701 = arith.constant 1.000000e+00 : f32
    %1403 = vector.broadcast %cst_701 : f32 to vector<8x128xf32>
    %1404 = arith.subf %1403, %1402 : vector<8x128xf32>
    %c0_702 = arith.constant 0 : index
    %c2_703 = arith.constant 2 : index
    %c40_704 = arith.constant 40 : index
    %c0_705 = arith.constant 0 : index
    %1405 = vector.load %arg3[%c0_702, %c2_703, %c40_704, %c0_705] : memref<1x7x64x128xf32, #tpu.memory_space<vmem>>, vector<1x1x8x128xf32>
    %1406 = vector.shape_cast %1405 : vector<1x1x8x128xf32> to vector<8x128xf32>
    %1407 = arith.subf %1406, %1363 : vector<8x128xf32>
    %1408 = vector.broadcast %1353 : vector<8x1xf32> to vector<8x128xf32>
    %1409 = arith.subf %1407, %1408 : vector<8x128xf32>
    %cst_706 = arith.constant 0.159154937 : f32
    %1410 = vector.broadcast %cst_706 : f32 to vector<8x128xf32>
    %1411 = arith.mulf %1409, %1410 : vector<8x128xf32>
    %cst_707 = arith.constant 5.000000e-01 : f32
    %1412 = vector.broadcast %cst_707 : f32 to vector<8x128xf32>
    %1413 = arith.addf %1411, %1412 : vector<8x128xf32>
    %1414 = math.floor %1413 : vector<8x128xf32>
    %cst_708 = arith.constant 6.28318548 : f32
    %1415 = vector.broadcast %cst_708 : f32 to vector<8x128xf32>
    %1416 = arith.mulf %1414, %1415 : vector<8x128xf32>
    %1417 = arith.subf %1409, %1416 : vector<8x128xf32>
    %cst_709 = arith.constant -1.74845553E-7 : f32
    %1418 = vector.broadcast %cst_709 : f32 to vector<8x128xf32>
    %1419 = arith.mulf %1414, %1418 : vector<8x128xf32>
    %1420 = arith.subf %1417, %1419 : vector<8x128xf32>
    %cst_710 = arith.constant 5.000000e-01 : f32
    %1421 = vector.broadcast %cst_710 : f32 to vector<8x128xf32>
    %1422 = arith.mulf %1421, %1420 : vector<8x128xf32>
    %1423 = arith.mulf %1422, %1422 : vector<8x128xf32>
    %cst_711 = arith.constant -2.50521079E-8 : f32
    %1424 = vector.broadcast %cst_711 : f32 to vector<8x128xf32>
    %1425 = arith.mulf %1424, %1423 : vector<8x128xf32>
    %cst_712 = arith.constant 2.75573188E-6 : f32
    %1426 = vector.broadcast %cst_712 : f32 to vector<8x128xf32>
    %1427 = arith.addf %1425, %1426 : vector<8x128xf32>
    %1428 = arith.mulf %1427, %1423 : vector<8x128xf32>
    %cst_713 = arith.constant 1.98412701E-4 : f32
    %1429 = vector.broadcast %cst_713 : f32 to vector<8x128xf32>
    %1430 = arith.subf %1428, %1429 : vector<8x128xf32>
    %1431 = arith.mulf %1430, %1423 : vector<8x128xf32>
    %cst_714 = arith.constant 0.00833333377 : f32
    %1432 = vector.broadcast %cst_714 : f32 to vector<8x128xf32>
    %1433 = arith.addf %1431, %1432 : vector<8x128xf32>
    %1434 = arith.mulf %1433, %1423 : vector<8x128xf32>
    %cst_715 = arith.constant 0.166666672 : f32
    %1435 = vector.broadcast %cst_715 : f32 to vector<8x128xf32>
    %1436 = arith.subf %1434, %1435 : vector<8x128xf32>
    %1437 = arith.mulf %1436, %1423 : vector<8x128xf32>
    %cst_716 = arith.constant 1.000000e+00 : f32
    %1438 = vector.broadcast %cst_716 : f32 to vector<8x128xf32>
    %1439 = arith.addf %1437, %1438 : vector<8x128xf32>
    %1440 = arith.mulf %1439, %1422 : vector<8x128xf32>
    %1441 = arith.mulf %1440, %1440 : vector<8x128xf32>
    %cst_717 = arith.constant 2.000000e+00 : f32
    %1442 = vector.broadcast %cst_717 : f32 to vector<8x128xf32>
    %1443 = arith.mulf %1442, %1441 : vector<8x128xf32>
    %cst_718 = arith.constant 1.000000e+00 : f32
    %1444 = vector.broadcast %cst_718 : f32 to vector<8x128xf32>
    %1445 = arith.subf %1444, %1443 : vector<8x128xf32>
    %1446 = arith.addf %1404, %1445 : vector<8x128xf32>
    %c0_719 = arith.constant 0 : index
    %c3_720 = arith.constant 3 : index
    %c40_721 = arith.constant 40 : index
    %c0_722 = arith.constant 0 : index
    %1447 = vector.load %arg3[%c0_719, %c3_720, %c40_721, %c0_722] : memref<1x7x64x128xf32, #tpu.memory_space<vmem>>, vector<1x1x8x128xf32>
    %1448 = vector.shape_cast %1447 : vector<1x1x8x128xf32> to vector<8x128xf32>
    %1449 = arith.subf %1448, %1363 : vector<8x128xf32>
    %1450 = vector.broadcast %1355 : vector<8x1xf32> to vector<8x128xf32>
    %1451 = arith.subf %1449, %1450 : vector<8x128xf32>
    %cst_723 = arith.constant 0.159154937 : f32
    %1452 = vector.broadcast %cst_723 : f32 to vector<8x128xf32>
    %1453 = arith.mulf %1451, %1452 : vector<8x128xf32>
    %cst_724 = arith.constant 5.000000e-01 : f32
    %1454 = vector.broadcast %cst_724 : f32 to vector<8x128xf32>
    %1455 = arith.addf %1453, %1454 : vector<8x128xf32>
    %1456 = math.floor %1455 : vector<8x128xf32>
    %cst_725 = arith.constant 6.28318548 : f32
    %1457 = vector.broadcast %cst_725 : f32 to vector<8x128xf32>
    %1458 = arith.mulf %1456, %1457 : vector<8x128xf32>
    %1459 = arith.subf %1451, %1458 : vector<8x128xf32>
    %cst_726 = arith.constant -1.74845553E-7 : f32
    %1460 = vector.broadcast %cst_726 : f32 to vector<8x128xf32>
    %1461 = arith.mulf %1456, %1460 : vector<8x128xf32>
    %1462 = arith.subf %1459, %1461 : vector<8x128xf32>
    %cst_727 = arith.constant 5.000000e-01 : f32
    %1463 = vector.broadcast %cst_727 : f32 to vector<8x128xf32>
    %1464 = arith.mulf %1463, %1462 : vector<8x128xf32>
    %1465 = arith.mulf %1464, %1464 : vector<8x128xf32>
    %cst_728 = arith.constant -2.50521079E-8 : f32
    %1466 = vector.broadcast %cst_728 : f32 to vector<8x128xf32>
    %1467 = arith.mulf %1466, %1465 : vector<8x128xf32>
    %cst_729 = arith.constant 2.75573188E-6 : f32
    %1468 = vector.broadcast %cst_729 : f32 to vector<8x128xf32>
    %1469 = arith.addf %1467, %1468 : vector<8x128xf32>
    %1470 = arith.mulf %1469, %1465 : vector<8x128xf32>
    %cst_730 = arith.constant 1.98412701E-4 : f32
    %1471 = vector.broadcast %cst_730 : f32 to vector<8x128xf32>
    %1472 = arith.subf %1470, %1471 : vector<8x128xf32>
    %1473 = arith.mulf %1472, %1465 : vector<8x128xf32>
    %cst_731 = arith.constant 0.00833333377 : f32
    %1474 = vector.broadcast %cst_731 : f32 to vector<8x128xf32>
    %1475 = arith.addf %1473, %1474 : vector<8x128xf32>
    %1476 = arith.mulf %1475, %1465 : vector<8x128xf32>
    %cst_732 = arith.constant 0.166666672 : f32
    %1477 = vector.broadcast %cst_732 : f32 to vector<8x128xf32>
    %1478 = arith.subf %1476, %1477 : vector<8x128xf32>
    %1479 = arith.mulf %1478, %1465 : vector<8x128xf32>
    %cst_733 = arith.constant 1.000000e+00 : f32
    %1480 = vector.broadcast %cst_733 : f32 to vector<8x128xf32>
    %1481 = arith.addf %1479, %1480 : vector<8x128xf32>
    %1482 = arith.mulf %1481, %1464 : vector<8x128xf32>
    %1483 = arith.mulf %1482, %1482 : vector<8x128xf32>
    %cst_734 = arith.constant 2.000000e+00 : f32
    %1484 = vector.broadcast %cst_734 : f32 to vector<8x128xf32>
    %1485 = arith.mulf %1484, %1483 : vector<8x128xf32>
    %cst_735 = arith.constant 1.000000e+00 : f32
    %1486 = vector.broadcast %cst_735 : f32 to vector<8x128xf32>
    %1487 = arith.subf %1486, %1485 : vector<8x128xf32>
    %1488 = arith.addf %1446, %1487 : vector<8x128xf32>
    %c0_736 = arith.constant 0 : index
    %c4_737 = arith.constant 4 : index
    %c40_738 = arith.constant 40 : index
    %c0_739 = arith.constant 0 : index
    %1489 = vector.load %arg3[%c0_736, %c4_737, %c40_738, %c0_739] : memref<1x7x64x128xf32, #tpu.memory_space<vmem>>, vector<1x1x8x128xf32>
    %1490 = vector.shape_cast %1489 : vector<1x1x8x128xf32> to vector<8x128xf32>
    %1491 = arith.subf %1490, %1363 : vector<8x128xf32>
    %1492 = vector.broadcast %1357 : vector<8x1xf32> to vector<8x128xf32>
    %1493 = arith.subf %1491, %1492 : vector<8x128xf32>
    %cst_740 = arith.constant 0.159154937 : f32
    %1494 = vector.broadcast %cst_740 : f32 to vector<8x128xf32>
    %1495 = arith.mulf %1493, %1494 : vector<8x128xf32>
    %cst_741 = arith.constant 5.000000e-01 : f32
    %1496 = vector.broadcast %cst_741 : f32 to vector<8x128xf32>
    %1497 = arith.addf %1495, %1496 : vector<8x128xf32>
    %1498 = math.floor %1497 : vector<8x128xf32>
    %cst_742 = arith.constant 6.28318548 : f32
    %1499 = vector.broadcast %cst_742 : f32 to vector<8x128xf32>
    %1500 = arith.mulf %1498, %1499 : vector<8x128xf32>
    %1501 = arith.subf %1493, %1500 : vector<8x128xf32>
    %cst_743 = arith.constant -1.74845553E-7 : f32
    %1502 = vector.broadcast %cst_743 : f32 to vector<8x128xf32>
    %1503 = arith.mulf %1498, %1502 : vector<8x128xf32>
    %1504 = arith.subf %1501, %1503 : vector<8x128xf32>
    %cst_744 = arith.constant 5.000000e-01 : f32
    %1505 = vector.broadcast %cst_744 : f32 to vector<8x128xf32>
    %1506 = arith.mulf %1505, %1504 : vector<8x128xf32>
    %1507 = arith.mulf %1506, %1506 : vector<8x128xf32>
    %cst_745 = arith.constant -2.50521079E-8 : f32
    %1508 = vector.broadcast %cst_745 : f32 to vector<8x128xf32>
    %1509 = arith.mulf %1508, %1507 : vector<8x128xf32>
    %cst_746 = arith.constant 2.75573188E-6 : f32
    %1510 = vector.broadcast %cst_746 : f32 to vector<8x128xf32>
    %1511 = arith.addf %1509, %1510 : vector<8x128xf32>
    %1512 = arith.mulf %1511, %1507 : vector<8x128xf32>
    %cst_747 = arith.constant 1.98412701E-4 : f32
    %1513 = vector.broadcast %cst_747 : f32 to vector<8x128xf32>
    %1514 = arith.subf %1512, %1513 : vector<8x128xf32>
    %1515 = arith.mulf %1514, %1507 : vector<8x128xf32>
    %cst_748 = arith.constant 0.00833333377 : f32
    %1516 = vector.broadcast %cst_748 : f32 to vector<8x128xf32>
    %1517 = arith.addf %1515, %1516 : vector<8x128xf32>
    %1518 = arith.mulf %1517, %1507 : vector<8x128xf32>
    %cst_749 = arith.constant 0.166666672 : f32
    %1519 = vector.broadcast %cst_749 : f32 to vector<8x128xf32>
    %1520 = arith.subf %1518, %1519 : vector<8x128xf32>
    %1521 = arith.mulf %1520, %1507 : vector<8x128xf32>
    %cst_750 = arith.constant 1.000000e+00 : f32
    %1522 = vector.broadcast %cst_750 : f32 to vector<8x128xf32>
    %1523 = arith.addf %1521, %1522 : vector<8x128xf32>
    %1524 = arith.mulf %1523, %1506 : vector<8x128xf32>
    %1525 = arith.mulf %1524, %1524 : vector<8x128xf32>
    %cst_751 = arith.constant 2.000000e+00 : f32
    %1526 = vector.broadcast %cst_751 : f32 to vector<8x128xf32>
    %1527 = arith.mulf %1526, %1525 : vector<8x128xf32>
    %cst_752 = arith.constant 1.000000e+00 : f32
    %1528 = vector.broadcast %cst_752 : f32 to vector<8x128xf32>
    %1529 = arith.subf %1528, %1527 : vector<8x128xf32>
    %1530 = arith.addf %1488, %1529 : vector<8x128xf32>
    %c0_753 = arith.constant 0 : index
    %c5_754 = arith.constant 5 : index
    %c40_755 = arith.constant 40 : index
    %c0_756 = arith.constant 0 : index
    %1531 = vector.load %arg3[%c0_753, %c5_754, %c40_755, %c0_756] : memref<1x7x64x128xf32, #tpu.memory_space<vmem>>, vector<1x1x8x128xf32>
    %1532 = vector.shape_cast %1531 : vector<1x1x8x128xf32> to vector<8x128xf32>
    %1533 = arith.subf %1532, %1363 : vector<8x128xf32>
    %1534 = vector.broadcast %1359 : vector<8x1xf32> to vector<8x128xf32>
    %1535 = arith.subf %1533, %1534 : vector<8x128xf32>
    %cst_757 = arith.constant 0.159154937 : f32
    %1536 = vector.broadcast %cst_757 : f32 to vector<8x128xf32>
    %1537 = arith.mulf %1535, %1536 : vector<8x128xf32>
    %cst_758 = arith.constant 5.000000e-01 : f32
    %1538 = vector.broadcast %cst_758 : f32 to vector<8x128xf32>
    %1539 = arith.addf %1537, %1538 : vector<8x128xf32>
    %1540 = math.floor %1539 : vector<8x128xf32>
    %cst_759 = arith.constant 6.28318548 : f32
    %1541 = vector.broadcast %cst_759 : f32 to vector<8x128xf32>
    %1542 = arith.mulf %1540, %1541 : vector<8x128xf32>
    %1543 = arith.subf %1535, %1542 : vector<8x128xf32>
    %cst_760 = arith.constant -1.74845553E-7 : f32
    %1544 = vector.broadcast %cst_760 : f32 to vector<8x128xf32>
    %1545 = arith.mulf %1540, %1544 : vector<8x128xf32>
    %1546 = arith.subf %1543, %1545 : vector<8x128xf32>
    %cst_761 = arith.constant 5.000000e-01 : f32
    %1547 = vector.broadcast %cst_761 : f32 to vector<8x128xf32>
    %1548 = arith.mulf %1547, %1546 : vector<8x128xf32>
    %1549 = arith.mulf %1548, %1548 : vector<8x128xf32>
    %cst_762 = arith.constant -2.50521079E-8 : f32
    %1550 = vector.broadcast %cst_762 : f32 to vector<8x128xf32>
    %1551 = arith.mulf %1550, %1549 : vector<8x128xf32>
    %cst_763 = arith.constant 2.75573188E-6 : f32
    %1552 = vector.broadcast %cst_763 : f32 to vector<8x128xf32>
    %1553 = arith.addf %1551, %1552 : vector<8x128xf32>
    %1554 = arith.mulf %1553, %1549 : vector<8x128xf32>
    %cst_764 = arith.constant 1.98412701E-4 : f32
    %1555 = vector.broadcast %cst_764 : f32 to vector<8x128xf32>
    %1556 = arith.subf %1554, %1555 : vector<8x128xf32>
    %1557 = arith.mulf %1556, %1549 : vector<8x128xf32>
    %cst_765 = arith.constant 0.00833333377 : f32
    %1558 = vector.broadcast %cst_765 : f32 to vector<8x128xf32>
    %1559 = arith.addf %1557, %1558 : vector<8x128xf32>
    %1560 = arith.mulf %1559, %1549 : vector<8x128xf32>
    %cst_766 = arith.constant 0.166666672 : f32
    %1561 = vector.broadcast %cst_766 : f32 to vector<8x128xf32>
    %1562 = arith.subf %1560, %1561 : vector<8x128xf32>
    %1563 = arith.mulf %1562, %1549 : vector<8x128xf32>
    %cst_767 = arith.constant 1.000000e+00 : f32
    %1564 = vector.broadcast %cst_767 : f32 to vector<8x128xf32>
    %1565 = arith.addf %1563, %1564 : vector<8x128xf32>
    %1566 = arith.mulf %1565, %1548 : vector<8x128xf32>
    %1567 = arith.mulf %1566, %1566 : vector<8x128xf32>
    %cst_768 = arith.constant 2.000000e+00 : f32
    %1568 = vector.broadcast %cst_768 : f32 to vector<8x128xf32>
    %1569 = arith.mulf %1568, %1567 : vector<8x128xf32>
    %cst_769 = arith.constant 1.000000e+00 : f32
    %1570 = vector.broadcast %cst_769 : f32 to vector<8x128xf32>
    %1571 = arith.subf %1570, %1569 : vector<8x128xf32>
    %1572 = arith.addf %1530, %1571 : vector<8x128xf32>
    %c0_770 = arith.constant 0 : index
    %c6_771 = arith.constant 6 : index
    %c40_772 = arith.constant 40 : index
    %c0_773 = arith.constant 0 : index
    %1573 = vector.load %arg3[%c0_770, %c6_771, %c40_772, %c0_773] : memref<1x7x64x128xf32, #tpu.memory_space<vmem>>, vector<1x1x8x128xf32>
    %1574 = vector.shape_cast %1573 : vector<1x1x8x128xf32> to vector<8x128xf32>
    %1575 = arith.subf %1574, %1363 : vector<8x128xf32>
    %1576 = vector.broadcast %1361 : vector<8x1xf32> to vector<8x128xf32>
    %1577 = arith.subf %1575, %1576 : vector<8x128xf32>
    %cst_774 = arith.constant 0.159154937 : f32
    %1578 = vector.broadcast %cst_774 : f32 to vector<8x128xf32>
    %1579 = arith.mulf %1577, %1578 : vector<8x128xf32>
    %cst_775 = arith.constant 5.000000e-01 : f32
    %1580 = vector.broadcast %cst_775 : f32 to vector<8x128xf32>
    %1581 = arith.addf %1579, %1580 : vector<8x128xf32>
    %1582 = math.floor %1581 : vector<8x128xf32>
    %cst_776 = arith.constant 6.28318548 : f32
    %1583 = vector.broadcast %cst_776 : f32 to vector<8x128xf32>
    %1584 = arith.mulf %1582, %1583 : vector<8x128xf32>
    %1585 = arith.subf %1577, %1584 : vector<8x128xf32>
    %cst_777 = arith.constant -1.74845553E-7 : f32
    %1586 = vector.broadcast %cst_777 : f32 to vector<8x128xf32>
    %1587 = arith.mulf %1582, %1586 : vector<8x128xf32>
    %1588 = arith.subf %1585, %1587 : vector<8x128xf32>
    %cst_778 = arith.constant 5.000000e-01 : f32
    %1589 = vector.broadcast %cst_778 : f32 to vector<8x128xf32>
    %1590 = arith.mulf %1589, %1588 : vector<8x128xf32>
    %1591 = arith.mulf %1590, %1590 : vector<8x128xf32>
    %cst_779 = arith.constant -2.50521079E-8 : f32
    %1592 = vector.broadcast %cst_779 : f32 to vector<8x128xf32>
    %1593 = arith.mulf %1592, %1591 : vector<8x128xf32>
    %cst_780 = arith.constant 2.75573188E-6 : f32
    %1594 = vector.broadcast %cst_780 : f32 to vector<8x128xf32>
    %1595 = arith.addf %1593, %1594 : vector<8x128xf32>
    %1596 = arith.mulf %1595, %1591 : vector<8x128xf32>
    %cst_781 = arith.constant 1.98412701E-4 : f32
    %1597 = vector.broadcast %cst_781 : f32 to vector<8x128xf32>
    %1598 = arith.subf %1596, %1597 : vector<8x128xf32>
    %1599 = arith.mulf %1598, %1591 : vector<8x128xf32>
    %cst_782 = arith.constant 0.00833333377 : f32
    %1600 = vector.broadcast %cst_782 : f32 to vector<8x128xf32>
    %1601 = arith.addf %1599, %1600 : vector<8x128xf32>
    %1602 = arith.mulf %1601, %1591 : vector<8x128xf32>
    %cst_783 = arith.constant 0.166666672 : f32
    %1603 = vector.broadcast %cst_783 : f32 to vector<8x128xf32>
    %1604 = arith.subf %1602, %1603 : vector<8x128xf32>
    %1605 = arith.mulf %1604, %1591 : vector<8x128xf32>
    %cst_784 = arith.constant 1.000000e+00 : f32
    %1606 = vector.broadcast %cst_784 : f32 to vector<8x128xf32>
    %1607 = arith.addf %1605, %1606 : vector<8x128xf32>
    %1608 = arith.mulf %1607, %1590 : vector<8x128xf32>
    %1609 = arith.mulf %1608, %1608 : vector<8x128xf32>
    %cst_785 = arith.constant 2.000000e+00 : f32
    %1610 = vector.broadcast %cst_785 : f32 to vector<8x128xf32>
    %1611 = arith.mulf %1610, %1609 : vector<8x128xf32>
    %cst_786 = arith.constant 1.000000e+00 : f32
    %1612 = vector.broadcast %cst_786 : f32 to vector<8x128xf32>
    %1613 = arith.subf %1612, %1611 : vector<8x128xf32>
    %1614 = arith.addf %1572, %1613 : vector<8x128xf32>
    %cst_787 = arith.constant 0.166666672 : f32
    %1615 = vector.broadcast %cst_787 : f32 to vector<8x128xf32>
    %1616 = arith.mulf %1614, %1615 : vector<8x128xf32>
    %c0_788 = arith.constant 0 : index
    %c40_789 = arith.constant 40 : index
    %c0_790 = arith.constant 0 : index
    %1617 = vector.load %arg4[%c0_788, %c40_789, %c0_790] : memref<1x64x128xf32, #tpu.memory_space<vmem>>, vector<1x8x128xf32>
    %1618 = vector.shape_cast %1617 : vector<1x8x128xf32> to vector<8x128xf32>
    %1619 = vector.shape_cast %1616 : vector<8x128xf32> to vector<1x8x128xf32>
    tpu.vector_store %arg4[%c0_788, %c40_789, %c0_790], %1619 {strides = array<i32>} : memref<1x64x128xf32, #tpu.memory_space<vmem>>, vector<1x8x128xf32>,
    %c0_791 = arith.constant 0 : index
    %c0_792 = arith.constant 0 : index
    %c48 = arith.constant 48 : index
    %c0_793 = arith.constant 0 : index
    %1620 = vector.load %arg2[%c0_791, %c0_792, %c48, %c0_793] : memref<1x6x64x1xf32, #tpu.memory_space<vmem>>, vector<1x1x8x1xf32>
    %1621 = vector.shape_cast %1620 : vector<1x1x8x1xf32> to vector<8x1xf32>
    %c0_794 = arith.constant 0 : index
    %c1_795 = arith.constant 1 : index
    %c48_796 = arith.constant 48 : index
    %c0_797 = arith.constant 0 : index
    %1622 = vector.load %arg2[%c0_794, %c1_795, %c48_796, %c0_797] : memref<1x6x64x1xf32, #tpu.memory_space<vmem>>, vector<1x1x8x1xf32>
    %1623 = vector.shape_cast %1622 : vector<1x1x8x1xf32> to vector<8x1xf32>
    %c0_798 = arith.constant 0 : index
    %c2_799 = arith.constant 2 : index
    %c48_800 = arith.constant 48 : index
    %c0_801 = arith.constant 0 : index
    %1624 = vector.load %arg2[%c0_798, %c2_799, %c48_800, %c0_801] : memref<1x6x64x1xf32, #tpu.memory_space<vmem>>, vector<1x1x8x1xf32>
    %1625 = vector.shape_cast %1624 : vector<1x1x8x1xf32> to vector<8x1xf32>
    %c0_802 = arith.constant 0 : index
    %c3_803 = arith.constant 3 : index
    %c48_804 = arith.constant 48 : index
    %c0_805 = arith.constant 0 : index
    %1626 = vector.load %arg2[%c0_802, %c3_803, %c48_804, %c0_805] : memref<1x6x64x1xf32, #tpu.memory_space<vmem>>, vector<1x1x8x1xf32>
    %1627 = vector.shape_cast %1626 : vector<1x1x8x1xf32> to vector<8x1xf32>
    %c0_806 = arith.constant 0 : index
    %c4_807 = arith.constant 4 : index
    %c48_808 = arith.constant 48 : index
    %c0_809 = arith.constant 0 : index
    %1628 = vector.load %arg2[%c0_806, %c4_807, %c48_808, %c0_809] : memref<1x6x64x1xf32, #tpu.memory_space<vmem>>, vector<1x1x8x1xf32>
    %1629 = vector.shape_cast %1628 : vector<1x1x8x1xf32> to vector<8x1xf32>
    %c0_810 = arith.constant 0 : index
    %c5_811 = arith.constant 5 : index
    %c48_812 = arith.constant 48 : index
    %c0_813 = arith.constant 0 : index
    %1630 = vector.load %arg2[%c0_810, %c5_811, %c48_812, %c0_813] : memref<1x6x64x1xf32, #tpu.memory_space<vmem>>, vector<1x1x8x1xf32>
    %1631 = vector.shape_cast %1630 : vector<1x1x8x1xf32> to vector<8x1xf32>
    %c0_814 = arith.constant 0 : index
    %c0_815 = arith.constant 0 : index
    %c48_816 = arith.constant 48 : index
    %c0_817 = arith.constant 0 : index
    %1632 = vector.load %arg3[%c0_814, %c0_815, %c48_816, %c0_817] : memref<1x7x64x128xf32, #tpu.memory_space<vmem>>, vector<1x1x8x128xf32>
    %1633 = vector.shape_cast %1632 : vector<1x1x8x128xf32> to vector<8x128xf32>
    %c0_818 = arith.constant 0 : index
    %c1_819 = arith.constant 1 : index
    %c48_820 = arith.constant 48 : index
    %c0_821 = arith.constant 0 : index
    %1634 = vector.load %arg3[%c0_818, %c1_819, %c48_820, %c0_821] : memref<1x7x64x128xf32, #tpu.memory_space<vmem>>, vector<1x1x8x128xf32>
    %1635 = vector.shape_cast %1634 : vector<1x1x8x128xf32> to vector<8x128xf32>
    %1636 = arith.subf %1635, %1633 : vector<8x128xf32>
    %1637 = vector.broadcast %1621 : vector<8x1xf32> to vector<8x128xf32>
    %1638 = arith.subf %1636, %1637 : vector<8x128xf32>
    %cst_822 = arith.constant 0.159154937 : f32
    %1639 = vector.broadcast %cst_822 : f32 to vector<8x128xf32>
    %1640 = arith.mulf %1638, %1639 : vector<8x128xf32>
    %cst_823 = arith.constant 5.000000e-01 : f32
    %1641 = vector.broadcast %cst_823 : f32 to vector<8x128xf32>
    %1642 = arith.addf %1640, %1641 : vector<8x128xf32>
    %1643 = math.floor %1642 : vector<8x128xf32>
    %cst_824 = arith.constant 6.28318548 : f32
    %1644 = vector.broadcast %cst_824 : f32 to vector<8x128xf32>
    %1645 = arith.mulf %1643, %1644 : vector<8x128xf32>
    %1646 = arith.subf %1638, %1645 : vector<8x128xf32>
    %cst_825 = arith.constant -1.74845553E-7 : f32
    %1647 = vector.broadcast %cst_825 : f32 to vector<8x128xf32>
    %1648 = arith.mulf %1643, %1647 : vector<8x128xf32>
    %1649 = arith.subf %1646, %1648 : vector<8x128xf32>
    %cst_826 = arith.constant 5.000000e-01 : f32
    %1650 = vector.broadcast %cst_826 : f32 to vector<8x128xf32>
    %1651 = arith.mulf %1650, %1649 : vector<8x128xf32>
    %1652 = arith.mulf %1651, %1651 : vector<8x128xf32>
    %cst_827 = arith.constant -2.50521079E-8 : f32
    %1653 = vector.broadcast %cst_827 : f32 to vector<8x128xf32>
    %1654 = arith.mulf %1653, %1652 : vector<8x128xf32>
    %cst_828 = arith.constant 2.75573188E-6 : f32
    %1655 = vector.broadcast %cst_828 : f32 to vector<8x128xf32>
    %1656 = arith.addf %1654, %1655 : vector<8x128xf32>
    %1657 = arith.mulf %1656, %1652 : vector<8x128xf32>
    %cst_829 = arith.constant 1.98412701E-4 : f32
    %1658 = vector.broadcast %cst_829 : f32 to vector<8x128xf32>
    %1659 = arith.subf %1657, %1658 : vector<8x128xf32>
    %1660 = arith.mulf %1659, %1652 : vector<8x128xf32>
    %cst_830 = arith.constant 0.00833333377 : f32
    %1661 = vector.broadcast %cst_830 : f32 to vector<8x128xf32>
    %1662 = arith.addf %1660, %1661 : vector<8x128xf32>
    %1663 = arith.mulf %1662, %1652 : vector<8x128xf32>
    %cst_831 = arith.constant 0.166666672 : f32
    %1664 = vector.broadcast %cst_831 : f32 to vector<8x128xf32>
    %1665 = arith.subf %1663, %1664 : vector<8x128xf32>
    %1666 = arith.mulf %1665, %1652 : vector<8x128xf32>
    %cst_832 = arith.constant 1.000000e+00 : f32
    %1667 = vector.broadcast %cst_832 : f32 to vector<8x128xf32>
    %1668 = arith.addf %1666, %1667 : vector<8x128xf32>
    %1669 = arith.mulf %1668, %1651 : vector<8x128xf32>
    %1670 = arith.mulf %1669, %1669 : vector<8x128xf32>
    %cst_833 = arith.constant 2.000000e+00 : f32
    %1671 = vector.broadcast %cst_833 : f32 to vector<8x128xf32>
    %1672 = arith.mulf %1671, %1670 : vector<8x128xf32>
    %cst_834 = arith.constant 1.000000e+00 : f32
    %1673 = vector.broadcast %cst_834 : f32 to vector<8x128xf32>
    %1674 = arith.subf %1673, %1672 : vector<8x128xf32>
    %c0_835 = arith.constant 0 : index
    %c2_836 = arith.constant 2 : index
    %c48_837 = arith.constant 48 : index
    %c0_838 = arith.constant 0 : index
    %1675 = vector.load %arg3[%c0_835, %c2_836, %c48_837, %c0_838] : memref<1x7x64x128xf32, #tpu.memory_space<vmem>>, vector<1x1x8x128xf32>
    %1676 = vector.shape_cast %1675 : vector<1x1x8x128xf32> to vector<8x128xf32>
    %1677 = arith.subf %1676, %1633 : vector<8x128xf32>
    %1678 = vector.broadcast %1623 : vector<8x1xf32> to vector<8x128xf32>
    %1679 = arith.subf %1677, %1678 : vector<8x128xf32>
    %cst_839 = arith.constant 0.159154937 : f32
    %1680 = vector.broadcast %cst_839 : f32 to vector<8x128xf32>
    %1681 = arith.mulf %1679, %1680 : vector<8x128xf32>
    %cst_840 = arith.constant 5.000000e-01 : f32
    %1682 = vector.broadcast %cst_840 : f32 to vector<8x128xf32>
    %1683 = arith.addf %1681, %1682 : vector<8x128xf32>
    %1684 = math.floor %1683 : vector<8x128xf32>
    %cst_841 = arith.constant 6.28318548 : f32
    %1685 = vector.broadcast %cst_841 : f32 to vector<8x128xf32>
    %1686 = arith.mulf %1684, %1685 : vector<8x128xf32>
    %1687 = arith.subf %1679, %1686 : vector<8x128xf32>
    %cst_842 = arith.constant -1.74845553E-7 : f32
    %1688 = vector.broadcast %cst_842 : f32 to vector<8x128xf32>
    %1689 = arith.mulf %1684, %1688 : vector<8x128xf32>
    %1690 = arith.subf %1687, %1689 : vector<8x128xf32>
    %cst_843 = arith.constant 5.000000e-01 : f32
    %1691 = vector.broadcast %cst_843 : f32 to vector<8x128xf32>
    %1692 = arith.mulf %1691, %1690 : vector<8x128xf32>
    %1693 = arith.mulf %1692, %1692 : vector<8x128xf32>
    %cst_844 = arith.constant -2.50521079E-8 : f32
    %1694 = vector.broadcast %cst_844 : f32 to vector<8x128xf32>
    %1695 = arith.mulf %1694, %1693 : vector<8x128xf32>
    %cst_845 = arith.constant 2.75573188E-6 : f32
    %1696 = vector.broadcast %cst_845 : f32 to vector<8x128xf32>
    %1697 = arith.addf %1695, %1696 : vector<8x128xf32>
    %1698 = arith.mulf %1697, %1693 : vector<8x128xf32>
    %cst_846 = arith.constant 1.98412701E-4 : f32
    %1699 = vector.broadcast %cst_846 : f32 to vector<8x128xf32>
    %1700 = arith.subf %1698, %1699 : vector<8x128xf32>
    %1701 = arith.mulf %1700, %1693 : vector<8x128xf32>
    %cst_847 = arith.constant 0.00833333377 : f32
    %1702 = vector.broadcast %cst_847 : f32 to vector<8x128xf32>
    %1703 = arith.addf %1701, %1702 : vector<8x128xf32>
    %1704 = arith.mulf %1703, %1693 : vector<8x128xf32>
    %cst_848 = arith.constant 0.166666672 : f32
    %1705 = vector.broadcast %cst_848 : f32 to vector<8x128xf32>
    %1706 = arith.subf %1704, %1705 : vector<8x128xf32>
    %1707 = arith.mulf %1706, %1693 : vector<8x128xf32>
    %cst_849 = arith.constant 1.000000e+00 : f32
    %1708 = vector.broadcast %cst_849 : f32 to vector<8x128xf32>
    %1709 = arith.addf %1707, %1708 : vector<8x128xf32>
    %1710 = arith.mulf %1709, %1692 : vector<8x128xf32>
    %1711 = arith.mulf %1710, %1710 : vector<8x128xf32>
    %cst_850 = arith.constant 2.000000e+00 : f32
    %1712 = vector.broadcast %cst_850 : f32 to vector<8x128xf32>
    %1713 = arith.mulf %1712, %1711 : vector<8x128xf32>
    %cst_851 = arith.constant 1.000000e+00 : f32
    %1714 = vector.broadcast %cst_851 : f32 to vector<8x128xf32>
    %1715 = arith.subf %1714, %1713 : vector<8x128xf32>
    %1716 = arith.addf %1674, %1715 : vector<8x128xf32>
    %c0_852 = arith.constant 0 : index
    %c3_853 = arith.constant 3 : index
    %c48_854 = arith.constant 48 : index
    %c0_855 = arith.constant 0 : index
    %1717 = vector.load %arg3[%c0_852, %c3_853, %c48_854, %c0_855] : memref<1x7x64x128xf32, #tpu.memory_space<vmem>>, vector<1x1x8x128xf32>
    %1718 = vector.shape_cast %1717 : vector<1x1x8x128xf32> to vector<8x128xf32>
    %1719 = arith.subf %1718, %1633 : vector<8x128xf32>
    %1720 = vector.broadcast %1625 : vector<8x1xf32> to vector<8x128xf32>
    %1721 = arith.subf %1719, %1720 : vector<8x128xf32>
    %cst_856 = arith.constant 0.159154937 : f32
    %1722 = vector.broadcast %cst_856 : f32 to vector<8x128xf32>
    %1723 = arith.mulf %1721, %1722 : vector<8x128xf32>
    %cst_857 = arith.constant 5.000000e-01 : f32
    %1724 = vector.broadcast %cst_857 : f32 to vector<8x128xf32>
    %1725 = arith.addf %1723, %1724 : vector<8x128xf32>
    %1726 = math.floor %1725 : vector<8x128xf32>
    %cst_858 = arith.constant 6.28318548 : f32
    %1727 = vector.broadcast %cst_858 : f32 to vector<8x128xf32>
    %1728 = arith.mulf %1726, %1727 : vector<8x128xf32>
    %1729 = arith.subf %1721, %1728 : vector<8x128xf32>
    %cst_859 = arith.constant -1.74845553E-7 : f32
    %1730 = vector.broadcast %cst_859 : f32 to vector<8x128xf32>
    %1731 = arith.mulf %1726, %1730 : vector<8x128xf32>
    %1732 = arith.subf %1729, %1731 : vector<8x128xf32>
    %cst_860 = arith.constant 5.000000e-01 : f32
    %1733 = vector.broadcast %cst_860 : f32 to vector<8x128xf32>
    %1734 = arith.mulf %1733, %1732 : vector<8x128xf32>
    %1735 = arith.mulf %1734, %1734 : vector<8x128xf32>
    %cst_861 = arith.constant -2.50521079E-8 : f32
    %1736 = vector.broadcast %cst_861 : f32 to vector<8x128xf32>
    %1737 = arith.mulf %1736, %1735 : vector<8x128xf32>
    %cst_862 = arith.constant 2.75573188E-6 : f32
    %1738 = vector.broadcast %cst_862 : f32 to vector<8x128xf32>
    %1739 = arith.addf %1737, %1738 : vector<8x128xf32>
    %1740 = arith.mulf %1739, %1735 : vector<8x128xf32>
    %cst_863 = arith.constant 1.98412701E-4 : f32
    %1741 = vector.broadcast %cst_863 : f32 to vector<8x128xf32>
    %1742 = arith.subf %1740, %1741 : vector<8x128xf32>
    %1743 = arith.mulf %1742, %1735 : vector<8x128xf32>
    %cst_864 = arith.constant 0.00833333377 : f32
    %1744 = vector.broadcast %cst_864 : f32 to vector<8x128xf32>
    %1745 = arith.addf %1743, %1744 : vector<8x128xf32>
    %1746 = arith.mulf %1745, %1735 : vector<8x128xf32>
    %cst_865 = arith.constant 0.166666672 : f32
    %1747 = vector.broadcast %cst_865 : f32 to vector<8x128xf32>
    %1748 = arith.subf %1746, %1747 : vector<8x128xf32>
    %1749 = arith.mulf %1748, %1735 : vector<8x128xf32>
    %cst_866 = arith.constant 1.000000e+00 : f32
    %1750 = vector.broadcast %cst_866 : f32 to vector<8x128xf32>
    %1751 = arith.addf %1749, %1750 : vector<8x128xf32>
    %1752 = arith.mulf %1751, %1734 : vector<8x128xf32>
    %1753 = arith.mulf %1752, %1752 : vector<8x128xf32>
    %cst_867 = arith.constant 2.000000e+00 : f32
    %1754 = vector.broadcast %cst_867 : f32 to vector<8x128xf32>
    %1755 = arith.mulf %1754, %1753 : vector<8x128xf32>
    %cst_868 = arith.constant 1.000000e+00 : f32
    %1756 = vector.broadcast %cst_868 : f32 to vector<8x128xf32>
    %1757 = arith.subf %1756, %1755 : vector<8x128xf32>
    %1758 = arith.addf %1716, %1757 : vector<8x128xf32>
    %c0_869 = arith.constant 0 : index
    %c4_870 = arith.constant 4 : index
    %c48_871 = arith.constant 48 : index
    %c0_872 = arith.constant 0 : index
    %1759 = vector.load %arg3[%c0_869, %c4_870, %c48_871, %c0_872] : memref<1x7x64x128xf32, #tpu.memory_space<vmem>>, vector<1x1x8x128xf32>
    %1760 = vector.shape_cast %1759 : vector<1x1x8x128xf32> to vector<8x128xf32>
    %1761 = arith.subf %1760, %1633 : vector<8x128xf32>
    %1762 = vector.broadcast %1627 : vector<8x1xf32> to vector<8x128xf32>
    %1763 = arith.subf %1761, %1762 : vector<8x128xf32>
    %cst_873 = arith.constant 0.159154937 : f32
    %1764 = vector.broadcast %cst_873 : f32 to vector<8x128xf32>
    %1765 = arith.mulf %1763, %1764 : vector<8x128xf32>
    %cst_874 = arith.constant 5.000000e-01 : f32
    %1766 = vector.broadcast %cst_874 : f32 to vector<8x128xf32>
    %1767 = arith.addf %1765, %1766 : vector<8x128xf32>
    %1768 = math.floor %1767 : vector<8x128xf32>
    %cst_875 = arith.constant 6.28318548 : f32
    %1769 = vector.broadcast %cst_875 : f32 to vector<8x128xf32>
    %1770 = arith.mulf %1768, %1769 : vector<8x128xf32>
    %1771 = arith.subf %1763, %1770 : vector<8x128xf32>
    %cst_876 = arith.constant -1.74845553E-7 : f32
    %1772 = vector.broadcast %cst_876 : f32 to vector<8x128xf32>
    %1773 = arith.mulf %1768, %1772 : vector<8x128xf32>
    %1774 = arith.subf %1771, %1773 : vector<8x128xf32>
    %cst_877 = arith.constant 5.000000e-01 : f32
    %1775 = vector.broadcast %cst_877 : f32 to vector<8x128xf32>
    %1776 = arith.mulf %1775, %1774 : vector<8x128xf32>
    %1777 = arith.mulf %1776, %1776 : vector<8x128xf32>
    %cst_878 = arith.constant -2.50521079E-8 : f32
    %1778 = vector.broadcast %cst_878 : f32 to vector<8x128xf32>
    %1779 = arith.mulf %1778, %1777 : vector<8x128xf32>
    %cst_879 = arith.constant 2.75573188E-6 : f32
    %1780 = vector.broadcast %cst_879 : f32 to vector<8x128xf32>
    %1781 = arith.addf %1779, %1780 : vector<8x128xf32>
    %1782 = arith.mulf %1781, %1777 : vector<8x128xf32>
    %cst_880 = arith.constant 1.98412701E-4 : f32
    %1783 = vector.broadcast %cst_880 : f32 to vector<8x128xf32>
    %1784 = arith.subf %1782, %1783 : vector<8x128xf32>
    %1785 = arith.mulf %1784, %1777 : vector<8x128xf32>
    %cst_881 = arith.constant 0.00833333377 : f32
    %1786 = vector.broadcast %cst_881 : f32 to vector<8x128xf32>
    %1787 = arith.addf %1785, %1786 : vector<8x128xf32>
    %1788 = arith.mulf %1787, %1777 : vector<8x128xf32>
    %cst_882 = arith.constant 0.166666672 : f32
    %1789 = vector.broadcast %cst_882 : f32 to vector<8x128xf32>
    %1790 = arith.subf %1788, %1789 : vector<8x128xf32>
    %1791 = arith.mulf %1790, %1777 : vector<8x128xf32>
    %cst_883 = arith.constant 1.000000e+00 : f32
    %1792 = vector.broadcast %cst_883 : f32 to vector<8x128xf32>
    %1793 = arith.addf %1791, %1792 : vector<8x128xf32>
    %1794 = arith.mulf %1793, %1776 : vector<8x128xf32>
    %1795 = arith.mulf %1794, %1794 : vector<8x128xf32>
    %cst_884 = arith.constant 2.000000e+00 : f32
    %1796 = vector.broadcast %cst_884 : f32 to vector<8x128xf32>
    %1797 = arith.mulf %1796, %1795 : vector<8x128xf32>
    %cst_885 = arith.constant 1.000000e+00 : f32
    %1798 = vector.broadcast %cst_885 : f32 to vector<8x128xf32>
    %1799 = arith.subf %1798, %1797 : vector<8x128xf32>
    %1800 = arith.addf %1758, %1799 : vector<8x128xf32>
    %c0_886 = arith.constant 0 : index
    %c5_887 = arith.constant 5 : index
    %c48_888 = arith.constant 48 : index
    %c0_889 = arith.constant 0 : index
    %1801 = vector.load %arg3[%c0_886, %c5_887, %c48_888, %c0_889] : memref<1x7x64x128xf32, #tpu.memory_space<vmem>>, vector<1x1x8x128xf32>
    %1802 = vector.shape_cast %1801 : vector<1x1x8x128xf32> to vector<8x128xf32>
    %1803 = arith.subf %1802, %1633 : vector<8x128xf32>
    %1804 = vector.broadcast %1629 : vector<8x1xf32> to vector<8x128xf32>
    %1805 = arith.subf %1803, %1804 : vector<8x128xf32>
    %cst_890 = arith.constant 0.159154937 : f32
    %1806 = vector.broadcast %cst_890 : f32 to vector<8x128xf32>
    %1807 = arith.mulf %1805, %1806 : vector<8x128xf32>
    %cst_891 = arith.constant 5.000000e-01 : f32
    %1808 = vector.broadcast %cst_891 : f32 to vector<8x128xf32>
    %1809 = arith.addf %1807, %1808 : vector<8x128xf32>
    %1810 = math.floor %1809 : vector<8x128xf32>
    %cst_892 = arith.constant 6.28318548 : f32
    %1811 = vector.broadcast %cst_892 : f32 to vector<8x128xf32>
    %1812 = arith.mulf %1810, %1811 : vector<8x128xf32>
    %1813 = arith.subf %1805, %1812 : vector<8x128xf32>
    %cst_893 = arith.constant -1.74845553E-7 : f32
    %1814 = vector.broadcast %cst_893 : f32 to vector<8x128xf32>
    %1815 = arith.mulf %1810, %1814 : vector<8x128xf32>
    %1816 = arith.subf %1813, %1815 : vector<8x128xf32>
    %cst_894 = arith.constant 5.000000e-01 : f32
    %1817 = vector.broadcast %cst_894 : f32 to vector<8x128xf32>
    %1818 = arith.mulf %1817, %1816 : vector<8x128xf32>
    %1819 = arith.mulf %1818, %1818 : vector<8x128xf32>
    %cst_895 = arith.constant -2.50521079E-8 : f32
    %1820 = vector.broadcast %cst_895 : f32 to vector<8x128xf32>
    %1821 = arith.mulf %1820, %1819 : vector<8x128xf32>
    %cst_896 = arith.constant 2.75573188E-6 : f32
    %1822 = vector.broadcast %cst_896 : f32 to vector<8x128xf32>
    %1823 = arith.addf %1821, %1822 : vector<8x128xf32>
    %1824 = arith.mulf %1823, %1819 : vector<8x128xf32>
    %cst_897 = arith.constant 1.98412701E-4 : f32
    %1825 = vector.broadcast %cst_897 : f32 to vector<8x128xf32>
    %1826 = arith.subf %1824, %1825 : vector<8x128xf32>
    %1827 = arith.mulf %1826, %1819 : vector<8x128xf32>
    %cst_898 = arith.constant 0.00833333377 : f32
    %1828 = vector.broadcast %cst_898 : f32 to vector<8x128xf32>
    %1829 = arith.addf %1827, %1828 : vector<8x128xf32>
    %1830 = arith.mulf %1829, %1819 : vector<8x128xf32>
    %cst_899 = arith.constant 0.166666672 : f32
    %1831 = vector.broadcast %cst_899 : f32 to vector<8x128xf32>
    %1832 = arith.subf %1830, %1831 : vector<8x128xf32>
    %1833 = arith.mulf %1832, %1819 : vector<8x128xf32>
    %cst_900 = arith.constant 1.000000e+00 : f32
    %1834 = vector.broadcast %cst_900 : f32 to vector<8x128xf32>
    %1835 = arith.addf %1833, %1834 : vector<8x128xf32>
    %1836 = arith.mulf %1835, %1818 : vector<8x128xf32>
    %1837 = arith.mulf %1836, %1836 : vector<8x128xf32>
    %cst_901 = arith.constant 2.000000e+00 : f32
    %1838 = vector.broadcast %cst_901 : f32 to vector<8x128xf32>
    %1839 = arith.mulf %1838, %1837 : vector<8x128xf32>
    %cst_902 = arith.constant 1.000000e+00 : f32
    %1840 = vector.broadcast %cst_902 : f32 to vector<8x128xf32>
    %1841 = arith.subf %1840, %1839 : vector<8x128xf32>
    %1842 = arith.addf %1800, %1841 : vector<8x128xf32>
    %c0_903 = arith.constant 0 : index
    %c6_904 = arith.constant 6 : index
    %c48_905 = arith.constant 48 : index
    %c0_906 = arith.constant 0 : index
    %1843 = vector.load %arg3[%c0_903, %c6_904, %c48_905, %c0_906] : memref<1x7x64x128xf32, #tpu.memory_space<vmem>>, vector<1x1x8x128xf32>
    %1844 = vector.shape_cast %1843 : vector<1x1x8x128xf32> to vector<8x128xf32>
    %1845 = arith.subf %1844, %1633 : vector<8x128xf32>
    %1846 = vector.broadcast %1631 : vector<8x1xf32> to vector<8x128xf32>
    %1847 = arith.subf %1845, %1846 : vector<8x128xf32>
    %cst_907 = arith.constant 0.159154937 : f32
    %1848 = vector.broadcast %cst_907 : f32 to vector<8x128xf32>
    %1849 = arith.mulf %1847, %1848 : vector<8x128xf32>
    %cst_908 = arith.constant 5.000000e-01 : f32
    %1850 = vector.broadcast %cst_908 : f32 to vector<8x128xf32>
    %1851 = arith.addf %1849, %1850 : vector<8x128xf32>
    %1852 = math.floor %1851 : vector<8x128xf32>
    %cst_909 = arith.constant 6.28318548 : f32
    %1853 = vector.broadcast %cst_909 : f32 to vector<8x128xf32>
    %1854 = arith.mulf %1852, %1853 : vector<8x128xf32>
    %1855 = arith.subf %1847, %1854 : vector<8x128xf32>
    %cst_910 = arith.constant -1.74845553E-7 : f32
    %1856 = vector.broadcast %cst_910 : f32 to vector<8x128xf32>
    %1857 = arith.mulf %1852, %1856 : vector<8x128xf32>
    %1858 = arith.subf %1855, %1857 : vector<8x128xf32>
    %cst_911 = arith.constant 5.000000e-01 : f32
    %1859 = vector.broadcast %cst_911 : f32 to vector<8x128xf32>
    %1860 = arith.mulf %1859, %1858 : vector<8x128xf32>
    %1861 = arith.mulf %1860, %1860 : vector<8x128xf32>
    %cst_912 = arith.constant -2.50521079E-8 : f32
    %1862 = vector.broadcast %cst_912 : f32 to vector<8x128xf32>
    %1863 = arith.mulf %1862, %1861 : vector<8x128xf32>
    %cst_913 = arith.constant 2.75573188E-6 : f32
    %1864 = vector.broadcast %cst_913 : f32 to vector<8x128xf32>
    %1865 = arith.addf %1863, %1864 : vector<8x128xf32>
    %1866 = arith.mulf %1865, %1861 : vector<8x128xf32>
    %cst_914 = arith.constant 1.98412701E-4 : f32
    %1867 = vector.broadcast %cst_914 : f32 to vector<8x128xf32>
    %1868 = arith.subf %1866, %1867 : vector<8x128xf32>
    %1869 = arith.mulf %1868, %1861 : vector<8x128xf32>
    %cst_915 = arith.constant 0.00833333377 : f32
    %1870 = vector.broadcast %cst_915 : f32 to vector<8x128xf32>
    %1871 = arith.addf %1869, %1870 : vector<8x128xf32>
    %1872 = arith.mulf %1871, %1861 : vector<8x128xf32>
    %cst_916 = arith.constant 0.166666672 : f32
    %1873 = vector.broadcast %cst_916 : f32 to vector<8x128xf32>
    %1874 = arith.subf %1872, %1873 : vector<8x128xf32>
    %1875 = arith.mulf %1874, %1861 : vector<8x128xf32>
    %cst_917 = arith.constant 1.000000e+00 : f32
    %1876 = vector.broadcast %cst_917 : f32 to vector<8x128xf32>
    %1877 = arith.addf %1875, %1876 : vector<8x128xf32>
    %1878 = arith.mulf %1877, %1860 : vector<8x128xf32>
    %1879 = arith.mulf %1878, %1878 : vector<8x128xf32>
    %cst_918 = arith.constant 2.000000e+00 : f32
    %1880 = vector.broadcast %cst_918 : f32 to vector<8x128xf32>
    %1881 = arith.mulf %1880, %1879 : vector<8x128xf32>
    %cst_919 = arith.constant 1.000000e+00 : f32
    %1882 = vector.broadcast %cst_919 : f32 to vector<8x128xf32>
    %1883 = arith.subf %1882, %1881 : vector<8x128xf32>
    %1884 = arith.addf %1842, %1883 : vector<8x128xf32>
    %cst_920 = arith.constant 0.166666672 : f32
    %1885 = vector.broadcast %cst_920 : f32 to vector<8x128xf32>
    %1886 = arith.mulf %1884, %1885 : vector<8x128xf32>
    %c0_921 = arith.constant 0 : index
    %c48_922 = arith.constant 48 : index
    %c0_923 = arith.constant 0 : index
    %1887 = vector.load %arg4[%c0_921, %c48_922, %c0_923] : memref<1x64x128xf32, #tpu.memory_space<vmem>>, vector<1x8x128xf32>
    %1888 = vector.shape_cast %1887 : vector<1x8x128xf32> to vector<8x128xf32>
    %1889 = vector.shape_cast %1886 : vector<8x128xf32> to vector<1x8x128xf32>
    tpu.vector_store %arg4[%c0_921, %c48_922, %c0_923], %1889 {strides = array<i32>} : memref<1x64x128xf32, #tpu.memory_space<vmem>>, vector<1x8x128xf32>,
    %c0_924 = arith.constant 0 : index
    %c0_925 = arith.constant 0 : index
    %c56 = arith.constant 56 : index
    %c0_926 = arith.constant 0 : index
    %1890 = vector.load %arg2[%c0_924, %c0_925, %c56, %c0_926] : memref<1x6x64x1xf32, #tpu.memory_space<vmem>>, vector<1x1x8x1xf32>
    %1891 = vector.shape_cast %1890 : vector<1x1x8x1xf32> to vector<8x1xf32>
    %c0_927 = arith.constant 0 : index
    %c1_928 = arith.constant 1 : index
    %c56_929 = arith.constant 56 : index
    %c0_930 = arith.constant 0 : index
    %1892 = vector.load %arg2[%c0_927, %c1_928, %c56_929, %c0_930] : memref<1x6x64x1xf32, #tpu.memory_space<vmem>>, vector<1x1x8x1xf32>
    %1893 = vector.shape_cast %1892 : vector<1x1x8x1xf32> to vector<8x1xf32>
    %c0_931 = arith.constant 0 : index
    %c2_932 = arith.constant 2 : index
    %c56_933 = arith.constant 56 : index
    %c0_934 = arith.constant 0 : index
    %1894 = vector.load %arg2[%c0_931, %c2_932, %c56_933, %c0_934] : memref<1x6x64x1xf32, #tpu.memory_space<vmem>>, vector<1x1x8x1xf32>
    %1895 = vector.shape_cast %1894 : vector<1x1x8x1xf32> to vector<8x1xf32>
    %c0_935 = arith.constant 0 : index
    %c3_936 = arith.constant 3 : index
    %c56_937 = arith.constant 56 : index
    %c0_938 = arith.constant 0 : index
    %1896 = vector.load %arg2[%c0_935, %c3_936, %c56_937, %c0_938] : memref<1x6x64x1xf32, #tpu.memory_space<vmem>>, vector<1x1x8x1xf32>
    %1897 = vector.shape_cast %1896 : vector<1x1x8x1xf32> to vector<8x1xf32>
    %c0_939 = arith.constant 0 : index
    %c4_940 = arith.constant 4 : index
    %c56_941 = arith.constant 56 : index
    %c0_942 = arith.constant 0 : index
    %1898 = vector.load %arg2[%c0_939, %c4_940, %c56_941, %c0_942] : memref<1x6x64x1xf32, #tpu.memory_space<vmem>>, vector<1x1x8x1xf32>
    %1899 = vector.shape_cast %1898 : vector<1x1x8x1xf32> to vector<8x1xf32>
    %c0_943 = arith.constant 0 : index
    %c5_944 = arith.constant 5 : index
    %c56_945 = arith.constant 56 : index
    %c0_946 = arith.constant 0 : index
    %1900 = vector.load %arg2[%c0_943, %c5_944, %c56_945, %c0_946] : memref<1x6x64x1xf32, #tpu.memory_space<vmem>>, vector<1x1x8x1xf32>
    %1901 = vector.shape_cast %1900 : vector<1x1x8x1xf32> to vector<8x1xf32>
    %c0_947 = arith.constant 0 : index
    %c0_948 = arith.constant 0 : index
    %c56_949 = arith.constant 56 : index
    %c0_950 = arith.constant 0 : index
    %1902 = vector.load %arg3[%c0_947, %c0_948, %c56_949, %c0_950] : memref<1x7x64x128xf32, #tpu.memory_space<vmem>>, vector<1x1x8x128xf32>
    %1903 = vector.shape_cast %1902 : vector<1x1x8x128xf32> to vector<8x128xf32>
    %c0_951 = arith.constant 0 : index
    %c1_952 = arith.constant 1 : index
    %c56_953 = arith.constant 56 : index
    %c0_954 = arith.constant 0 : index
    %1904 = vector.load %arg3[%c0_951, %c1_952, %c56_953, %c0_954] : memref<1x7x64x128xf32, #tpu.memory_space<vmem>>, vector<1x1x8x128xf32>
    %1905 = vector.shape_cast %1904 : vector<1x1x8x128xf32> to vector<8x128xf32>
    %1906 = arith.subf %1905, %1903 : vector<8x128xf32>
    %1907 = vector.broadcast %1891 : vector<8x1xf32> to vector<8x128xf32>
    %1908 = arith.subf %1906, %1907 : vector<8x128xf32>
    %cst_955 = arith.constant 0.159154937 : f32
    %1909 = vector.broadcast %cst_955 : f32 to vector<8x128xf32>
    %1910 = arith.mulf %1908, %1909 : vector<8x128xf32>
    %cst_956 = arith.constant 5.000000e-01 : f32
    %1911 = vector.broadcast %cst_956 : f32 to vector<8x128xf32>
    %1912 = arith.addf %1910, %1911 : vector<8x128xf32>
    %1913 = math.floor %1912 : vector<8x128xf32>
    %cst_957 = arith.constant 6.28318548 : f32
    %1914 = vector.broadcast %cst_957 : f32 to vector<8x128xf32>
    %1915 = arith.mulf %1913, %1914 : vector<8x128xf32>
    %1916 = arith.subf %1908, %1915 : vector<8x128xf32>
    %cst_958 = arith.constant -1.74845553E-7 : f32
    %1917 = vector.broadcast %cst_958 : f32 to vector<8x128xf32>
    %1918 = arith.mulf %1913, %1917 : vector<8x128xf32>
    %1919 = arith.subf %1916, %1918 : vector<8x128xf32>
    %cst_959 = arith.constant 5.000000e-01 : f32
    %1920 = vector.broadcast %cst_959 : f32 to vector<8x128xf32>
    %1921 = arith.mulf %1920, %1919 : vector<8x128xf32>
    %1922 = arith.mulf %1921, %1921 : vector<8x128xf32>
    %cst_960 = arith.constant -2.50521079E-8 : f32
    %1923 = vector.broadcast %cst_960 : f32 to vector<8x128xf32>
    %1924 = arith.mulf %1923, %1922 : vector<8x128xf32>
    %cst_961 = arith.constant 2.75573188E-6 : f32
    %1925 = vector.broadcast %cst_961 : f32 to vector<8x128xf32>
    %1926 = arith.addf %1924, %1925 : vector<8x128xf32>
    %1927 = arith.mulf %1926, %1922 : vector<8x128xf32>
    %cst_962 = arith.constant 1.98412701E-4 : f32
    %1928 = vector.broadcast %cst_962 : f32 to vector<8x128xf32>
    %1929 = arith.subf %1927, %1928 : vector<8x128xf32>
    %1930 = arith.mulf %1929, %1922 : vector<8x128xf32>
    %cst_963 = arith.constant 0.00833333377 : f32
    %1931 = vector.broadcast %cst_963 : f32 to vector<8x128xf32>
    %1932 = arith.addf %1930, %1931 : vector<8x128xf32>
    %1933 = arith.mulf %1932, %1922 : vector<8x128xf32>
    %cst_964 = arith.constant 0.166666672 : f32
    %1934 = vector.broadcast %cst_964 : f32 to vector<8x128xf32>
    %1935 = arith.subf %1933, %1934 : vector<8x128xf32>
    %1936 = arith.mulf %1935, %1922 : vector<8x128xf32>
    %cst_965 = arith.constant 1.000000e+00 : f32
    %1937 = vector.broadcast %cst_965 : f32 to vector<8x128xf32>
    %1938 = arith.addf %1936, %1937 : vector<8x128xf32>
    %1939 = arith.mulf %1938, %1921 : vector<8x128xf32>
    %1940 = arith.mulf %1939, %1939 : vector<8x128xf32>
    %cst_966 = arith.constant 2.000000e+00 : f32
    %1941 = vector.broadcast %cst_966 : f32 to vector<8x128xf32>
    %1942 = arith.mulf %1941, %1940 : vector<8x128xf32>
    %cst_967 = arith.constant 1.000000e+00 : f32
    %1943 = vector.broadcast %cst_967 : f32 to vector<8x128xf32>
    %1944 = arith.subf %1943, %1942 : vector<8x128xf32>
    %c0_968 = arith.constant 0 : index
    %c2_969 = arith.constant 2 : index
    %c56_970 = arith.constant 56 : index
    %c0_971 = arith.constant 0 : index
    %1945 = vector.load %arg3[%c0_968, %c2_969, %c56_970, %c0_971] : memref<1x7x64x128xf32, #tpu.memory_space<vmem>>, vector<1x1x8x128xf32>
    %1946 = vector.shape_cast %1945 : vector<1x1x8x128xf32> to vector<8x128xf32>
    %1947 = arith.subf %1946, %1903 : vector<8x128xf32>
    %1948 = vector.broadcast %1893 : vector<8x1xf32> to vector<8x128xf32>
    %1949 = arith.subf %1947, %1948 : vector<8x128xf32>
    %cst_972 = arith.constant 0.159154937 : f32
    %1950 = vector.broadcast %cst_972 : f32 to vector<8x128xf32>
    %1951 = arith.mulf %1949, %1950 : vector<8x128xf32>
    %cst_973 = arith.constant 5.000000e-01 : f32
    %1952 = vector.broadcast %cst_973 : f32 to vector<8x128xf32>
    %1953 = arith.addf %1951, %1952 : vector<8x128xf32>
    %1954 = math.floor %1953 : vector<8x128xf32>
    %cst_974 = arith.constant 6.28318548 : f32
    %1955 = vector.broadcast %cst_974 : f32 to vector<8x128xf32>
    %1956 = arith.mulf %1954, %1955 : vector<8x128xf32>
    %1957 = arith.subf %1949, %1956 : vector<8x128xf32>
    %cst_975 = arith.constant -1.74845553E-7 : f32
    %1958 = vector.broadcast %cst_975 : f32 to vector<8x128xf32>
    %1959 = arith.mulf %1954, %1958 : vector<8x128xf32>
    %1960 = arith.subf %1957, %1959 : vector<8x128xf32>
    %cst_976 = arith.constant 5.000000e-01 : f32
    %1961 = vector.broadcast %cst_976 : f32 to vector<8x128xf32>
    %1962 = arith.mulf %1961, %1960 : vector<8x128xf32>
    %1963 = arith.mulf %1962, %1962 : vector<8x128xf32>
    %cst_977 = arith.constant -2.50521079E-8 : f32
    %1964 = vector.broadcast %cst_977 : f32 to vector<8x128xf32>
    %1965 = arith.mulf %1964, %1963 : vector<8x128xf32>
    %cst_978 = arith.constant 2.75573188E-6 : f32
    %1966 = vector.broadcast %cst_978 : f32 to vector<8x128xf32>
    %1967 = arith.addf %1965, %1966 : vector<8x128xf32>
    %1968 = arith.mulf %1967, %1963 : vector<8x128xf32>
    %cst_979 = arith.constant 1.98412701E-4 : f32
    %1969 = vector.broadcast %cst_979 : f32 to vector<8x128xf32>
    %1970 = arith.subf %1968, %1969 : vector<8x128xf32>
    %1971 = arith.mulf %1970, %1963 : vector<8x128xf32>
    %cst_980 = arith.constant 0.00833333377 : f32
    %1972 = vector.broadcast %cst_980 : f32 to vector<8x128xf32>
    %1973 = arith.addf %1971, %1972 : vector<8x128xf32>
    %1974 = arith.mulf %1973, %1963 : vector<8x128xf32>
    %cst_981 = arith.constant 0.166666672 : f32
    %1975 = vector.broadcast %cst_981 : f32 to vector<8x128xf32>
    %1976 = arith.subf %1974, %1975 : vector<8x128xf32>
    %1977 = arith.mulf %1976, %1963 : vector<8x128xf32>
    %cst_982 = arith.constant 1.000000e+00 : f32
    %1978 = vector.broadcast %cst_982 : f32 to vector<8x128xf32>
    %1979 = arith.addf %1977, %1978 : vector<8x128xf32>
    %1980 = arith.mulf %1979, %1962 : vector<8x128xf32>
    %1981 = arith.mulf %1980, %1980 : vector<8x128xf32>
    %cst_983 = arith.constant 2.000000e+00 : f32
    %1982 = vector.broadcast %cst_983 : f32 to vector<8x128xf32>
    %1983 = arith.mulf %1982, %1981 : vector<8x128xf32>
    %cst_984 = arith.constant 1.000000e+00 : f32
    %1984 = vector.broadcast %cst_984 : f32 to vector<8x128xf32>
    %1985 = arith.subf %1984, %1983 : vector<8x128xf32>
    %1986 = arith.addf %1944, %1985 : vector<8x128xf32>
    %c0_985 = arith.constant 0 : index
    %c3_986 = arith.constant 3 : index
    %c56_987 = arith.constant 56 : index
    %c0_988 = arith.constant 0 : index
    %1987 = vector.load %arg3[%c0_985, %c3_986, %c56_987, %c0_988] : memref<1x7x64x128xf32, #tpu.memory_space<vmem>>, vector<1x1x8x128xf32>
    %1988 = vector.shape_cast %1987 : vector<1x1x8x128xf32> to vector<8x128xf32>
    %1989 = arith.subf %1988, %1903 : vector<8x128xf32>
    %1990 = vector.broadcast %1895 : vector<8x1xf32> to vector<8x128xf32>
    %1991 = arith.subf %1989, %1990 : vector<8x128xf32>
    %cst_989 = arith.constant 0.159154937 : f32
    %1992 = vector.broadcast %cst_989 : f32 to vector<8x128xf32>
    %1993 = arith.mulf %1991, %1992 : vector<8x128xf32>
    %cst_990 = arith.constant 5.000000e-01 : f32
    %1994 = vector.broadcast %cst_990 : f32 to vector<8x128xf32>
    %1995 = arith.addf %1993, %1994 : vector<8x128xf32>
    %1996 = math.floor %1995 : vector<8x128xf32>
    %cst_991 = arith.constant 6.28318548 : f32
    %1997 = vector.broadcast %cst_991 : f32 to vector<8x128xf32>
    %1998 = arith.mulf %1996, %1997 : vector<8x128xf32>
    %1999 = arith.subf %1991, %1998 : vector<8x128xf32>
    %cst_992 = arith.constant -1.74845553E-7 : f32
    %2000 = vector.broadcast %cst_992 : f32 to vector<8x128xf32>
    %2001 = arith.mulf %1996, %2000 : vector<8x128xf32>
    %2002 = arith.subf %1999, %2001 : vector<8x128xf32>
    %cst_993 = arith.constant 5.000000e-01 : f32
    %2003 = vector.broadcast %cst_993 : f32 to vector<8x128xf32>
    %2004 = arith.mulf %2003, %2002 : vector<8x128xf32>
    %2005 = arith.mulf %2004, %2004 : vector<8x128xf32>
    %cst_994 = arith.constant -2.50521079E-8 : f32
    %2006 = vector.broadcast %cst_994 : f32 to vector<8x128xf32>
    %2007 = arith.mulf %2006, %2005 : vector<8x128xf32>
    %cst_995 = arith.constant 2.75573188E-6 : f32
    %2008 = vector.broadcast %cst_995 : f32 to vector<8x128xf32>
    %2009 = arith.addf %2007, %2008 : vector<8x128xf32>
    %2010 = arith.mulf %2009, %2005 : vector<8x128xf32>
    %cst_996 = arith.constant 1.98412701E-4 : f32
    %2011 = vector.broadcast %cst_996 : f32 to vector<8x128xf32>
    %2012 = arith.subf %2010, %2011 : vector<8x128xf32>
    %2013 = arith.mulf %2012, %2005 : vector<8x128xf32>
    %cst_997 = arith.constant 0.00833333377 : f32
    %2014 = vector.broadcast %cst_997 : f32 to vector<8x128xf32>
    %2015 = arith.addf %2013, %2014 : vector<8x128xf32>
    %2016 = arith.mulf %2015, %2005 : vector<8x128xf32>
    %cst_998 = arith.constant 0.166666672 : f32
    %2017 = vector.broadcast %cst_998 : f32 to vector<8x128xf32>
    %2018 = arith.subf %2016, %2017 : vector<8x128xf32>
    %2019 = arith.mulf %2018, %2005 : vector<8x128xf32>
    %cst_999 = arith.constant 1.000000e+00 : f32
    %2020 = vector.broadcast %cst_999 : f32 to vector<8x128xf32>
    %2021 = arith.addf %2019, %2020 : vector<8x128xf32>
    %2022 = arith.mulf %2021, %2004 : vector<8x128xf32>
    %2023 = arith.mulf %2022, %2022 : vector<8x128xf32>
    %cst_1000 = arith.constant 2.000000e+00 : f32
    %2024 = vector.broadcast %cst_1000 : f32 to vector<8x128xf32>
    %2025 = arith.mulf %2024, %2023 : vector<8x128xf32>
    %cst_1001 = arith.constant 1.000000e+00 : f32
    %2026 = vector.broadcast %cst_1001 : f32 to vector<8x128xf32>
    %2027 = arith.subf %2026, %2025 : vector<8x128xf32>
    %2028 = arith.addf %1986, %2027 : vector<8x128xf32>
    %c0_1002 = arith.constant 0 : index
    %c4_1003 = arith.constant 4 : index
    %c56_1004 = arith.constant 56 : index
    %c0_1005 = arith.constant 0 : index
    %2029 = vector.load %arg3[%c0_1002, %c4_1003, %c56_1004, %c0_1005] : memref<1x7x64x128xf32, #tpu.memory_space<vmem>>, vector<1x1x8x128xf32>
    %2030 = vector.shape_cast %2029 : vector<1x1x8x128xf32> to vector<8x128xf32>
    %2031 = arith.subf %2030, %1903 : vector<8x128xf32>
    %2032 = vector.broadcast %1897 : vector<8x1xf32> to vector<8x128xf32>
    %2033 = arith.subf %2031, %2032 : vector<8x128xf32>
    %cst_1006 = arith.constant 0.159154937 : f32
    %2034 = vector.broadcast %cst_1006 : f32 to vector<8x128xf32>
    %2035 = arith.mulf %2033, %2034 : vector<8x128xf32>
    %cst_1007 = arith.constant 5.000000e-01 : f32
    %2036 = vector.broadcast %cst_1007 : f32 to vector<8x128xf32>
    %2037 = arith.addf %2035, %2036 : vector<8x128xf32>
    %2038 = math.floor %2037 : vector<8x128xf32>
    %cst_1008 = arith.constant 6.28318548 : f32
    %2039 = vector.broadcast %cst_1008 : f32 to vector<8x128xf32>
    %2040 = arith.mulf %2038, %2039 : vector<8x128xf32>
    %2041 = arith.subf %2033, %2040 : vector<8x128xf32>
    %cst_1009 = arith.constant -1.74845553E-7 : f32
    %2042 = vector.broadcast %cst_1009 : f32 to vector<8x128xf32>
    %2043 = arith.mulf %2038, %2042 : vector<8x128xf32>
    %2044 = arith.subf %2041, %2043 : vector<8x128xf32>
    %cst_1010 = arith.constant 5.000000e-01 : f32
    %2045 = vector.broadcast %cst_1010 : f32 to vector<8x128xf32>
    %2046 = arith.mulf %2045, %2044 : vector<8x128xf32>
    %2047 = arith.mulf %2046, %2046 : vector<8x128xf32>
    %cst_1011 = arith.constant -2.50521079E-8 : f32
    %2048 = vector.broadcast %cst_1011 : f32 to vector<8x128xf32>
    %2049 = arith.mulf %2048, %2047 : vector<8x128xf32>
    %cst_1012 = arith.constant 2.75573188E-6 : f32
    %2050 = vector.broadcast %cst_1012 : f32 to vector<8x128xf32>
    %2051 = arith.addf %2049, %2050 : vector<8x128xf32>
    %2052 = arith.mulf %2051, %2047 : vector<8x128xf32>
    %cst_1013 = arith.constant 1.98412701E-4 : f32
    %2053 = vector.broadcast %cst_1013 : f32 to vector<8x128xf32>
    %2054 = arith.subf %2052, %2053 : vector<8x128xf32>
    %2055 = arith.mulf %2054, %2047 : vector<8x128xf32>
    %cst_1014 = arith.constant 0.00833333377 : f32
    %2056 = vector.broadcast %cst_1014 : f32 to vector<8x128xf32>
    %2057 = arith.addf %2055, %2056 : vector<8x128xf32>
    %2058 = arith.mulf %2057, %2047 : vector<8x128xf32>
    %cst_1015 = arith.constant 0.166666672 : f32
    %2059 = vector.broadcast %cst_1015 : f32 to vector<8x128xf32>
    %2060 = arith.subf %2058, %2059 : vector<8x128xf32>
    %2061 = arith.mulf %2060, %2047 : vector<8x128xf32>
    %cst_1016 = arith.constant 1.000000e+00 : f32
    %2062 = vector.broadcast %cst_1016 : f32 to vector<8x128xf32>
    %2063 = arith.addf %2061, %2062 : vector<8x128xf32>
    %2064 = arith.mulf %2063, %2046 : vector<8x128xf32>
    %2065 = arith.mulf %2064, %2064 : vector<8x128xf32>
    %cst_1017 = arith.constant 2.000000e+00 : f32
    %2066 = vector.broadcast %cst_1017 : f32 to vector<8x128xf32>
    %2067 = arith.mulf %2066, %2065 : vector<8x128xf32>
    %cst_1018 = arith.constant 1.000000e+00 : f32
    %2068 = vector.broadcast %cst_1018 : f32 to vector<8x128xf32>
    %2069 = arith.subf %2068, %2067 : vector<8x128xf32>
    %2070 = arith.addf %2028, %2069 : vector<8x128xf32>
    %c0_1019 = arith.constant 0 : index
    %c5_1020 = arith.constant 5 : index
    %c56_1021 = arith.constant 56 : index
    %c0_1022 = arith.constant 0 : index
    %2071 = vector.load %arg3[%c0_1019, %c5_1020, %c56_1021, %c0_1022] : memref<1x7x64x128xf32, #tpu.memory_space<vmem>>, vector<1x1x8x128xf32>
    %2072 = vector.shape_cast %2071 : vector<1x1x8x128xf32> to vector<8x128xf32>
    %2073 = arith.subf %2072, %1903 : vector<8x128xf32>
    %2074 = vector.broadcast %1899 : vector<8x1xf32> to vector<8x128xf32>
    %2075 = arith.subf %2073, %2074 : vector<8x128xf32>
    %cst_1023 = arith.constant 0.159154937 : f32
    %2076 = vector.broadcast %cst_1023 : f32 to vector<8x128xf32>
    %2077 = arith.mulf %2075, %2076 : vector<8x128xf32>
    %cst_1024 = arith.constant 5.000000e-01 : f32
    %2078 = vector.broadcast %cst_1024 : f32 to vector<8x128xf32>
    %2079 = arith.addf %2077, %2078 : vector<8x128xf32>
    %2080 = math.floor %2079 : vector<8x128xf32>
    %cst_1025 = arith.constant 6.28318548 : f32
    %2081 = vector.broadcast %cst_1025 : f32 to vector<8x128xf32>
    %2082 = arith.mulf %2080, %2081 : vector<8x128xf32>
    %2083 = arith.subf %2075, %2082 : vector<8x128xf32>
    %cst_1026 = arith.constant -1.74845553E-7 : f32
    %2084 = vector.broadcast %cst_1026 : f32 to vector<8x128xf32>
    %2085 = arith.mulf %2080, %2084 : vector<8x128xf32>
    %2086 = arith.subf %2083, %2085 : vector<8x128xf32>
    %cst_1027 = arith.constant 5.000000e-01 : f32
    %2087 = vector.broadcast %cst_1027 : f32 to vector<8x128xf32>
    %2088 = arith.mulf %2087, %2086 : vector<8x128xf32>
    %2089 = arith.mulf %2088, %2088 : vector<8x128xf32>
    %cst_1028 = arith.constant -2.50521079E-8 : f32
    %2090 = vector.broadcast %cst_1028 : f32 to vector<8x128xf32>
    %2091 = arith.mulf %2090, %2089 : vector<8x128xf32>
    %cst_1029 = arith.constant 2.75573188E-6 : f32
    %2092 = vector.broadcast %cst_1029 : f32 to vector<8x128xf32>
    %2093 = arith.addf %2091, %2092 : vector<8x128xf32>
    %2094 = arith.mulf %2093, %2089 : vector<8x128xf32>
    %cst_1030 = arith.constant 1.98412701E-4 : f32
    %2095 = vector.broadcast %cst_1030 : f32 to vector<8x128xf32>
    %2096 = arith.subf %2094, %2095 : vector<8x128xf32>
    %2097 = arith.mulf %2096, %2089 : vector<8x128xf32>
    %cst_1031 = arith.constant 0.00833333377 : f32
    %2098 = vector.broadcast %cst_1031 : f32 to vector<8x128xf32>
    %2099 = arith.addf %2097, %2098 : vector<8x128xf32>
    %2100 = arith.mulf %2099, %2089 : vector<8x128xf32>
    %cst_1032 = arith.constant 0.166666672 : f32
    %2101 = vector.broadcast %cst_1032 : f32 to vector<8x128xf32>
    %2102 = arith.subf %2100, %2101 : vector<8x128xf32>
    %2103 = arith.mulf %2102, %2089 : vector<8x128xf32>
    %cst_1033 = arith.constant 1.000000e+00 : f32
    %2104 = vector.broadcast %cst_1033 : f32 to vector<8x128xf32>
    %2105 = arith.addf %2103, %2104 : vector<8x128xf32>
    %2106 = arith.mulf %2105, %2088 : vector<8x128xf32>
    %2107 = arith.mulf %2106, %2106 : vector<8x128xf32>
    %cst_1034 = arith.constant 2.000000e+00 : f32
    %2108 = vector.broadcast %cst_1034 : f32 to vector<8x128xf32>
    %2109 = arith.mulf %2108, %2107 : vector<8x128xf32>
    %cst_1035 = arith.constant 1.000000e+00 : f32
    %2110 = vector.broadcast %cst_1035 : f32 to vector<8x128xf32>
    %2111 = arith.subf %2110, %2109 : vector<8x128xf32>
    %2112 = arith.addf %2070, %2111 : vector<8x128xf32>
    %c0_1036 = arith.constant 0 : index
    %c6_1037 = arith.constant 6 : index
    %c56_1038 = arith.constant 56 : index
    %c0_1039 = arith.constant 0 : index
    %2113 = vector.load %arg3[%c0_1036, %c6_1037, %c56_1038, %c0_1039] : memref<1x7x64x128xf32, #tpu.memory_space<vmem>>, vector<1x1x8x128xf32>
    %2114 = vector.shape_cast %2113 : vector<1x1x8x128xf32> to vector<8x128xf32>
    %2115 = arith.subf %2114, %1903 : vector<8x128xf32>
    %2116 = vector.broadcast %1901 : vector<8x1xf32> to vector<8x128xf32>
    %2117 = arith.subf %2115, %2116 : vector<8x128xf32>
    %cst_1040 = arith.constant 0.159154937 : f32
    %2118 = vector.broadcast %cst_1040 : f32 to vector<8x128xf32>
    %2119 = arith.mulf %2117, %2118 : vector<8x128xf32>
    %cst_1041 = arith.constant 5.000000e-01 : f32
    %2120 = vector.broadcast %cst_1041 : f32 to vector<8x128xf32>
    %2121 = arith.addf %2119, %2120 : vector<8x128xf32>
    %2122 = math.floor %2121 : vector<8x128xf32>
    %cst_1042 = arith.constant 6.28318548 : f32
    %2123 = vector.broadcast %cst_1042 : f32 to vector<8x128xf32>
    %2124 = arith.mulf %2122, %2123 : vector<8x128xf32>
    %2125 = arith.subf %2117, %2124 : vector<8x128xf32>
    %cst_1043 = arith.constant -1.74845553E-7 : f32
    %2126 = vector.broadcast %cst_1043 : f32 to vector<8x128xf32>
    %2127 = arith.mulf %2122, %2126 : vector<8x128xf32>
    %2128 = arith.subf %2125, %2127 : vector<8x128xf32>
    %cst_1044 = arith.constant 5.000000e-01 : f32
    %2129 = vector.broadcast %cst_1044 : f32 to vector<8x128xf32>
    %2130 = arith.mulf %2129, %2128 : vector<8x128xf32>
    %2131 = arith.mulf %2130, %2130 : vector<8x128xf32>
    %cst_1045 = arith.constant -2.50521079E-8 : f32
    %2132 = vector.broadcast %cst_1045 : f32 to vector<8x128xf32>
    %2133 = arith.mulf %2132, %2131 : vector<8x128xf32>
    %cst_1046 = arith.constant 2.75573188E-6 : f32
    %2134 = vector.broadcast %cst_1046 : f32 to vector<8x128xf32>
    %2135 = arith.addf %2133, %2134 : vector<8x128xf32>
    %2136 = arith.mulf %2135, %2131 : vector<8x128xf32>
    %cst_1047 = arith.constant 1.98412701E-4 : f32
    %2137 = vector.broadcast %cst_1047 : f32 to vector<8x128xf32>
    %2138 = arith.subf %2136, %2137 : vector<8x128xf32>
    %2139 = arith.mulf %2138, %2131 : vector<8x128xf32>
    %cst_1048 = arith.constant 0.00833333377 : f32
    %2140 = vector.broadcast %cst_1048 : f32 to vector<8x128xf32>
    %2141 = arith.addf %2139, %2140 : vector<8x128xf32>
    %2142 = arith.mulf %2141, %2131 : vector<8x128xf32>
    %cst_1049 = arith.constant 0.166666672 : f32
    %2143 = vector.broadcast %cst_1049 : f32 to vector<8x128xf32>
    %2144 = arith.subf %2142, %2143 : vector<8x128xf32>
    %2145 = arith.mulf %2144, %2131 : vector<8x128xf32>
    %cst_1050 = arith.constant 1.000000e+00 : f32
    %2146 = vector.broadcast %cst_1050 : f32 to vector<8x128xf32>
    %2147 = arith.addf %2145, %2146 : vector<8x128xf32>
    %2148 = arith.mulf %2147, %2130 : vector<8x128xf32>
    %2149 = arith.mulf %2148, %2148 : vector<8x128xf32>
    %cst_1051 = arith.constant 2.000000e+00 : f32
    %2150 = vector.broadcast %cst_1051 : f32 to vector<8x128xf32>
    %2151 = arith.mulf %2150, %2149 : vector<8x128xf32>
    %cst_1052 = arith.constant 1.000000e+00 : f32
    %2152 = vector.broadcast %cst_1052 : f32 to vector<8x128xf32>
    %2153 = arith.subf %2152, %2151 : vector<8x128xf32>
    %2154 = arith.addf %2112, %2153 : vector<8x128xf32>
    %cst_1053 = arith.constant 0.166666672 : f32
    %2155 = vector.broadcast %cst_1053 : f32 to vector<8x128xf32>
    %2156 = arith.mulf %2154, %2155 : vector<8x128xf32>
    %c0_1054 = arith.constant 0 : index
    %c56_1055 = arith.constant 56 : index
    %c0_1056 = arith.constant 0 : index
    %2157 = vector.load %arg4[%c0_1054, %c56_1055, %c0_1056] : memref<1x64x128xf32, #tpu.memory_space<vmem>>, vector<1x8x128xf32>
    %2158 = vector.shape_cast %2157 : vector<1x8x128xf32> to vector<8x128xf32>
    %2159 = vector.shape_cast %2156 : vector<8x128xf32> to vector<1x8x128xf32>
    tpu.vector_store %arg4[%c0_1054, %c56_1055, %c0_1056], %2159 {strides = array<i32>} : memref<1x64x128xf32, #tpu.memory_space<vmem>>, vector<1x8x128xf32>,
    return
  }
  func.func @transform_0(%arg0: i32, %arg1: i32) -> (i32, i32, i32, i32) {
    %c0_i32 = arith.constant 0 : i32
    %c0_i32_0 = arith.constant 0 : i32
    %c0_i32_1 = arith.constant 0 : i32
    %c0_i32_2 = arith.constant 0 : i32
    return %arg1, %c0_i32, %c0_i32_0, %c0_i32_1 : i32, i32, i32, i32
  }
  func.func @transform_1(%arg0: i32, %arg1: i32) -> (i32, i32, i32, i32) {
    %c0_i32 = arith.constant 0 : i32
    %c0_i32_0 = arith.constant 0 : i32
    %c0_i32_1 = arith.constant 0 : i32
    return %arg1, %c0_i32, %c0_i32_0, %arg0 : i32, i32, i32, i32
  }
  func.func @transform_2(%arg0: i32, %arg1: i32) -> (i32, i32, i32) {
    %c0_i32 = arith.constant 0 : i32
    %c0_i32_0 = arith.constant 0 : i32
    return %arg1, %c0_i32, %arg0 : i32, i32, i32
  }
}

</mosaic_0001>

<bundles_post_ra>
// kernel: tpu_custom_call.1
= control target key start
LH: loop header
LB: loop body
LE: loop exit
PB: predicated region body
PF: predicated region fallthrough
CT: control target
= control target key end

     0   :  { %s2168_s9 = smov 0   ;;  %s2170_s10 = smov 0   ;;  %s3097_s0 = inlined_call_operand.vmem [shape: f32[2,6,64,1], index: 0, kind: input, shape index: {}]   ;;  %s3098_s1 = inlined_call_operand.vmem [shape: f32[2,7,64,16], index: 1, kind: input, shape index: {}]   ;;  %s3099_s2 = inlined_call_operand.vmem [shape: f32[2,64,16], index: 2, kind: output, shape index: {}]  }
   0x1   :  { %s2172_s11 = smov 0  }
   0x2 LB: > { %s21_s12 = sadd.s32 1, %s2146_s10  ;;  %p1905_p0 = scmp.ge.s32.totalorder %s2150_s11, 1  ;;  %s2150_s11 = sphi %s2172_s11, %s12_s11   ;;  %s2146_s10 = sphi %s2170_s10, %s3101_s10   ;;  %s2142_s9 = sphi %s2168_s9, %s3100_s9  }
   0x3   : > { %p22_p1 = scmp.ge.s32.totalorder %s21_s12, 2  ;;  %p141_p2 = scmp.lt.s32.totalorder %s2150_s11, 3 }
   0x5   : > { %s3103_s12 = smov (%p22_p1, %s21_s12), 0  ;;  %p142_p3 = pnand %p1905_p0, %p141_p2 }
   0x6   : > { %p174_p4 = scmp.lt.s32.totalorder (!%p142_p3), %s2142_s9, 1 }
   0x7   : > { %145 = sbr.rel (%p142_p3) target bundleno = 451 (0x1c3), region = 28 }
   0xc   : > { %v2152_v0 = vmov 0   ;;  %s3105_s9 = smov (!%p174_p4, %s2142_s9), 1 }
   0xd   : > { %2126 = vset.pattern.permute.xlu2 %v2152_v0  ;;  %2125 = vset.pattern.permute.xlu1 %v2152_v0  ;;  %s2097_s13 = smul.u32 384, %s3105_s9  ;;  %s2096_s21 = sshll.u32 %s3105_s9, 6 }
   0xe   : > { %2124 = vset.pattern.permute.xlu0 %v2152_v0  ;;  %s2098_s17 = smul.u32 448, %s3105_s9  ;;  %s2464_s24 = scalar_lea.vmem %s3099_s2, %s2096_s21 }
   0xf   : > { %s2192_s16 = scalar_lea.vmem %s3097_s0, %s2097_s13 }
  0x10   : > { %v1913_v1 = vld [vmem:[%s2192_s16 + $0x100] sm:$0xff]  ;;  %v1934_v7 = vld [vmem:[%s2192_s16 + $0x88] sm:$0xff]  ;;  %v1957_v13 = vld [vmem:[%s2192_s16 + $0x90] sm:$0xff]  ;;  %s2231_s20 = scalar_lea.vmem %s3098_s1, %s2098_s17 }
  0x11   : > { %v1911_v2 = vld [vmem:[%s2192_s16 + $0x80] sm:$0xff]  ;;  %343 = vperm.xlu2 %2126, %v1913_v1   ;;  %v1933_v8 = vld [vmem:[%s2192_s16 + $0x48] sm:$0xff]  ;;  %v1956_v14 = vld [vmem:[%s2192_s16 + $0x50] sm:$0xff] }
  0x12   : > { %v195_v3 = vld [vmem:[%s2192_s16] sm:$0xff]  ;;  %277 = vperm.xlu1 %2125, %v1911_v2   ;;  %v406_v9 = vld [vmem:[%s2192_s16 + $0x8] sm:$0xff]  ;;  %v606_v15 = vld [vmem:[%s2192_s16 + $0x10] sm:$0xff] }
  0x13   : > { %212 = vperm.xlu0 %2124, %v195_v3   ;;  %v1914_v4 = vld [vmem:[%s2192_s16 + $0x140] sm:$0xff]  ;;  %v1937_v10 = vld [vmem:[%s2192_s16 + $0x148] sm:$0xff]  ;;  %v1960_v16 = vld [vmem:[%s2192_s16 + $0x150] sm:$0xff] }
  0x14   : > { %v1912_v5 = vld [vmem:[%s2192_s16 + $0xc0] sm:$0xff]  ;;  %v1936_v11 = vld [vmem:[%s2192_s16 + $0x108] sm:$0xff]  ;;  %v1959_v17 = vld [vmem:[%s2192_s16 + $0x110] sm:$0xff] }
  0x15   : > { %v1910_v6 = vld [vmem:[%s2192_s16 + $0x40] sm:$0xff]  ;;  %v1935_v12 = vld [vmem:[%s2192_s16 + $0xc8] sm:$0xff]  ;;  %v1958_v18 = vld [vmem:[%s2192_s16 + $0xd0] sm:$0xff] }
  0x16   : > { %v1980_v19 = vld [vmem:[%s2192_s16 + $0x98] sm:$0xff]  ;;  %v2003_v25 = vld [vmem:[%s2192_s16 + $0xa0] sm:$0xff]  ;;  %v1406_v31 = vld [vmem:[%s2192_s16 + $0x30] sm:$0xff] }
  0x17   : > { %v1979_v20 = vld [vmem:[%s2192_s16 + $0x58] sm:$0xff]  ;;  %v2002_v26 = vld [vmem:[%s2192_s16 + $0x60] sm:$0xff]  ;;  %v2025_v32 = vld [vmem:[%s2192_s16 + $0x68] sm:$0xff] }
  0x18   : > { %v806_v21 = vld [vmem:[%s2192_s16 + $0x18] sm:$0xff]  ;;  %v1006_v27 = vld [vmem:[%s2192_s16 + $0x20] sm:$0xff]  ;;  %v1206_v33 = vld [vmem:[%s2192_s16 + $0x28] sm:$0xff] }
  0x19   : > { %376 = vperm.xlu2 %2126, %v1914_v4   ;;  %v1983_v22 = vld [vmem:[%s2192_s16 + $0x158] sm:$0xff]  ;;  %v2006_v28 = vld [vmem:[%s2192_s16 + $0x160] sm:$0xff]  ;;  %v2048_v38 = vld [vmem:[%s2192_s16 + $0x70] sm:$0xff] }
  0x1a   : > { %310 = vperm.xlu1 %2125, %v1912_v5   ;;  %v1982_v23 = vld [vmem:[%s2192_s16 + $0x118] sm:$0xff]  ;;  %v2005_v29 = vld [vmem:[%s2192_s16 + $0x120] sm:$0xff]  ;;  %v2049_v45 = vld [vmem:[%s2192_s16 + $0xb0] sm:$0xff] }
  0x1b   : > { %244 = vperm.xlu0 %2124, %v1910_v6   ;;  %v1981_v24 = vld [vmem:[%s2192_s16 + $0xd8] sm:$0xff]  ;;  %v2004_v30 = vld [vmem:[%s2192_s16 + $0xe0] sm:$0xff]  ;;  %v2026_v46 = vld [vmem:[%s2192_s16 + $0xa8] sm:$0xff] }
  0x1c   : > { %v2234_v34 = vld [vmem:[%s2231_s20] sm:$0xff]  ;;  %v2071_v36 = vld [vmem:[%s2192_s16 + $0x78] sm:$0xff]  ;;  %v2247_v54 = vld [vmem:[%s2231_s20 + $0x8] sm:$0xff] }
  0x1d   : > { %v1927_v35 = vld [vmem:[%s2231_s20 + $0x140] sm:$0xff]  ;;  %v1606_v37 = vld [vmem:[%s2192_s16 + $0x38] sm:$0xff]  ;;  %v1944_v55 = vld [vmem:[%s2231_s20 + $0xc8] sm:$0xff] }
  0x1e   : > { %v340_v39 = vsub.f32 %v1927_v35, %v2234_v34  ;;  %v1930_v42 = vld [vmem:[%s2231_s20 + $0x180] sm:$0xff]  ;;  %v2072_v44 = vld [vmem:[%s2192_s16 + $0xb8] sm:$0xff]  ;;  %v2050_v59 = vld [vmem:[%s2192_s16 + $0xf0] sm:$0xff]  ;;  %v477_v63 = vsub.f32 %v1944_v55, %v2247_v54 }
  0x1f   : > { %v373_v48 = vsub.f32 %v1930_v42, %v2234_v34  ;;  %v2073_v58 = vld [vmem:[%s2192_s16 + $0xf8] sm:$0xff]  ;;  %v2027_v60 = vld [vmem:[%s2192_s16 + $0xe8] sm:$0xff]  ;;  %v2052_v35 = vld [vmem:[%s2192_s16 + $0x170] sm:$0xff] }
  0x20   : > { %v1924_v42 = vld [vmem:[%s2231_s20 + $0x100] sm:$0xff] }
  0x21   : > { %480 = vperm.xlu2 %2126, %v1934_v7   ;;  %v2074_v7 = vld [vmem:[%s2192_s16 + $0x138] sm:$0xff] }
  0x22   : > { %448 = vperm.xlu1 %2125, %v1933_v8   ;;  %v2051_v8 = vld [vmem:[%s2192_s16 + $0x130] sm:$0xff] }
  0x23   : > { %417 = vperm.xlu0 %2124, %v406_v9   ;;  %v1953_v9 = vld [vmem:[%s2231_s20 + $0x188] sm:$0xff] }
  0x29   : > { %576 = vperm.xlu2 %2126, %v1937_v10  }
  0x2a   : > { %544 = vperm.xlu1 %2125, %v1936_v11  }
  0x2b   : > { %512 = vperm.xlu0 %2124, %v1935_v12  }
  0x31   : > { %680 = vperm.xlu2 %2126, %v1957_v13   ;;  %v1921_v13 = vld [vmem:[%s2231_s20 + $0xc0] sm:$0xff] }
  0x32   : > { %648 = vperm.xlu1 %2125, %v1956_v14   ;;  %v1915_v14 = vld [vmem:[%s2231_s20 + $0x40] sm:$0xff] }
  0x33   : > { %617 = vperm.xlu0 %2124, %v606_v15   ;;  %v2028_v15 = vld [vmem:[%s2192_s16 + $0x128] sm:$0xff] }
  0x39   : > { %776 = vperm.xlu2 %2126, %v1960_v16  }
  0x3a   : > { %744 = vperm.xlu1 %2125, %v1959_v17  }
  0x3b   : > { %712 = vperm.xlu0 %2124, %v1958_v18   ;;  %v573_v18 = vsub.f32 %v1953_v9, %v2247_v54 }
  0x41   : > { %880 = vperm.xlu2 %2126, %v1980_v19   ;;  %v274_v19 = vsub.f32 %v1921_v13, %v2234_v34 }
  0x42   : > { %848 = vperm.xlu1 %2125, %v1979_v20   ;;  %v209_v20 = vsub.f32 %v1915_v14, %v2234_v34 }
  0x43   : > { %817 = vperm.xlu0 %2124, %v806_v21  }
  0x49   : > { %976 = vperm.xlu2 %2126, %v1983_v22  }
  0x4a   : > { %944 = vperm.xlu1 %2125, %v1982_v23  }
  0x4b   : > { %912 = vperm.xlu0 %2124, %v1981_v24  }
  0x51   : > { %1080 = vperm.xlu2 %2126, %v2003_v25  }
  0x52   : > { %1048 = vperm.xlu1 %2125, %v2002_v26  }
  0x53   : > { %1017 = vperm.xlu0 %2124, %v1006_v27  }
  0x59   : > { %1176 = vperm.xlu2 %2126, %v2006_v28  }
  0x5a   : > { %1144 = vperm.xlu1 %2125, %v2005_v29  }
  0x5b   : > { %1112 = vperm.xlu0 %2124, %v2004_v30  }
  0x61   : > { %1417 = vperm.xlu2 %2126, %v1406_v31  }
  0x62   : > { %1248 = vperm.xlu1 %2125, %v2025_v32  }
  0x63   : > { %1217 = vperm.xlu0 %2124, %v1206_v33   ;;  %v2075_v33 = vld [vmem:[%s2192_s16 + $0x178] sm:$0xff] }
  0x69   : > { %1648 = vperm.xlu2 %2126, %v2071_v36   ;;  %v2029_v36 = vld [vmem:[%s2192_s16 + $0x168] sm:$0xff] }
  0x6a   : > { %1617 = vperm.xlu1 %2125, %v1606_v37  }
  0x6b   : > { %1448 = vperm.xlu0 %2124, %v2048_v38   ;;  %v344_v40 = vpop.permute.xlu2 %343 }
  0x6c   : > { %v346_v41 = vsub.f32 %v340_v39, %v344_v40  ;;  %v2282_v40 = vld [vmem:[%s2231_s20 + $0x10] sm:$0xff] }
  0x6e   : > { %v347_v43 = vmul.f32 0.15915494, %v346_v41 }
  0x70   : > { %v348_v47 = vadd.f32 0.5, %v347_v43 }
  0x71   : > { %1680 = vperm.xlu2 %2126, %v2072_v44  }
  0x72   : > { %1480 = vperm.xlu1 %2125, %v2049_v45   ;;  %v349_v49 = vfloor.f32 %v348_v47 }
  0x73   : > { %1280 = vperm.xlu0 %2124, %v2026_v46   ;;  %v377_v50 = vpop.permute.xlu2 %376 }
  0x74   : > { %v350_v51 = vmul.f32 6.2831855, %v349_v49  ;;  %v352_v52 = vmul.f32 -1.7484555e-07, %v349_v49  ;;  %v379_v53 = vsub.f32 %v373_v48, %v377_v50 }
  0x76   : > { %v351_v56 = vsub.f32 %v346_v41, %v350_v51  ;;  %v380_v57 = vmul.f32 0.15915494, %v379_v53  ;;  %v1967_v41 = vld [vmem:[%s2231_s20 + $0xd0] sm:$0xff] }
  0x77   : > { %v677_v51 = vsub.f32 %v1967_v41, %v2282_v40 }
  0x78   : > { %v353_v61 = vsub.f32 %v351_v56, %v352_v52  ;;  %v381_v62 = vadd.f32 0.5, %v380_v57  ;;  %v307_v56 = vsub.f32 %v1924_v42, %v2234_v34 }
  0x79   : > { %1712 = vperm.xlu2 %2126, %v2073_v58  }
  0x7a   : > { %1512 = vperm.xlu1 %2125, %v2050_v59   ;;  %v2254_v0 = vmul.f32 0.5, %v353_v61  ;;  %v382_v1 = vfloor.f32 %v381_v62 }
  0x7b   : > { %1312 = vperm.xlu0 %2124, %v2027_v60   ;;  %v481_v2 = vpop.permute.xlu2 %480 }
  0x7c   : > { %v2258_v3 = vmul.f32 %v2254_v0, %v2254_v0  ;;  %v383_v4 = vmul.f32 6.2831855, %v382_v1  ;;  %v385_v5 = vmul.f32 -1.7484555e-07, %v382_v1  ;;  %v483_v6 = vsub.f32 %v477_v63, %v481_v2 }
  0x7e   : > { %v356_v10 = vmul.f32 -2.5052108e-08, %v2258_v3  ;;  %v384_v11 = vsub.f32 %v379_v53, %v383_v4  ;;  %v484_v12 = vmul.f32 0.15915494, %v483_v6 }
  0x80   : > { %v386_v16 = vsub.f32 %v384_v11, %v385_v5  ;;  %v485_v17 = vadd.f32 0.5, %v484_v12  ;;  %v357_v21 = vadd.f32 2.7557319e-06, %v356_v10 }
  0x81   : > { %1744 = vperm.xlu2 %2126, %v2074_v7  }
  0x82   : > { %1544 = vperm.xlu1 %2125, %v2051_v8   ;;  %v2270_v22 = vmul.f32 0.5, %v386_v16  ;;  %v486_v23 = vfloor.f32 %v485_v17  ;;  %v358_v37 = vmul.f32 %v357_v21, %v2258_v3  ;;  %v1918_v17 = vld [vmem:[%s2231_s20 + $0x80] sm:$0xff] }
  0x83   : > { %1344 = vperm.xlu0 %2124, %v2028_v15   ;;  %v577_v24 = vpop.permute.xlu2 %576 }
  0x84   : > { %v278_v25 = vpop.permute.xlu1 %277  ;;  %v2274_v26 = vmul.f32 %v2270_v22, %v2270_v22  ;;  %v487_v27 = vmul.f32 6.2831855, %v486_v23  ;;  %v489_v28 = vmul.f32 -1.7484555e-07, %v486_v23  ;;  %v579_v30 = vsub.f32 %v573_v18, %v577_v24 }
  0x85   : > { %v213_v29 = vpop.permute.xlu0 %212  ;;  %v280_v31 = vsub.f32 %v274_v19, %v278_v25  ;;  %v1928_v52 = vadd.f32 -0.0001984127, %v358_v37 }
  0x86   : > { %v215_v32 = vsub.f32 %v209_v20, %v213_v29  ;;  %v389_v38 = vmul.f32 -2.5052108e-08, %v2274_v26  ;;  %v488_v39 = vsub.f32 %v483_v6, %v487_v27  ;;  %v580_v43 = vmul.f32 0.15915494, %v579_v30 }
  0x87   : > { %v281_v44 = vmul.f32 0.15915494, %v280_v31  ;;  %v360_v4 = vmul.f32 %v1928_v52, %v2258_v3 }
  0x88   : > { %v216_v45 = vmul.f32 0.15915494, %v215_v32  ;;  %v390_v46 = vadd.f32 2.7557319e-06, %v389_v38  ;;  %v490_v47 = vsub.f32 %v488_v39, %v489_v28  ;;  %v581_v48 = vadd.f32 0.5, %v580_v43 }
  0x89   : > { %v282_v49 = vadd.f32 0.5, %v281_v44  ;;  %1776 = vperm.xlu2 %2126, %v2075_v33   ;;  %v361_v18 = vadd.f32 0.008333334, %v360_v4  ;;  %v241_v28 = vsub.f32 %v1918_v17, %v2234_v34 }
  0x8a   : > { %v217_v50 = vadd.f32 0.5, %v216_v45  ;;  %1576 = vperm.xlu1 %2125, %v2052_v35   ;;  %v391_v53 = vmul.f32 %v390_v46, %v2274_v26  ;;  %v2288_v55 = vmul.f32 0.5, %v490_v47  ;;  %v582_v57 = vfloor.f32 %v581_v48 }
  0x8b   : > { %1376 = vperm.xlu0 %2124, %v2029_v36   ;;  %v283_v58 = vfloor.f32 %v282_v49  ;;  %v681_v60 = vpop.permute.xlu2 %680  ;;  %v362_v33 = vmul.f32 %v361_v18, %v2258_v3 }
  0x8c   : > { %v218_v59 = vfloor.f32 %v217_v50  ;;  %v311_v61 = vpop.permute.xlu1 %310  ;;  %v1931_v62 = vadd.f32 -0.0001984127, %v391_v53  ;;  %v2293_v63 = vmul.f32 %v2288_v55, %v2288_v55  ;;  %v583_v1 = vmul.f32 6.2831855, %v582_v57 }
  0x8d   : > { %v284_v2 = vmul.f32 6.2831855, %v283_v58  ;;  %v2297_v6 = vsub.f32 %v677_v51, %v681_v60  ;;  %v313_v7 = vsub.f32 %v307_v56, %v311_v61  ;;  %v286_v10 = vmul.f32 -1.7484555e-07, %v283_v58  ;;  %v1976_v60 = vld [vmem:[%s2231_s20 + $0x190] sm:$0xff] }
  0x8e   : > { %v393_v5 = vmul.f32 %v1931_v62, %v2274_v26  ;;  %v584_v8 = vsub.f32 %v579_v30, %v583_v1  ;;  %v219_v11 = vmul.f32 6.2831855, %v218_v59  ;;  %v585_v12 = vmul.f32 -1.7484555e-07, %v582_v57 }
  0x8f   : > { %v285_v9 = vsub.f32 %v280_v31, %v284_v2  ;;  %v493_v13 = vmul.f32 -2.5052108e-08, %v2293_v63  ;;  %v221_v16 = vmul.f32 -1.7484555e-07, %v218_v59  ;;  %v314_v20 = vmul.f32 0.15915494, %v313_v7 }
  0x90   : > { %v220_v15 = vsub.f32 %v215_v32, %v219_v11  ;;  %v394_v19 = vadd.f32 0.008333334, %v393_v5  ;;  %v586_v21 = vsub.f32 %v584_v8, %v585_v12  ;;  %v684_v25 = vmul.f32 0.15915494, %v2297_v6  ;;  %v245_v32 = vpop.permute.xlu0 %244 }
  0x91   : > { %v287_v14 = vsub.f32 %v285_v9, %v286_v10  ;;  %v315_v27 = vadd.f32 0.5, %v314_v20  ;;  %v494_v29 = vadd.f32 2.7557319e-06, %v493_v13  ;;  %v247_v41 = vsub.f32 %v241_v28, %v245_v32  ;;  %v1941_v20 = vld [vmem:[%s2231_s20 + $0x88] sm:$0xff] }
  0x92   : > { %v222_v24 = vsub.f32 %v220_v15, %v221_v16  ;;  %v395_v35 = vmul.f32 %v394_v19, %v2274_v26  ;;  %v2313_v37 = vmul.f32 0.5, %v586_v21  ;;  %v685_v39 = vadd.f32 0.5, %v684_v25 }
  0x93   : > { %v2301_v23 = vmul.f32 0.5, %v287_v14  ;;  %v316_v36 = vfloor.f32 %v315_v27  ;;  %v495_v42 = vmul.f32 %v494_v29, %v2293_v63  ;;  %v1929_v45 = vadd.f32 -0.16666667, %v362_v33 }
  0x94   : > { %v2309_v31 = vmul.f32 0.5, %v222_v24  ;;  %v1932_v46 = vadd.f32 -0.16666667, %v395_v35  ;;  %v2324_v48 = vmul.f32 %v2313_v37, %v2313_v37  ;;  %v686_v51 = vfloor.f32 %v685_v39 }
  0x95   : > { %v2307_v30 = vmul.f32 %v2301_v23, %v2301_v23  ;;  %v317_v47 = vmul.f32 6.2831855, %v316_v36  ;;  %v319_v53 = vmul.f32 -1.7484555e-07, %v316_v36  ;;  %v248_v56 = vmul.f32 0.15915494, %v247_v41 }
  0x96   : > { %v2318_v34 = vmul.f32 %v2309_v31, %v2309_v31  ;;  %v1945_v57 = vadd.f32 -0.0001984127, %v495_v42  ;;  %v364_v61 = vmul.f32 %v1929_v45, %v2258_v3  ;;  %v397_v62 = vmul.f32 %v1932_v46, %v2274_v26  ;;  %v777_v26 = vpop.permute.xlu2 %776 }
  0x97   : > { %v290_v38 = vmul.f32 -2.5052108e-08, %v2307_v30  ;;  %v318_v52 = vsub.f32 %v313_v7, %v317_v47  ;;  %v249_v2 = vadd.f32 0.5, %v248_v56  ;;  %v589_v4 = vmul.f32 -2.5052108e-08, %v2324_v48 }
  0x98   : > { %v225_v44 = vmul.f32 -2.5052108e-08, %v2318_v34  ;;  %v687_v7 = vmul.f32 6.2831855, %v686_v51  ;;  %v773_v11 = vsub.f32 %v1976_v60, %v2282_v40  ;;  %v497_v12 = vmul.f32 %v1945_v57, %v2293_v63 }
  0x99   : > { %v291_v43 = vadd.f32 2.7557319e-06, %v290_v38  ;;  %v320_v1 = vsub.f32 %v318_v52, %v319_v53  ;;  %v250_v10 = vfloor.f32 %v249_v2  ;;  %v365_v16 = vadd.f32 1.0, %v364_v61 }
  0x9a   : > { %v226_v50 = vadd.f32 2.7557319e-06, %v225_v44  ;;  %v398_v17 = vadd.f32 1.0, %v397_v62  ;;  %v590_v18 = vadd.f32 2.7557319e-06, %v589_v4  ;;  %v688_v19 = vsub.f32 %v2297_v6, %v687_v7 }
  0x9b   : > { %v292_v49 = vmul.f32 %v291_v43, %v2307_v30  ;;  %v2333_v9 = vmul.f32 0.5, %v320_v1  ;;  %v251_v15 = vmul.f32 6.2831855, %v250_v10  ;;  %v253_v25 = vmul.f32 -1.7484555e-07, %v250_v10  ;;  %v449_v43 = vpop.permute.xlu1 %448 }
  0x9c   : > { %v227_v59 = vmul.f32 %v226_v50, %v2318_v34  ;;  %v2345_v27 = vsub.f32 %v773_v11, %v777_v26  ;;  %v498_v28 = vadd.f32 0.008333334, %v497_v12  ;;  %v689_v33 = vmul.f32 -1.7484555e-07, %v686_v51 }
  0x9d   : > { %v1922_v58 = vadd.f32 -0.0001984127, %v292_v49  ;;  %v2340_v14 = vmul.f32 %v2333_v9, %v2333_v9  ;;  %v252_v24 = vsub.f32 %v247_v41, %v251_v15  ;;  %v445_v38 = vsub.f32 %v1941_v20, %v2247_v54 }
  0x9e   : > { %v1916_v8 = vadd.f32 -0.0001984127, %v227_v59  ;;  %v366_v39 = vmul.f32 %v365_v16, %v2254_v0  ;;  %v399_v6 = vmul.f32 %v398_v17, %v2270_v22  ;;  %v591_v42 = vmul.f32 %v590_v18, %v2324_v48  ;;  %v418_v16 = vpop.permute.xlu0 %417 }
  0x9f   : > { %v294_v5 = vmul.f32 %v1922_v58, %v2307_v30  ;;  %v323_v21 = vmul.f32 -2.5052108e-08, %v2340_v14  ;;  %v254_v36 = vsub.f32 %v252_v24, %v253_v25  ;;  %v780_v41 = vmul.f32 0.15915494, %v2345_v27  ;;  %v1938_v58 = vld [vmem:[%s2231_s20 + $0x48] sm:$0xff] }
  0xa0   : > { %v229_v3 = vmul.f32 %v1916_v8, %v2318_v34  ;;  %v690_v44 = vsub.f32 %v688_v19, %v689_v33  ;;  %v499_v47 = vmul.f32 %v498_v28, %v2293_v63  ;;  %v451_v22 = vsub.f32 %v445_v38, %v449_v43  ;;  %v1950_v38 = vld [vmem:[%s2231_s20 + $0x148] sm:$0xff]  ;;  %v1990_v43 = vld [vmem:[%s2231_s20 + $0xd8] sm:$0xff] }
  0xa1   : > { %v295_v13 = vadd.f32 0.008333334, %v294_v5  ;;  %v324_v35 = vadd.f32 2.7557319e-06, %v323_v21  ;;  %v2354_v46 = vmul.f32 0.5, %v254_v36  ;;  %v367_v52 = vmul.f32 %v366_v39, %v366_v39 }
  0xa2   : > { %v230_v32 = vadd.f32 0.008333334, %v229_v3  ;;  %v400_v53 = vmul.f32 %v399_v6, %v399_v6  ;;  %v1954_v56 = vadd.f32 -0.0001984127, %v591_v42  ;;  %v781_v57 = vadd.f32 0.5, %v780_v41  ;;  %v2389_v41 = vld [vmem:[%s2231_s20 + $0x18] sm:$0xff] }
  0xa3   : > { %v296_v29 = vmul.f32 %v295_v13, %v2307_v30  ;;  %v325_v45 = vmul.f32 %v324_v35, %v2340_v14  ;;  %v2360_v0 = vmul.f32 %v2354_v46, %v2354_v46  ;;  %v2363_v59 = vmul.f32 0.5, %v690_v44 }
  0xa4   : > { %v231_v50 = vmul.f32 %v230_v32, %v2318_v34  ;;  %v1946_v62 = vadd.f32 -0.16666667, %v499_v47  ;;  %v452_v8 = vmul.f32 0.15915494, %v451_v22  ;;  %v414_v7 = vsub.f32 %v1938_v58, %v2247_v54 }
  0xa5   : > { %v1923_v49 = vadd.f32 -0.16666667, %v296_v29  ;;  %v1925_v51 = vadd.f32 -0.0001984127, %v325_v45  ;;  %v257_v61 = vmul.f32 -2.5052108e-08, %v2360_v0  ;;  %v593_v12 = vmul.f32 %v1954_v56, %v2324_v48 }
  0xa6   : > { %v1917_v2 = vadd.f32 -0.16666667, %v231_v50  ;;  %v2369_v10 = vmul.f32 2.0, %v367_v52  ;;  %v2371_v11 = vmul.f32 2.0, %v400_v53  ;;  %v782_v13 = vfloor.f32 %v781_v57  ;;  %v545_v50 = vpop.permute.xlu1 %544 }
  0xa7   : > { %v327_v60 = vmul.f32 %v1925_v51, %v2340_v14  ;;  %v298_v1 = vmul.f32 %v1923_v49, %v2307_v30  ;;  %v258_v5 = vadd.f32 2.7557319e-06, %v257_v61  ;;  %v2376_v3 = vmul.f32 %v2363_v59, %v2363_v59 }
  0xa8   : > { %v453_v15 = vadd.f32 0.5, %v452_v8  ;;  %v501_v17 = vmul.f32 %v1946_v62, %v2293_v63  ;;  %v233_v19 = vmul.f32 %v1917_v2, %v2318_v34  ;;  %v369_v25 = vsub.f32 1.0, %v2369_v10 }
  0xa9   : > { %v328_v4 = vadd.f32 0.008333334, %v327_v60  ;;  %v259_v30 = vmul.f32 %v258_v5, %v2360_v0  ;;  %v299_v18 = vadd.f32 1.0, %v298_v1  ;;  %v594_v28 = vadd.f32 0.008333334, %v593_v12 }
  0xaa   : > { %v454_v24 = vfloor.f32 %v453_v15  ;;  %v783_v29 = vmul.f32 6.2831855, %v782_v13  ;;  %v420_v32 = vsub.f32 %v414_v7, %v418_v16  ;;  %v402_v33 = vsub.f32 1.0, %v2371_v11 }
  0xab   : > { %v329_v26 = vmul.f32 %v328_v4, %v2340_v14  ;;  %v1919_v21 = vadd.f32 -0.0001984127, %v259_v30  ;;  %v693_v35 = vmul.f32 -2.5052108e-08, %v2376_v3  ;;  %v502_v39 = vadd.f32 1.0, %v501_v17 }
  0xac   : > { %v455_v63 = vmul.f32 6.2831855, %v454_v24  ;;  %v300_v34 = vmul.f32 %v299_v18, %v2301_v23  ;;  %v234_v6 = vadd.f32 1.0, %v233_v19  ;;  %v421_v42 = vmul.f32 0.15915494, %v420_v32 }
  0xad   : > { %v1926_v20 = vadd.f32 -0.16666667, %v329_v26  ;;  %v261_v36 = vmul.f32 %v1919_v21, %v2360_v0  ;;  %v457_v49 = vmul.f32 -1.7484555e-07, %v454_v24  ;;  %v595_v51 = vmul.f32 %v594_v28, %v2324_v48 }
  0xae   : > { %v456_v47 = vsub.f32 %v451_v22, %v455_v63  ;;  %v784_v52 = vsub.f32 %v2345_v27, %v783_v29  ;;  %v422_v53 = vadd.f32 0.5, %v421_v42  ;;  %v541_v56 = vsub.f32 %v1950_v38, %v2247_v54  ;;  %v881_v22 = vpop.permute.xlu2 %880  ;;  %v513_v29 = vpop.permute.xlu0 %512 }
  0xaf   : > { %v331_v44 = vmul.f32 %v1926_v20, %v2340_v14  ;;  %v262_v45 = vadd.f32 0.008333334, %v261_v36  ;;  %v694_v57 = vadd.f32 2.7557319e-06, %v693_v35  ;;  %v877_v60 = vsub.f32 %v1990_v43, %v2389_v41 }
  0xb0   : > { %v458_v58 = vsub.f32 %v456_v47, %v457_v49  ;;  %v301_v61 = vmul.f32 %v300_v34, %v300_v34  ;;  %v785_v62 = vmul.f32 -1.7484555e-07, %v782_v13  ;;  %v423_v14 = vfloor.f32 %v422_v53 }
  0xb1   : > { %v263_v23 = vmul.f32 %v262_v45, %v2360_v0  ;;  %v547_v1 = vsub.f32 %v541_v56, %v545_v50  ;;  %v235_v2 = vmul.f32 %v234_v6, %v2309_v31  ;;  %v332_v4 = vadd.f32 1.0, %v331_v44  ;;  %v1947_v31 = vld [vmem:[%s2231_s20 + $0x108] sm:$0xff]  ;;  %v1999_v44 = vld [vmem:[%s2231_s20 + $0x198] sm:$0xff] }
  0xb2   : > { %v2399_v27 = vmul.f32 0.5, %v458_v58  ;;  %v503_v8 = vmul.f32 %v502_v39, %v2288_v55  ;;  %v1955_v7 = vadd.f32 -0.16666667, %v595_v51  ;;  %v786_v12 = vsub.f32 %v784_v52, %v785_v62 }
  0xb3   : > { %v1920_v5 = vadd.f32 -0.16666667, %v263_v23  ;;  %v424_v26 = vmul.f32 6.2831855, %v423_v14  ;;  %v695_v30 = vmul.f32 %v694_v57, %v2376_v3  ;;  %v2408_v16 = vsub.f32 %v877_v60, %v881_v22 }
  0xb4   : > { %v2406_v13 = vmul.f32 %v2399_v27, %v2399_v27  ;;  %v302_v17 = vmul.f32 2.0, %v301_v61  ;;  %v426_v19 = vmul.f32 -1.7484555e-07, %v423_v14  ;;  %v548_v20 = vmul.f32 0.15915494, %v547_v1 }
  0xb5   : > { %v265_v15 = vmul.f32 %v1920_v5, %v2360_v0  ;;  %v425_v18 = vsub.f32 %v420_v32, %v424_v26  ;;  %v236_v21 = vmul.f32 %v235_v2, %v235_v2  ;;  %v333_v55 = vmul.f32 %v332_v4, %v2333_v9 }
  0xb6   : > { %v461_v28 = vmul.f32 -2.5052108e-08, %v2406_v13  ;;  %v2413_v0 = vmul.f32 0.5, %v786_v12  ;;  %v549_v36 = vadd.f32 0.5, %v548_v20  ;;  %v509_v63 = vsub.f32 %v1947_v31, %v2247_v54  ;;  %v977_v62 = vpop.permute.xlu2 %976 }
  0xb7   : > { %v266_v24 = vadd.f32 1.0, %v265_v15  ;;  %v427_v35 = vsub.f32 %v425_v18, %v426_v19  ;;  %v597_v38 = vmul.f32 %v1955_v7, %v2324_v48  ;;  %v884_v34 = vmul.f32 0.15915494, %v2408_v16 }
  0xb8   : > { %v462_v39 = vadd.f32 2.7557319e-06, %v461_v28  ;;  %v1968_v6 = vadd.f32 -0.0001984127, %v695_v30  ;;  %v550_v42 = vfloor.f32 %v549_v36  ;;  %v515_v43 = vsub.f32 %v509_v63, %v513_v29 }
  0xb9   : > { %v267_v32 = vmul.f32 %v266_v24, %v2354_v46  ;;  %v2419_v9 = vmul.f32 0.5, %v427_v35  ;;  %v237_v45 = vmul.f32 2.0, %v236_v21  ;;  %v334_v47 = vmul.f32 %v333_v55, %v333_v55 }
  0xba   : > { %v463_v50 = vmul.f32 %v462_v39, %v2406_v13  ;;  %v303_v51 = vsub.f32 1.0, %v302_v17  ;;  %v2425_v54 = vmul.f32 %v2413_v0, %v2413_v0  ;;  %v551_v46 = vmul.f32 6.2831855, %v550_v42 }
  0xbb   : > { %v268_v49 = vmul.f32 %v267_v32, %v267_v32  ;;  %v2429_v48 = vmul.f32 %v2419_v9, %v2419_v9  ;;  %v885_v56 = vadd.f32 0.5, %v884_v34  ;;  %v973_v57 = vsub.f32 %v1999_v44, %v2389_v41 }
  0xbc   : > { %v1942_v53 = vadd.f32 -0.0001984127, %v463_v50  ;;  %v552_v58 = vsub.f32 %v547_v1, %v551_v46  ;;  %v553_v60 = vmul.f32 -1.7484555e-07, %v550_v42  ;;  %v516_v61 = vmul.f32 0.15915494, %v515_v43 }
  0xbd   : > { %v269_v52 = vmul.f32 2.0, %v268_v49  ;;  %v430_v23 = vmul.f32 -2.5052108e-08, %v2429_v48  ;;  %v238_v14 = vsub.f32 1.0, %v237_v45  ;;  %v335_v22 = vmul.f32 2.0, %v334_v47 }
  0xbe   : > { %v465_v4 = vmul.f32 %v1942_v53, %v2406_v13  ;;  %v789_v5 = vmul.f32 -2.5052108e-08, %v2425_v54  ;;  %v554_v12 = vsub.f32 %v552_v58, %v553_v60  ;;  %v517_v26 = vadd.f32 0.5, %v516_v61 }
  0xbf   : > { %v270_v2 = vsub.f32 1.0, %v269_v52  ;;  %v431_v7 = vadd.f32 2.7557319e-06, %v430_v23  ;;  %v886_v31 = vfloor.f32 %v885_v56  ;;  %v2435_v17 = vsub.f32 %v973_v57, %v977_v62  ;;  %v649_v57 = vpop.permute.xlu1 %648  ;;  %v1961_v62 = vld [vmem:[%s2231_s20 + $0x50] sm:$0xff] }
  0xc0   : > { %v466_v15 = vadd.f32 0.008333334, %v465_v4  ;;  %v504_v1 = vmul.f32 %v503_v8, %v503_v8  ;;  %v2438_v19 = vmul.f32 0.5, %v554_v12  ;;  %v518_v20 = vfloor.f32 %v517_v26  ;;  %v1964_v8 = vld [vmem:[%s2231_s20 + $0x90] sm:$0xff] }
  0xc1   : > { %v271_v30 = vadd.f32 %v270_v2, %v238_v14  ;;  %v432_v18 = vmul.f32 %v431_v7, %v2429_v48  ;;  %v598_v21 = vadd.f32 1.0, %v597_v38  ;;  %v697_v55 = vmul.f32 %v1968_v6, %v2376_v3  ;;  %v618_v7 = vpop.permute.xlu0 %617 }
  0xc2   : > { %v336_v24 = vsub.f32 1.0, %v335_v22  ;;  %v467_v29 = vmul.f32 %v466_v15, %v2406_v13  ;;  %v2444_v36 = vmul.f32 %v2438_v19, %v2438_v19  ;;  %v519_v63 = vmul.f32 6.2831855, %v518_v20 }
  0xc3   : > { %v304_v28 = vadd.f32 %v303_v51, %v271_v30  ;;  %v1939_v35 = vadd.f32 -0.0001984127, %v432_v18  ;;  %v790_v39 = vadd.f32 2.7557319e-06, %v789_v5  ;;  %v887_v34 = vmul.f32 6.2831855, %v886_v31 }
  0xc4   : > { %v980_v42 = vmul.f32 0.15915494, %v2435_v17  ;;  %v557_v6 = vmul.f32 -2.5052108e-08, %v2444_v36  ;;  %v520_v44 = vsub.f32 %v515_v43, %v519_v63  ;;  %v521_v45 = vmul.f32 -1.7484555e-07, %v518_v20 }
  0xc5   : > { %v337_v32 = vadd.f32 %v336_v24, %v304_v28  ;;  %v434_v38 = vmul.f32 %v1939_v35, %v2429_v48  ;;  %v2450_v47 = vmul.f32 2.0, %v504_v1  ;;  %v698_v49 = vadd.f32 0.008333334, %v697_v55 }
  0xc6   : > { %v645_v51 = vsub.f32 %v1964_v8, %v2282_v40  ;;  %v1943_v46 = vadd.f32 -0.16666667, %v467_v29  ;;  %v558_v53 = vadd.f32 2.7557319e-06, %v557_v6  ;;  %v522_v56 = vsub.f32 %v520_v44, %v521_v45 }
  0xc7   : > { %v370_v50 = vadd.f32 %v369_v25, %v337_v32  ;;  %v435_v52 = vadd.f32 0.008333334, %v434_v38  ;;  %v599_v23 = vmul.f32 %v598_v21, %v2313_v37  ;;  %v791_v58 = vmul.f32 %v790_v39, %v2425_v54 }
  0xc8   : > { %v888_v60 = vsub.f32 %v2408_v16, %v887_v34  ;;  %v559_v25 = vmul.f32 %v558_v53, %v2444_v36  ;;  %v2468_v61 = vmul.f32 0.5, %v522_v56  ;;  %v981_v37 = vadd.f32 0.5, %v980_v42  ;;  %v2494_v53 = vld [vmem:[%s2231_s20 + $0x20] sm:$0xff] }
  0xc9   : > { %v403_v43 = vadd.f32 %v402_v33, %v370_v50  ;;  %v436_v10 = vmul.f32 %v435_v52, %v2429_v48  ;;  %v699_v11 = vmul.f32 %v698_v49, %v2376_v3  ;;  %v889_v14 = vmul.f32 -1.7484555e-07, %v886_v31  ;;  %v2013_v56 = vld [vmem:[%s2231_s20 + $0xe0] sm:$0xff] }
  0xca   : > { %v651_v22 = vsub.f32 %v645_v51, %v649_v57  ;;  %v469_v16 = vmul.f32 %v1943_v46, %v2406_v13  ;;  %v1951_v4 = vadd.f32 -0.0001984127, %v559_v25  ;;  %v2475_v5 = vmul.f32 %v2468_v61, %v2468_v61 }
  0xcb   : > { %v404_v33 = vmul.f32 0.16666667, %v403_v43  ;;  %v1940_v2 = vadd.f32 -0.16666667, %v436_v10  ;;  %v1977_v12 = vadd.f32 -0.0001984127, %v791_v58  ;;  %v890_v26 = vsub.f32 %v888_v60, %v889_v14 }
  0xcc   : > { %v652_v30 = vmul.f32 0.15915494, %v651_v22  ;;  %v614_v15 = vsub.f32 %v1961_v62, %v2282_v40  ;;  %v561_v31 = vmul.f32 %v1951_v4, %v2444_v36  ;;  %v525_v18 = vmul.f32 -2.5052108e-08, %v2475_v5 }
  0xcd   : > { %405 = vst [vmem:[%s2464_s24] sm:$0xff] %v404_v33  ;;  %v438_v1 = vmul.f32 %v1940_v2, %v2429_v48  ;;  %v982_v13 = vfloor.f32 %v981_v37  ;;  %v600_v20 = vmul.f32 %v599_v23, %v599_v23  ;;  %v1969_v21 = vadd.f32 -0.16666667, %v699_v11 }
  0xce   : > { %v653_v55 = vadd.f32 0.5, %v652_v30  ;;  %v620_v24 = vsub.f32 %v614_v15, %v618_v7  ;;  %v470_v28 = vadd.f32 1.0, %v469_v16  ;;  %v562_v35 = vadd.f32 0.008333334, %v561_v31  ;;  %v1973_v15 = vld [vmem:[%s2231_s20 + $0x150] sm:$0xff] }
  0xcf   : > { %v439_v29 = vadd.f32 1.0, %v438_v1  ;;  %v526_v63 = vadd.f32 2.7557319e-06, %v525_v18  ;;  %v2482_v8 = vmul.f32 0.5, %v890_v26  ;;  %v793_v48 = vmul.f32 %v1977_v12, %v2425_v54 }
  0xd0   : > { %v654_v32 = vfloor.f32 %v653_v55  ;;  %v621_v39 = vmul.f32 0.15915494, %v620_v24  ;;  %v563_v34 = vmul.f32 %v562_v35, %v2444_v36  ;;  %v983_v38 = vmul.f32 6.2831855, %v982_v13 }
  0xd1   : > { %v527_v42 = vmul.f32 %v526_v63, %v2475_v5  ;;  %v506_v6 = vsub.f32 1.0, %v2450_v47  ;;  %v2488_v44 = vmul.f32 2.0, %v600_v20  ;;  %v701_v45 = vmul.f32 %v1969_v21, %v2376_v3 }
  0xd2   : > { %v655_v49 = vmul.f32 6.2831855, %v654_v32  ;;  %v471_v50 = vmul.f32 %v470_v28, %v2399_v27  ;;  %v440_v51 = vmul.f32 %v439_v29, %v2419_v9  ;;  %v1952_v46 = vadd.f32 -0.16666667, %v563_v34  ;;  %v745_v29 = vpop.permute.xlu1 %744 }
  0xd3   : > { %v1948_v52 = vadd.f32 -0.0001984127, %v527_v42  ;;  %v2499_v57 = vmul.f32 %v2482_v8, %v2482_v8  ;;  %v657_v43 = vmul.f32 -1.7484555e-07, %v654_v32  ;;  %v622_v58 = vadd.f32 0.5, %v621_v39 }
  0xd4   : > { %v656_v23 = vsub.f32 %v651_v22, %v655_v49  ;;  %v794_v60 = vadd.f32 0.008333334, %v793_v48  ;;  %v565_v3 = vmul.f32 %v1952_v46, %v2444_v36  ;;  %v984_v27 = vsub.f32 %v2435_v17, %v983_v38  ;;  %v1081_v22 = vpop.permute.xlu2 %1080  ;;  %v1970_v48 = vld [vmem:[%s2231_s20 + $0x110] sm:$0xff] }
  0xd5   : > { %v529_v10 = vmul.f32 %v1948_v52, %v2475_v5  ;;  %v702_v9 = vadd.f32 1.0, %v701_v45  ;;  %v623_v37 = vfloor.f32 %v622_v58  ;;  %v1077_v62 = vsub.f32 %v2013_v56, %v2494_v53 }
  0xd6   : > { %v658_v25 = vsub.f32 %v656_v23, %v657_v43  ;;  %v472_v11 = vmul.f32 %v471_v50, %v471_v50  ;;  %v441_v33 = vmul.f32 %v440_v51, %v440_v51  ;;  %v985_v16 = vmul.f32 -1.7484555e-07, %v982_v13  ;;  %v713_v51 = vpop.permute.xlu0 %712 }
  0xd7   : > { %v530_v14 = vadd.f32 0.008333334, %v529_v10  ;;  %v602_v2 = vsub.f32 1.0, %v2488_v44  ;;  %v893_v4 = vmul.f32 -2.5052108e-08, %v2499_v57  ;;  %v795_v17 = vmul.f32 %v794_v60, %v2425_v54 }
  0xd8   : > { %v2507_v36 = vmul.f32 0.5, %v658_v25  ;;  %v624_v7 = vmul.f32 6.2831855, %v623_v37  ;;  %v566_v12 = vadd.f32 1.0, %v565_v3  ;;  %v986_v30 = vsub.f32 %v984_v27, %v985_v16 }
  0xd9   : > { %v531_v26 = vmul.f32 %v530_v14, %v2475_v5  ;;  %v626_v18 = vmul.f32 -1.7484555e-07, %v623_v37  ;;  %v2516_v13 = vsub.f32 %v1077_v62, %v1081_v22  ;;  %v2519_v20 = vmul.f32 %v702_v9, %v2363_v59 }
  0xda   : > { %v2514_v1 = vmul.f32 %v2507_v36, %v2507_v36  ;;  %v625_v31 = vsub.f32 %v620_v24, %v624_v7  ;;  %v473_v21 = vmul.f32 2.0, %v472_v11  ;;  %v442_v55 = vmul.f32 2.0, %v441_v33  ;;  %v2022_v7 = vld [vmem:[%s2231_s20 + $0x1a0] sm:$0xff] }
  0xdb   : > { %v1949_v28 = vadd.f32 -0.16666667, %v531_v26  ;;  %v894_v35 = vadd.f32 2.7557319e-06, %v893_v4  ;;  %v741_v39 = vsub.f32 %v1973_v15, %v2282_v40  ;;  %v1978_v34 = vadd.f32 -0.16666667, %v795_v17 }
  0xdc   : > { %v661_v63 = vmul.f32 -2.5052108e-08, %v2514_v1  ;;  %v627_v32 = vsub.f32 %v625_v31, %v626_v18  ;;  %v567_v24 = vmul.f32 %v566_v12, %v2438_v19  ;;  %v2526_v38 = vmul.f32 0.5, %v986_v30 }
  0xdd   : > { %v533_v42 = vmul.f32 %v1949_v28, %v2475_v5  ;;  %v1084_v49 = vmul.f32 0.15915494, %v2516_v13  ;;  %v747_v50 = vsub.f32 %v741_v39, %v745_v29  ;;  %v474_v46 = vsub.f32 1.0, %v473_v21 }
  0xde   : > { %v662_v59 = vadd.f32 2.7557319e-06, %v661_v63  ;;  %v2528_v45 = vmul.f32 0.5, %v627_v32  ;;  %v443_v52 = vsub.f32 1.0, %v442_v55  ;;  %v709_v23 = vsub.f32 %v1970_v48, %v2282_v40  ;;  %v1177_v48 = vpop.permute.xlu2 %1176 }
  0xdf   : > { %v534_v56 = vadd.f32 1.0, %v533_v42  ;;  %v895_v43 = vmul.f32 %v894_v35, %v2499_v57  ;;  %v748_v58 = vmul.f32 0.15915494, %v747_v50  ;;  %v568_v60 = vmul.f32 %v567_v24, %v567_v24 }
  0xe0   : > { %v663_v19 = vmul.f32 %v662_v59, %v2514_v1  ;;  %v2536_v5 = vmul.f32 %v2528_v45, %v2528_v45  ;;  %v2541_v10 = vmul.f32 %v2526_v38, %v2526_v38  ;;  %v715_v27 = vsub.f32 %v709_v23, %v713_v51 }
  0xe1   : > { %v535_v3 = vmul.f32 %v534_v56, %v2468_v61  ;;  %v2544_v25 = vadd.f32 0.5, %v1084_v49  ;;  %v749_v37 = vadd.f32 0.5, %v748_v58  ;;  %v797_v62 = vmul.f32 %v1978_v34, %v2425_v54 }
  0xe2   : > { %v1965_v9 = vadd.f32 -0.0001984127, %v663_v19  ;;  %v630_v40 = vmul.f32 -2.5052108e-08, %v2536_v5  ;;  %v475_v11 = vadd.f32 %v474_v46, %v443_v52  ;;  %v716_v14 = vmul.f32 0.15915494, %v715_v27 }
  0xe3   : > { %v536_v33 = vmul.f32 %v535_v3, %v535_v3  ;;  %v1991_v16 = vadd.f32 -0.0001984127, %v895_v43  ;;  %v750_v4 = vfloor.f32 %v749_v37  ;;  %v569_v17 = vmul.f32 2.0, %v568_v60  ;;  %v1987_v43 = vld [vmem:[%s2231_s20 + $0x98] sm:$0xff] }
  0xe4   : > { %v665_v22 = vmul.f32 %v1965_v9, %v2514_v1  ;;  %v631_v61 = vadd.f32 2.7557319e-06, %v630_v40  ;;  %v989_v26 = vmul.f32 -2.5052108e-08, %v2541_v10  ;;  %v717_v30 = vadd.f32 0.5, %v716_v14 }
  0xe5   : > { %v537_v12 = vmul.f32 2.0, %v536_v33  ;;  %v1086_v18 = vfloor.f32 %v2544_v25  ;;  %v751_v54 = vmul.f32 6.2831855, %v750_v4  ;;  %v507_v21 = vadd.f32 %v506_v6, %v475_v11  ;;  %v849_v33 = vpop.permute.xlu1 %848 }
  0xe6   : > { %v666_v15 = vadd.f32 0.008333334, %v665_v22  ;;  %v632_v31 = vmul.f32 %v631_v61, %v2536_v5  ;;  %v718_v28 = vfloor.f32 %v717_v30  ;;  %v1173_v29 = vsub.f32 %v2022_v7, %v2494_v53  ;;  %v818_v30 = vpop.permute.xlu0 %817 }
  0xe7   : > { %v538_v55 = vsub.f32 1.0, %v537_v12  ;;  %v897_v35 = vmul.f32 %v1991_v16, %v2499_v57  ;;  %v752_v32 = vsub.f32 %v747_v50, %v751_v54  ;;  %v753_v39 = vmul.f32 -1.7484555e-07, %v750_v4 }
  0xe8   : > { %v1962_v63 = vadd.f32 -0.0001984127, %v632_v31  ;;  %v570_v34 = vsub.f32 1.0, %v569_v17  ;;  %v667_v42 = vmul.f32 %v666_v15, %v2514_v1  ;;  %v719_v59 = vmul.f32 6.2831855, %v718_v28 }
  0xe9   : > { %v539_v24 = vadd.f32 %v538_v55, %v507_v21  ;;  %v990_v49 = vadd.f32 2.7557319e-06, %v989_v26  ;;  %v1087_v6 = vmul.f32 6.2831855, %v1086_v18  ;;  %v754_v51 = vsub.f32 %v752_v32, %v753_v39 }
  0xea   : > { %v634_v47 = vmul.f32 %v1962_v63, %v2536_v5  ;;  %v720_v52 = vsub.f32 %v715_v27, %v719_v59  ;;  %v721_v56 = vmul.f32 -1.7484555e-07, %v718_v28  ;;  %v2558_v23 = vsub.f32 %v1173_v29, %v1177_v48 }
  0xeb   : > { %v571_v46 = vadd.f32 %v570_v34, %v539_v24  ;;  %v798_v19 = vadd.f32 1.0, %v797_v62  ;;  %v898_v50 = vadd.f32 0.008333334, %v897_v35  ;;  %v2561_v60 = vmul.f32 0.5, %v754_v51 }
  0xec   : > { %v635_v58 = vadd.f32 0.008333334, %v634_v47  ;;  %v704_v3 = vmul.f32 %v2519_v20, %v2519_v20  ;;  %v1966_v40 = vadd.f32 -0.16666667, %v667_v42  ;;  %v722_v25 = vsub.f32 %v720_v52, %v721_v56 }
  0xed   : > { %v603_v9 = vadd.f32 %v602_v2, %v571_v46  ;;  %v991_v27 = vmul.f32 %v990_v49, %v2541_v10  ;;  %v2571_v62 = vmul.f32 %v2561_v60, %v2561_v60  ;;  %v845_v11 = vsub.f32 %v1987_v43, %v2389_v41  ;;  %v1984_v2 = vld [vmem:[%s2231_s20 + $0x58] sm:$0xff] }
  0xee   : > { %v636_v37 = vmul.f32 %v635_v58, %v2536_v5  ;;  %v1088_v20 = vsub.f32 %v2516_v13, %v1087_v6  ;;  %v2575_v16 = vmul.f32 0.5, %v722_v25  ;;  %v1180_v44 = vmul.f32 0.15915494, %v2558_v23 }
  0xef   : > { %v604_v14 = vmul.f32 0.16666667, %v603_v9  ;;  %v799_v22 = vmul.f32 %v798_v19, %v2413_v0  ;;  %v899_v61 = vmul.f32 %v898_v50, %v2499_v57  ;;  %v757_v7 = vmul.f32 -2.5052108e-08, %v2571_v62 }
  0xf0   : > { %v1963_v4 = vadd.f32 -0.16666667, %v636_v37  ;;  %v669_v17 = vmul.f32 %v1966_v40, %v2514_v1  ;;  %v1089_v12 = vmul.f32 -1.7484555e-07, %v1086_v18  ;;  %v2586_v26 = vmul.f32 %v2575_v16, %v2575_v16 }
  0xf1   : > { %605 = vst [vmem:[%s2464_s24 + $0x8] sm:$0xff] %v604_v14  ;;  %v851_v13 = vsub.f32 %v845_v11, %v849_v33  ;;  %v2000_v15 = vadd.f32 -0.0001984127, %v991_v27  ;;  %v758_v54 = vadd.f32 2.7557319e-06, %v757_v7  ;;  %v814_v0 = vsub.f32 %v1984_v2, %v2389_v41  ;;  %v1996_v27 = vld [vmem:[%s2231_s20 + $0x158] sm:$0xff] }
  0xf2   : > { %v638_v31 = vmul.f32 %v1963_v4, %v2536_v5  ;;  %v1090_v21 = vsub.f32 %v1088_v20, %v1089_v12  ;;  %v725_v55 = vmul.f32 -2.5052108e-08, %v2586_v26  ;;  %v1181_v28 = vadd.f32 0.5, %v1180_v44 }
  0xf3   : > { %v852_v29 = vmul.f32 0.15915494, %v851_v13  ;;  %v2591_v35 = vmul.f32 2.0, %v704_v3  ;;  %v800_v1 = vmul.f32 %v799_v22, %v799_v22  ;;  %v759_v18 = vmul.f32 %v758_v54, %v2571_v62 }
  0xf4   : > { %v820_v63 = vsub.f32 %v814_v0, %v818_v30  ;;  %v670_v32 = vadd.f32 1.0, %v669_v17  ;;  %v639_v39 = vadd.f32 1.0, %v638_v31  ;;  %v726_v48 = vadd.f32 2.7557319e-06, %v725_v55 }
  0xf5   : > { %v853_v34 = vadd.f32 0.5, %v852_v29  ;;  %v1992_v24 = vadd.f32 -0.16666667, %v899_v61  ;;  %v993_v5 = vmul.f32 %v2000_v15, %v2541_v10  ;;  %v1974_v42 = vadd.f32 -0.0001984127, %v759_v18  ;;  %v1993_v29 = vld [vmem:[%s2231_s20 + $0x118] sm:$0xff] }
  0xf6   : > { %v821_v59 = vmul.f32 0.15915494, %v820_v63  ;;  %v2595_v49 = vmul.f32 0.5, %v1090_v21  ;;  %v727_v47 = vmul.f32 %v726_v48, %v2586_v26  ;;  %v1182_v6 = vfloor.f32 %v1181_v28 }
  0xf7   : > { %v854_v51 = vfloor.f32 %v853_v34  ;;  %v706_v46 = vsub.f32 1.0, %v2591_v35  ;;  %v761_v52 = vmul.f32 %v1974_v42, %v2571_v62  ;;  %v2600_v43 = vmul.f32 2.0, %v800_v1  ;;  %v2666_v35 = vld [vmem:[%s2231_s20 + $0x30] sm:$0xff] }
  0xf8   : > { %v822_v56 = vadd.f32 0.5, %v821_v59  ;;  %v671_v19 = vmul.f32 %v670_v32, %v2507_v36  ;;  %v640_v50 = vmul.f32 %v639_v39, %v2528_v45  ;;  %v1971_v58 = vadd.f32 -0.0001984127, %v727_v47 }
  0xf9   : > { %v901_v3 = vmul.f32 %v1992_v24, %v2499_v57  ;;  %v762_v9 = vadd.f32 0.008333334, %v761_v52  ;;  %v855_v40 = vmul.f32 6.2831855, %v854_v51  ;;  %v994_v37 = vadd.f32 0.008333334, %v993_v5  ;;  %v913_v5 = vpop.permute.xlu0 %912 }
  0xfa   : > { %v823_v25 = vfloor.f32 %v822_v56  ;;  %v2608_v11 = vmul.f32 %v2595_v49, %v2595_v49  ;;  %v729_v33 = vmul.f32 %v1971_v58, %v2586_v26  ;;  %v1183_v14 = vmul.f32 6.2831855, %v1182_v6 }
  0xfb   : > { %v763_v20 = vmul.f32 %v762_v9, %v2571_v62  ;;  %v856_v36 = vsub.f32 %v851_v13, %v855_v40  ;;  %v857_v44 = vmul.f32 -1.7484555e-07, %v854_v51  ;;  %v672_v2 = vmul.f32 %v671_v19, %v671_v19  ;;  %v945_v13 = vpop.permute.xlu1 %944 }
  0xfc   : > { %v824_v45 = vmul.f32 6.2831855, %v823_v25  ;;  %v641_v22 = vmul.f32 %v640_v50, %v640_v50  ;;  %v730_v57 = vadd.f32 0.008333334, %v729_v33  ;;  %v941_v61 = vsub.f32 %v1996_v27, %v2389_v41 }
  0xfd   : > { %v1975_v4 = vadd.f32 -0.16666667, %v763_v20  ;;  %v858_v7 = vsub.f32 %v856_v36, %v857_v44  ;;  %v826_v12 = vmul.f32 -1.7484555e-07, %v823_v25  ;;  %v902_v30 = vadd.f32 1.0, %v901_v3 }
  0xfe   : > { %v825_v17 = vsub.f32 %v820_v63, %v824_v45  ;;  %v1093_v15 = vmul.f32 -2.5052108e-08, %v2608_v11  ;;  %v731_v31 = vmul.f32 %v730_v57, %v2586_v26  ;;  %v1184_v54 = vsub.f32 %v2558_v23, %v1183_v14  ;;  %v2627_v23 = vpop.permute.xlu2 %1417 }
  0xff   : > { %v995_v0 = vmul.f32 %v994_v37, %v2541_v10  ;;  %v765_v21 = vmul.f32 %v1975_v4, %v2571_v62  ;;  %v2618_v55 = vmul.f32 0.5, %v858_v7  ;;  %v673_v1 = vmul.f32 2.0, %v672_v2  ;;  %v2652_v4 = vld [vmem:[%s2231_s20 + $0x38] sm:$0xff] }
 0x100   : > { %v827_v28 = vsub.f32 %v825_v17, %v826_v12  ;;  %v642_v18 = vmul.f32 2.0, %v641_v22  ;;  %v1972_v63 = vadd.f32 -0.16666667, %v731_v31  ;;  %v1185_v32 = vmul.f32 -1.7484555e-07, %v1182_v6 }
 0x101   : > { %v766_v39 = vadd.f32 1.0, %v765_v21  ;;  %v2623_v48 = vmul.f32 %v2618_v55, %v2618_v55  ;;  %v947_v24 = vsub.f32 %v941_v61, %v945_v13  ;;  %v1094_v62 = vadd.f32 2.7557319e-06, %v1093_v15 }
 0x102   : > { %v2625_v34 = vmul.f32 0.5, %v827_v28  ;;  %v733_v42 = vmul.f32 %v1972_v63, %v2586_v26  ;;  %v1186_v59 = vsub.f32 %v1184_v54, %v1185_v32  ;;  %v909_v47 = vsub.f32 %v1993_v29, %v2389_v41 }
 0x103   : > { %v767_v51 = vmul.f32 %v766_v39, %v2561_v60  ;;  %v861_v6 = vmul.f32 -2.5052108e-08, %v2623_v48  ;;  %v948_v56 = vmul.f32 0.15915494, %v947_v24  ;;  %v674_v19 = vsub.f32 1.0, %v673_v1 }
 0x104   : > { %v2635_v52 = vmul.f32 %v2625_v34, %v2625_v34  ;;  %v643_v50 = vsub.f32 1.0, %v642_v18  ;;  %v734_v58 = vadd.f32 1.0, %v733_v42  ;;  %v2637_v3 = vsub.f32 %v909_v47, %v913_v5  ;;  %v2053_v47 = vld [vmem:[%s2231_s20 + $0x70] sm:$0xff] }
 0x105   : > { %v903_v9 = vmul.f32 %v902_v30, %v2482_v8  ;;  %v862_v26 = vadd.f32 2.7557319e-06, %v861_v6  ;;  %v949_v41 = vadd.f32 0.5, %v948_v56  ;;  %v802_v60 = vsub.f32 1.0, %v2600_v43 }
 0x106   : > { %v830_v40 = vmul.f32 -2.5052108e-08, %v2635_v52  ;;  %v1095_v25 = vmul.f32 %v1094_v62, %v2608_v11  ;;  %v768_v27 = vmul.f32 %v767_v51, %v767_v51  ;;  %v735_v37 = vmul.f32 %v734_v58, %v2575_v16  ;;  %v2079_v16 = vld [vmem:[%s2231_s20 + $0xb8] sm:$0xff] }
 0x107   : > { %v2001_v33 = vadd.f32 -0.16666667, %v995_v0  ;;  %v863_v14 = vmul.f32 %v862_v26, %v2623_v48  ;;  %v950_v36 = vfloor.f32 %v949_v41  ;;  %v675_v44 = vadd.f32 %v674_v19, %v643_v50  ;;  %v1649_v0 = vpop.permute.xlu2 %1648  ;;  %v2010_v41 = vld [vmem:[%s2231_s20 + $0xa0] sm:$0xff] }
 0x108   : > { %v831_v20 = vadd.f32 2.7557319e-06, %v830_v40  ;;  %v736_v8 = vmul.f32 %v735_v37, %v735_v37  ;;  %v2645_v45 = vmul.f32 0.5, %v1186_v59  ;;  %v916_v2 = vmul.f32 0.15915494, %v2637_v3 }
 0x109   : > { %v2648_v22 = vmul.f32 %v903_v9, %v903_v9  ;;  %v1988_v43 = vadd.f32 -0.0001984127, %v863_v14  ;;  %v951_v61 = vmul.f32 6.2831855, %v950_v36  ;;  %v2014_v7 = vadd.f32 -0.0001984127, %v1095_v25 }
 0x10a   : > { %v832_v57 = vmul.f32 %v831_v20, %v2635_v52  ;;  %v769_v17 = vmul.f32 2.0, %v768_v27  ;;  %v737_v12 = vmul.f32 2.0, %v736_v8  ;;  %v953_v30 = vmul.f32 -1.7484555e-07, %v950_v36  ;;  %v1049_v8 = vpop.permute.xlu1 %1048 }
 0x10b   : > { %v865_v15 = vmul.f32 %v1988_v43, %v2623_v48  ;;  %v952_v54 = vsub.f32 %v947_v24, %v951_v61  ;;  %v917_v13 = vadd.f32 0.5, %v916_v2  ;;  %v707_v21 = vadd.f32 %v706_v46, %v675_v44  ;;  %v2007_v2 = vld [vmem:[%s2231_s20 + $0x60] sm:$0xff] }
 0x10c   : > { %v1985_v31 = vadd.f32 -0.0001984127, %v832_v57  ;;  %v738_v28 = vsub.f32 1.0, %v737_v12  ;;  %v2660_v29 = vmul.f32 %v2645_v45, %v2645_v45  ;;  %v1645_v1 = vsub.f32 %v2079_v16, %v2652_v4 }
 0x10d   : > { %v866_v18 = vadd.f32 0.008333334, %v865_v15  ;;  %v954_v32 = vsub.f32 %v952_v54, %v953_v30  ;;  %v918_v39 = vfloor.f32 %v917_v13  ;;  %v997_v24 = vmul.f32 %v2001_v33, %v2541_v10 }
 0x10e   : > { %v834_v63 = vmul.f32 %v1985_v31, %v2635_v52  ;;  %v770_v5 = vsub.f32 1.0, %v769_v17  ;;  %v739_v62 = vadd.f32 %v738_v28, %v707_v21  ;;  %v2668_v46 = vsub.f32 %v1645_v1, %v1649_v0  ;;  %v1018_v0 = vpop.permute.xlu0 %1017 }
 0x10f   : > { %v867_v42 = vmul.f32 %v866_v18, %v2623_v48  ;;  %v2672_v51 = vmul.f32 0.5, %v954_v32  ;;  %v919_v6 = vmul.f32 6.2831855, %v918_v39  ;;  %v1097_v56 = vmul.f32 %v2014_v7, %v2608_v11 }
 0x110   : > { %v835_v59 = vadd.f32 0.008333334, %v834_v63  ;;  %v771_v19 = vadd.f32 %v770_v5, %v739_v62  ;;  %v1189_v50 = vmul.f32 -2.5052108e-08, %v2660_v29  ;;  %v921_v10 = vmul.f32 -1.7484555e-07, %v918_v39 }
 0x111   : > { %v1989_v58 = vadd.f32 -0.16666667, %v867_v42  ;;  %v2679_v26 = vmul.f32 %v2672_v51, %v2672_v51  ;;  %v920_v40 = vsub.f32 %v2637_v3, %v919_v6  ;;  %v998_v25 = vadd.f32 1.0, %v997_v24 }
 0x112   : > { %v836_v9 = vmul.f32 %v835_v59, %v2635_v52  ;;  %v803_v27 = vadd.f32 %v802_v60, %v771_v19  ;;  %v1414_v37 = vsub.f32 %v2053_v47, %v2666_v35  ;;  %v1652_v33 = vmul.f32 0.15915494, %v2668_v46 }
 0x113   : > { %v869_v14 = vmul.f32 %v1989_v58, %v2623_v48  ;;  %v957_v36 = vmul.f32 -2.5052108e-08, %v2679_v26  ;;  %v922_v44 = vsub.f32 %v920_v40, %v921_v10  ;;  %v1098_v43 = vadd.f32 0.008333334, %v1097_v56 }
 0x114   : > { %v1986_v20 = vadd.f32 -0.16666667, %v836_v9  ;;  %v804_v57 = vmul.f32 0.16666667, %v803_v27  ;;  %v1653_v61 = vadd.f32 0.5, %v1652_v33  ;;  %v1045_v3 = vsub.f32 %v2010_v41, %v2494_v53  ;;  %v2082_v27 = vld [vmem:[%s2231_s20 + $0xf8] sm:$0xff] }
 0x115   : > { %v1190_v16 = vadd.f32 2.7557319e-06, %v1189_v50  ;;  %v958_v7 = vadd.f32 2.7557319e-06, %v957_v36  ;;  %v2690_v17 = vmul.f32 0.5, %v922_v44  ;;  %v999_v12 = vmul.f32 %v998_v25, %v2526_v38 }
 0x116   : > { %v838_v60 = vmul.f32 %v1986_v20, %v2635_v52  ;;  %805 = vst [vmem:[%s2464_s24 + $0x10] sm:$0xff] %v804_v57  ;;  %v2695_v48 = vsub.f32 %v1414_v37, %v2627_v23  ;;  %v1051_v30 = vsub.f32 %v1045_v3, %v1049_v8  ;;  %v1014_v15 = vsub.f32 %v2007_v2, %v2494_v53 }
 0x117   : > { %v870_v31 = vadd.f32 1.0, %v869_v14  ;;  %v959_v54 = vmul.f32 %v958_v7, %v2679_v26  ;;  %v2701_v13 = vmul.f32 %v2690_v17, %v2690_v17  ;;  %v1654_v52 = vfloor.f32 %v1653_v61 }
 0x118   : > { %v2704_v21 = vmul.f32 2.0, %v2648_v22  ;;  %v839_v38 = vadd.f32 1.0, %v838_v60  ;;  %v1052_v28 = vmul.f32 0.15915494, %v1051_v30  ;;  %v1099_v23 = vmul.f32 %v1098_v43, %v2608_v11 }
 0x119   : > { %v1191_v1 = vmul.f32 %v1190_v16, %v2660_v29  ;;  %v1997_v18 = vadd.f32 -0.0001984127, %v959_v54  ;;  %v925_v63 = vmul.f32 -2.5052108e-08, %v2701_v13  ;;  %v1000_v32 = vmul.f32 %v999_v12, %v999_v12  ;;  %v1681_v12 = vpop.permute.xlu2 %1680 }
 0x11a   : > { %v1421_v39 = vmul.f32 0.15915494, %v2695_v48  ;;  %v1053_v24 = vadd.f32 0.5, %v1052_v28  ;;  %v1020_v5 = vsub.f32 %v1014_v15, %v1018_v0  ;;  %v871_v62 = vmul.f32 %v870_v31, %v2618_v55  ;;  %v2019_v15 = vld [vmem:[%s2231_s20 + $0x160] sm:$0xff] }
 0x11b   : > { %v961_v22 = vmul.f32 %v1997_v18, %v2679_v26  ;;  %v926_v42 = vadd.f32 2.7557319e-06, %v925_v63  ;;  %v1655_v59 = vmul.f32 6.2831855, %v1654_v52  ;;  %v906_v47 = vsub.f32 1.0, %v2704_v21 }
 0x11c   : > { %v840_v6 = vmul.f32 %v839_v38, %v2625_v34  ;;  %v1054_v56 = vfloor.f32 %v1053_v24  ;;  %v1021_v19 = vmul.f32 0.15915494, %v1020_v5  ;;  %v2714_v50 = vadd.f32 -0.16666667, %v1099_v23 }
 0x11d   : > { %v2023_v10 = vadd.f32 -0.0001984127, %v1191_v1  ;;  %v962_v58 = vadd.f32 0.008333334, %v961_v22  ;;  %v927_v9 = vmul.f32 %v926_v42, %v2701_v13  ;;  %v2717_v40 = vmul.f32 2.0, %v1000_v32 }
 0x11e   : > { %v1422_v55 = vadd.f32 0.5, %v1421_v39  ;;  %v1055_v41 = vmul.f32 6.2831855, %v1054_v56  ;;  %v1022_v25 = vadd.f32 0.5, %v1021_v19  ;;  %v872_v37 = vmul.f32 %v871_v62, %v871_v62 }
 0x11f   : > { %v963_v33 = vmul.f32 %v962_v58, %v2679_v26  ;;  %v1994_v14 = vadd.f32 -0.0001984127, %v927_v9  ;;  %v1656_v34 = vsub.f32 %v2668_v46, %v1655_v59  ;;  %v841_v20 = vmul.f32 %v840_v6, %v840_v6 }
 0x120   : > { %v1056_v36 = vsub.f32 %v1051_v30, %v1055_v41  ;;  %v1057_v44 = vmul.f32 -1.7484555e-07, %v1054_v56  ;;  %v1023_v8 = vfloor.f32 %v1022_v25  ;;  %v1657_v57 = vmul.f32 -1.7484555e-07, %v1654_v52  ;;  %v1145_v52 = vpop.permute.xlu1 %1144  ;;  %v2016_v25 = vld [vmem:[%s2231_s20 + $0x120] sm:$0xff] }
 0x121   : > { %v1998_v2 = vadd.f32 -0.16666667, %v963_v33  ;;  %v929_v43 = vmul.f32 %v1994_v14, %v2701_v13  ;;  %v1677_v61 = vsub.f32 %v2082_v27, %v2652_v4  ;;  %v1193_v3 = vmul.f32 %v2023_v10, %v2660_v29 }
 0x122   : > { %v1423_v16 = vfloor.f32 %v1422_v55  ;;  %v1058_v60 = vsub.f32 %v1056_v36, %v1057_v44  ;;  %v1024_v7 = vmul.f32 6.2831855, %v1023_v8  ;;  %v873_v31 = vmul.f32 2.0, %v872_v37 }
 0x123   : > { %v965_v46 = vmul.f32 %v1998_v2, %v2679_v26  ;;  %v930_v54 = vadd.f32 0.008333334, %v929_v43  ;;  %v1658_v30 = vsub.f32 %v1656_v34, %v1657_v57  ;;  %v842_v0 = vmul.f32 2.0, %v841_v20  ;;  %v1113_v43 = vpop.permute.xlu0 %1112  ;;  %v2085_v57 = vld [vmem:[%s2231_s20 + $0x138] sm:$0xff] }
 0x124   : > { %v2727_v38 = vmul.f32 0.5, %v1058_v60  ;;  %v1025_v28 = vsub.f32 %v1020_v5, %v1024_v7  ;;  %v1026_v23 = vmul.f32 -1.7484555e-07, %v1023_v8  ;;  %v1683_v63 = vsub.f32 %v1677_v61, %v1681_v12 }
 0x125   : > { %v966_v1 = vadd.f32 1.0, %v965_v46  ;;  %v931_v18 = vmul.f32 %v930_v54, %v2701_v13  ;;  %v1141_v32 = vsub.f32 %v2019_v15, %v2494_v53  ;;  %v1194_v39 = vadd.f32 0.008333334, %v1193_v3 }
 0x126   : > { %v2731_v24 = vmul.f32 6.2831855, %v1423_v16  ;;  %v2735_v26 = vmul.f32 %v2727_v38, %v2727_v38  ;;  %v1027_v62 = vsub.f32 %v1025_v28, %v1026_v23  ;;  %v874_v22 = vsub.f32 1.0, %v873_v31 }
 0x127   : > { %v1995_v42 = vadd.f32 -0.16666667, %v931_v18  ;;  %v1684_v5 = vmul.f32 0.15915494, %v1683_v63  ;;  %v1147_v59 = vsub.f32 %v1141_v32, %v1145_v52  ;;  %v843_v6 = vsub.f32 1.0, %v842_v0  ;;  %v1713_v52 = vpop.permute.xlu2 %1712 }
 0x128   : > { %v2737_v56 = vmul.f32 0.5, %v1658_v30  ;;  %v1061_v19 = vmul.f32 -2.5052108e-08, %v2735_v26  ;;  %v2740_v10 = vmul.f32 0.5, %v1027_v62  ;;  %v967_v58 = vmul.f32 %v966_v1, %v2672_v51 }
 0x129   : > { %v933_v9 = vmul.f32 %v1995_v42, %v2701_v13  ;;  %v1685_v55 = vadd.f32 0.5, %v1684_v5  ;;  %v1148_v41 = vmul.f32 0.15915494, %v1147_v59  ;;  %v1195_v27 = vmul.f32 %v1194_v39, %v2660_v29 }
 0x12a   : > { %v1426_v37 = vmul.f32 -1.7484555e-07, %v1423_v16  ;;  %v1062_v33 = vadd.f32 2.7557319e-06, %v1061_v19  ;;  %v2748_v14 = vmul.f32 %v2740_v10, %v2740_v10  ;;  %v1425_v34 = vsub.f32 %v2695_v48, %v2731_v24 }
 0x12b   : > { %v934_v20 = vadd.f32 1.0, %v933_v9  ;;  %v1686_v36 = vfloor.f32 %v1685_v55  ;;  %v1149_v51 = vadd.f32 0.5, %v1148_v41  ;;  %v2754_v13 = vmul.f32 %v2737_v56, %v2737_v56 }
 0x12c   : > { %v1063_v44 = vmul.f32 %v1062_v33, %v2735_v26  ;;  %v1030_v8 = vmul.f32 -2.5052108e-08, %v2748_v14  ;;  %v1109_v2 = vsub.f32 %v2016_v25, %v2494_v53  ;;  %v875_v61 = vadd.f32 %v874_v22, %v843_v6 }
 0x12d   : > { %v968_v3 = vmul.f32 %v967_v58, %v967_v58  ;;  %v935_v16 = vmul.f32 %v934_v20, %v2690_v17  ;;  %v1687_v48 = vmul.f32 6.2831855, %v1686_v36  ;;  %v1689_v12 = vmul.f32 -1.7484555e-07, %v1686_v36 }
 0x12e   : > { %v2011_v60 = vadd.f32 -0.0001984127, %v1063_v44  ;;  %v1031_v7 = vadd.f32 2.7557319e-06, %v1030_v8  ;;  %v1150_v15 = vfloor.f32 %v1149_v51  ;;  %v1115_v54 = vsub.f32 %v1109_v2, %v1113_v43 }
 0x12f   : > { %v936_v31 = vmul.f32 %v935_v16, %v935_v16  ;;  %v1688_v46 = vsub.f32 %v1683_v63, %v1687_v48  ;;  %v1709_v30 = vsub.f32 %v2085_v57, %v2652_v4  ;;  %v1661_v0 = vmul.f32 -2.5052108e-08, %v2754_v13 }
 0x130   : > { %v1065_v53 = vmul.f32 %v2011_v60, %v2735_v26  ;;  %v1032_v28 = vmul.f32 %v1031_v7, %v2748_v14  ;;  %v1151_v23 = vmul.f32 6.2831855, %v1150_v15  ;;  %v969_v1 = vmul.f32 2.0, %v968_v3 }
 0x131   : > { %v937_v17 = vmul.f32 2.0, %v936_v31  ;;  %v1690_v18 = vsub.f32 %v1688_v46, %v1689_v12  ;;  %v1116_v32 = vmul.f32 0.15915494, %v1115_v54  ;;  %v1153_v22 = vmul.f32 -1.7484555e-07, %v1150_v15 }
 0x132   : > { %v1066_v39 = vadd.f32 0.008333334, %v1065_v53  ;;  %v2008_v24 = vadd.f32 -0.0001984127, %v1032_v28  ;;  %v1152_v62 = vsub.f32 %v1147_v59, %v1151_v23  ;;  %v907_v63 = vadd.f32 %v906_v47, %v875_v61 }
 0x133   : > { %v938_v42 = vsub.f32 1.0, %v937_v17  ;;  %v1117_v5 = vadd.f32 0.5, %v1116_v32  ;;  %v1715_v6 = vsub.f32 %v1709_v30, %v1713_v52  ;;  %v1662_v19 = vadd.f32 2.7557319e-06, %v1661_v0 }
 0x134   : > { %v1034_v58 = vmul.f32 %v2008_v24, %v2748_v14  ;;  %v2768_v9 = vmul.f32 0.5, %v1690_v18  ;;  %v1154_v55 = vsub.f32 %v1152_v62, %v1153_v22  ;;  %v970_v41 = vsub.f32 1.0, %v969_v1 }
 0x135   : > { %v939_v25 = vadd.f32 %v938_v42, %v907_v63  ;;  %v1118_v33 = vfloor.f32 %v1117_v5  ;;  %v1716_v20 = vmul.f32 0.15915494, %v1715_v6  ;;  %v2024_v36 = vadd.f32 -0.16666667, %v1195_v27  ;;  %v1249_v42 = vpop.permute.xlu1 %1248  ;;  %v2088_v5 = vld [vmem:[%s2231_s20 + $0x178] sm:$0xff] }
 0x136   : > { %v1067_v59 = vmul.f32 %v1066_v39, %v2735_v26  ;;  %v1035_v51 = vadd.f32 0.008333334, %v1034_v58  ;;  %v2771_v44 = vmul.f32 0.5, %v1154_v55  ;;  %v1002_v21 = vsub.f32 1.0, %v2717_v40 }
 0x137   : > { %v1427_v47 = vsub.f32 %v1425_v34, %v1426_v37  ;;  %v971_v8 = vadd.f32 %v970_v41, %v939_v25  ;;  %v1119_v2 = vmul.f32 6.2831855, %v1118_v33  ;;  %v1663_v43 = vmul.f32 %v1662_v19, %v2754_v13 }
 0x138   : > { %v1036_v57 = vmul.f32 %v1035_v51, %v2748_v14  ;;  %v2778_v61 = vmul.f32 %v2768_v9, %v2768_v9  ;;  %v2782_v27 = vmul.f32 %v2771_v44, %v2771_v44  ;;  %v1121_v48 = vmul.f32 -1.7484555e-07, %v1118_v33 }
 0x139   : > { %v1003_v3 = vadd.f32 %v1002_v21, %v971_v8  ;;  %v1120_v16 = vsub.f32 %v1115_v54, %v1119_v2  ;;  %v1717_v40 = vadd.f32 0.5, %v1716_v20  ;;  %v1101_v37 = vmul.f32 %v2714_v50, %v2608_v11 }
 0x13a   : > { %v1197_v34 = vmul.f32 %v2024_v36, %v2660_v29  ;;  %v2012_v60 = vadd.f32 -0.16666667, %v1067_v59  ;;  %v1157_v7 = vmul.f32 -2.5052108e-08, %v2782_v27  ;;  %v2009_v15 = vadd.f32 -0.16666667, %v1036_v57 }
 0x13b   : > { %v1004_v12 = vmul.f32 0.16666667, %v1003_v3  ;;  %v1122_v31 = vsub.f32 %v1120_v16, %v1121_v48  ;;  %v1718_v46 = vfloor.f32 %v1717_v40  ;;  %v2788_v30 = vmul.f32 0.5, %v1427_v47  ;;  %v2825_v16 = vld [vmem:[%s2231_s20 + $0x28] sm:$0xff] }
 0x13c   : > { %v2080_v0 = vadd.f32 -0.0001984127, %v1663_v43  ;;  %v1158_v53 = vadd.f32 2.7557319e-06, %v1157_v7  ;;  %v1693_v54 = vmul.f32 -2.5052108e-08, %v2778_v61  ;;  %v1069_v50 = vmul.f32 %v2012_v60, %v2735_v26 }
 0x13d   : > { %1005 = vst [vmem:[%s2464_s24 + $0x18] sm:$0xff] %v1004_v12  ;;  %v2792_v28 = vmul.f32 0.5, %v1122_v31  ;;  %v1719_v23 = vmul.f32 6.2831855, %v1718_v46  ;;  %v1102_v11 = vadd.f32 1.0, %v1101_v37  ;;  %v1198_v29 = vadd.f32 1.0, %v1197_v34 }
 0x13e   : > { %v1159_v52 = vmul.f32 %v1158_v53, %v2782_v27  ;;  %v1038_v1 = vmul.f32 %v2009_v15, %v2748_v14  ;;  %v1721_v32 = vmul.f32 -1.7484555e-07, %v1718_v46  ;;  %v2803_v39 = vmul.f32 %v2788_v30, %v2788_v30  ;;  %v2033_v48 = vld [vmem:[%s2231_s20 + $0xa8] sm:$0xff]  ;;  %v1218_v15 = vpop.permute.xlu0 %1217  ;;  %v2076_v31 = vld [vmem:[%s2231_s20 + $0x78] sm:$0xff] }
 0x13f   : > { %v2799_v17 = vmul.f32 %v2792_v28, %v2792_v28  ;;  %v1720_v18 = vsub.f32 %v1715_v6, %v1719_v23  ;;  %v1665_v62 = vmul.f32 %v2080_v0, %v2754_v13  ;;  %v1694_v22 = vadd.f32 2.7557319e-06, %v1693_v54 }
 0x140   : > { %v2020_v24 = vadd.f32 -0.0001984127, %v1159_v52  ;;  %v1103_v14 = vmul.f32 %v1102_v11, %v2595_v49  ;;  %v1070_v19 = vadd.f32 1.0, %v1069_v50  ;;  %v1199_v6 = vmul.f32 %v1198_v29, %v2645_v45  ;;  %v1745_v45 = vpop.permute.xlu2 %1744  ;;  %v1618_v29 = vpop.permute.xlu1 %1617 }
 0x141   : > { %v1125_v26 = vmul.f32 -2.5052108e-08, %v2799_v17  ;;  %v1722_v63 = vsub.f32 %v1720_v18, %v1721_v32  ;;  %v1039_v55 = vadd.f32 1.0, %v1038_v1  ;;  %v1430_v33 = vmul.f32 -2.5052108e-08, %v2803_v39  ;;  %v2030_v1 = vld [vmem:[%s2231_s20 + $0x68] sm:$0xff] }
 0x142   : > { %v1161_v58 = vmul.f32 %v2020_v24, %v2782_v27  ;;  %v1741_v36 = vsub.f32 %v2088_v5, %v2652_v4  ;;  %v1666_v59 = vadd.f32 0.008333334, %v1665_v62  ;;  %v1695_v51 = vmul.f32 %v1694_v22, %v2778_v61 }
 0x143   : > { %v1126_v41 = vadd.f32 2.7557319e-06, %v1125_v26  ;;  %v2811_v25 = vmul.f32 0.5, %v1722_v63  ;;  %v1071_v47 = vmul.f32 %v1070_v19, %v2727_v38  ;;  %v1104_v2 = vmul.f32 %v1103_v14, %v1103_v14 }
 0x144   : > { %v1162_v20 = vadd.f32 0.008333334, %v1161_v58  ;;  %v1200_v43 = vmul.f32 %v1199_v6, %v1199_v6  ;;  %v1040_v57 = vmul.f32 %v1039_v55, %v2740_v10  ;;  %v1431_v40 = vadd.f32 2.7557319e-06, %v1430_v33 }
 0x145   : > { %v1127_v49 = vmul.f32 %v1126_v41, %v2799_v17  ;;  %v2819_v21 = vmul.f32 %v2811_v25, %v2811_v25  ;;  %v1747_v60 = vsub.f32 %v1741_v36, %v1745_v45  ;;  %v1667_v7 = vmul.f32 %v1666_v59, %v2754_v13  ;;  %v2056_v45 = vld [vmem:[%s2231_s20 + $0xb0] sm:$0xff] }
 0x146   : > { %v1163_v8 = vmul.f32 %v1162_v20, %v2782_v27  ;;  %v2083_v38 = vadd.f32 -0.0001984127, %v1695_v51  ;;  %v1072_v46 = vmul.f32 %v1071_v47, %v1071_v47  ;;  %v1245_v0 = vsub.f32 %v2033_v48, %v2825_v16 }
 0x147   : > { %v2017_v3 = vadd.f32 -0.0001984127, %v1127_v49  ;;  %v1725_v34 = vmul.f32 -2.5052108e-08, %v2819_v21  ;;  %v2834_v53 = vmul.f32 2.0, %v1104_v2  ;;  %v2836_v54 = vmul.f32 2.0, %v1200_v43 }
 0x148   : > { %v2021_v37 = vadd.f32 -0.16666667, %v1163_v8  ;;  %v1041_v23 = vmul.f32 %v1040_v57, %v1040_v57  ;;  %v1432_v50 = vmul.f32 %v1431_v40, %v2803_v39  ;;  %v1748_v18 = vmul.f32 0.15915494, %v1747_v60 }
 0x149   : > { %v1129_v12 = vmul.f32 %v2017_v3, %v2799_v17  ;;  %v1726_v52 = vadd.f32 2.7557319e-06, %v1725_v34  ;;  %v1614_v32 = vsub.f32 %v2076_v31, %v2652_v4  ;;  %v2081_v24 = vadd.f32 -0.16666667, %v1667_v7  ;;  %v2091_v34 = vld [vmem:[%s2231_s20 + $0x1b8] sm:$0xff] }
 0x14a   : > { %v1165_v10 = vmul.f32 %v2021_v37, %v2782_v27  ;;  %v1697_v62 = vmul.f32 %v2083_v38, %v2778_v61  ;;  %v1073_v26 = vmul.f32 2.0, %v1072_v46  ;;  %v2843_v63 = vsub.f32 %v1245_v0, %v1249_v42  ;;  %v1449_v37 = vpop.permute.xlu0 %1448 }
 0x14b   : > { %v1130_v11 = vadd.f32 0.008333334, %v1129_v12  ;;  %v1749_v5 = vadd.f32 0.5, %v1748_v18  ;;  %v1620_v14 = vsub.f32 %v1614_v32, %v1618_v29  ;;  %v1106_v19 = vsub.f32 1.0, %v2834_v53 }
 0x14c   : > { %v1166_v27 = vadd.f32 1.0, %v1165_v10  ;;  %v1042_v58 = vmul.f32 2.0, %v1041_v23  ;;  %v1214_v55 = vsub.f32 %v2030_v1, %v2825_v16  ;;  %v2847_v41 = vadd.f32 -0.0001984127, %v1432_v50 }
 0x14d   : > { %v1131_v22 = vmul.f32 %v1130_v11, %v2799_v17  ;;  %v1727_v33 = vmul.f32 %v1726_v52, %v2819_v21  ;;  %v1750_v20 = vfloor.f32 %v1749_v5  ;;  %v1621_v36 = vmul.f32 0.15915494, %v1620_v14 }
 0x14e   : > { %v1669_v59 = vmul.f32 %v2081_v24, %v2754_v13  ;;  %v1698_v51 = vadd.f32 0.008333334, %v1697_v62  ;;  %v1167_v42 = vmul.f32 %v1166_v27, %v2771_v44  ;;  %v1202_v47 = vsub.f32 1.0, %v2836_v54 }
 0x14f   : > { %v2018_v6 = vadd.f32 -0.16666667, %v1131_v22  ;;  %v1074_v8 = vsub.f32 1.0, %v1073_v26  ;;  %v1252_v2 = vmul.f32 0.15915494, %v2843_v63  ;;  %v1043_v57 = vsub.f32 1.0, %v1042_v58 }
 0x150   : > { %v1751_v43 = vmul.f32 6.2831855, %v1750_v20  ;;  %v2856_v48 = vsub.f32 %v1214_v55, %v1218_v15  ;;  %v1622_v40 = vadd.f32 0.5, %v1621_v36  ;;  %v2086_v13 = vadd.f32 -0.0001984127, %v1727_v33 }
 0x151   : > { %v1133_v49 = vmul.f32 %v2018_v6, %v2799_v17  ;;  %v1753_v38 = vmul.f32 -1.7484555e-07, %v1750_v20  ;;  %v1445_v44 = vsub.f32 %v2056_v45, %v2666_v35  ;;  %v1670_v17 = vadd.f32 1.0, %v1669_v59 }
 0x152   : > { %v1752_v7 = vsub.f32 %v1747_v60, %v1751_v43  ;;  %v1168_v12 = vmul.f32 %v1167_v42, %v1167_v42  ;;  %v1623_v46 = vfloor.f32 %v1622_v40  ;;  %v1699_v10 = vmul.f32 %v1698_v51, %v2778_v61  ;;  %v1777_v60 = vpop.permute.xlu2 %1776  ;;  %v2059_v51 = vld [vmem:[%s2231_s20 + $0xf0] sm:$0xff] }
 0x153   : > { %v1134_v3 = vadd.f32 1.0, %v1133_v49  ;;  %v2862_v53 = vsub.f32 %v1445_v44, %v1449_v37  ;;  %v1773_v15 = vsub.f32 %v2091_v34, %v2652_v4  ;;  %v1075_v23 = vadd.f32 %v1074_v8, %v1043_v57 }
 0x154   : > { %v1754_v0 = vsub.f32 %v1752_v7, %v1753_v38  ;;  %v1253_v29 = vadd.f32 0.5, %v1252_v2  ;;  %v1624_v50 = vmul.f32 6.2831855, %v1623_v46  ;;  %v1729_v52 = vmul.f32 %v2086_v13, %v2819_v21  ;;  %v1481_v38 = vpop.permute.xlu1 %1480 }
 0x155   : > { %v1135_v31 = vmul.f32 %v1134_v3, %v2792_v28  ;;  %v1221_v1 = vmul.f32 0.15915494, %v2856_v48  ;;  %v1452_v28 = vmul.f32 0.15915494, %v2862_v53  ;;  %v1169_v32 = vmul.f32 2.0, %v1168_v12 }
 0x156   : > { %v2867_v18 = vmul.f32 0.5, %v1754_v0  ;;  %v1625_v62 = vsub.f32 %v1620_v14, %v1624_v50  ;;  %v1626_v27 = vmul.f32 -1.7484555e-07, %v1623_v46  ;;  %v1671_v4 = vmul.f32 %v1670_v17, %v2737_v56  ;;  %v2036_v0 = vld [vmem:[%s2231_s20 + $0xe8] sm:$0xff] }
 0x157   : > { %v1136_v11 = vmul.f32 %v1135_v31, %v1135_v31  ;;  %v1453_v26 = vadd.f32 0.5, %v1452_v28  ;;  %v2875_v5 = vsub.f32 %v1773_v15, %v1777_v60  ;;  %v2084_v58 = vadd.f32 -0.16666667, %v1699_v10 }
 0x158   : > { %v2873_v22 = vmul.f32 %v2867_v18, %v2867_v18  ;;  %v1107_v6 = vadd.f32 %v1106_v19, %v1075_v23  ;;  %v1627_v33 = vsub.f32 %v1625_v62, %v1626_v27  ;;  %v1254_v20 = vfloor.f32 %v1253_v29 }
 0x159   : > { %v1137_v24 = vmul.f32 2.0, %v1136_v11  ;;  %v2877_v36 = vadd.f32 0.5, %v1221_v1  ;;  %v1454_v14 = vfloor.f32 %v1453_v26  ;;  %v1170_v42 = vsub.f32 1.0, %v1169_v32 }
 0x15a   : > { %v1757_v59 = vmul.f32 -2.5052108e-08, %v2873_v22  ;;  %v1730_v49 = vadd.f32 0.008333334, %v1729_v52  ;;  %v2881_v45 = vmul.f32 0.5, %v1627_v33  ;;  %v1701_v19 = vmul.f32 %v2084_v58, %v2778_v61 }
 0x15b   : > { %v1138_v55 = vsub.f32 1.0, %v1137_v24  ;;  %v1455_v2 = vmul.f32 6.2831855, %v1454_v14  ;;  %v1780_v43 = vmul.f32 0.15915494, %v2875_v5  ;;  %v1477_v40 = vsub.f32 %v2059_v51, %v2666_v35 }
 0x15c   : > { %v1758_v8 = vadd.f32 2.7557319e-06, %v1757_v59  ;;  %v2887_v3 = vmul.f32 %v2881_v45, %v2881_v45  ;;  %v1434_v37 = vmul.f32 %v2847_v41, %v2803_v39  ;;  %v1672_v34 = vmul.f32 %v1671_v4, %v1671_v4  ;;  %v1281_v4 = vpop.permute.xlu0 %1280  ;;  %v2062_v59 = vld [vmem:[%s2231_s20 + $0x130] sm:$0xff] }
 0x15d   : > { %v1139_v56 = vadd.f32 %v1138_v55, %v1107_v6  ;;  %v1255_v13 = vmul.f32 6.2831855, %v1254_v20  ;;  %v1257_v61 = vmul.f32 -1.7484555e-07, %v1254_v20  ;;  %v1223_v17 = vfloor.f32 %v2877_v36 }
 0x15e   : > { %v1759_v7 = vmul.f32 %v1758_v8, %v2873_v22  ;;  %v1630_v12 = vmul.f32 -2.5052108e-08, %v2887_v3  ;;  %v1731_v31 = vmul.f32 %v1730_v49, %v2819_v21  ;;  %v1456_v10 = vsub.f32 %v2862_v53, %v1455_v2 }
 0x15f   : > { %v1171_v57 = vadd.f32 %v1170_v42, %v1139_v56  ;;  %v1781_v41 = vadd.f32 0.5, %v1780_v43  ;;  %v1702_v15 = vadd.f32 1.0, %v1701_v19  ;;  %v1483_v29 = vsub.f32 %v1477_v40, %v1481_v38 }
 0x160   : > { %v2089_v46 = vadd.f32 -0.0001984127, %v1759_v7  ;;  %v1631_v11 = vadd.f32 2.7557319e-06, %v1630_v12  ;;  %v1256_v54 = vsub.f32 %v2843_v63, %v1255_v13  ;;  %v1457_v50 = vmul.f32 -1.7484555e-07, %v1454_v14  ;;  %v1513_v7 = vpop.permute.xlu1 %1512 }
 0x161   : > { %v1203_v44 = vadd.f32 %v1202_v47, %v1171_v57  ;;  %v1782_v60 = vfloor.f32 %v1781_v41  ;;  %v1224_v52 = vmul.f32 6.2831855, %v1223_v17  ;;  %v1484_v28 = vmul.f32 0.15915494, %v1483_v29 }
 0x162   : > { %v1761_v47 = vmul.f32 %v2089_v46, %v2873_v22  ;;  %v1632_v1 = vmul.f32 %v1631_v11, %v2887_v3  ;;  %v1277_v53 = vsub.f32 %v2036_v0, %v2825_v16  ;;  %v2087_v32 = vadd.f32 -0.16666667, %v1731_v31 }
 0x163   : > { %v1204_v23 = vmul.f32 0.16666667, %v1203_v44  ;;  %v1458_v62 = vsub.f32 %v1456_v10, %v1457_v50  ;;  %v1783_v27 = vmul.f32 6.2831855, %v1782_v60  ;;  %v2905_v26 = vadd.f32 0.008333334, %v1434_v37 }
 0x164   : > { %v1762_v24 = vadd.f32 0.008333334, %v1761_v47  ;;  %v1703_v63 = vmul.f32 %v1702_v15, %v2768_v9  ;;  %v2077_v58 = vadd.f32 -0.0001984127, %v1632_v1  ;;  %v1485_v6 = vadd.f32 0.5, %v1484_v28  ;;  %v2039_v15 = vld [vmem:[%s2231_s20 + $0x128] sm:$0xff] }
 0x165   : > { %1205 = vst [vmem:[%s2464_s24 + $0x20] sm:$0xff] %v1204_v23  ;;  %v1258_v55 = vsub.f32 %v1256_v54, %v1257_v61  ;;  %v1784_v20 = vsub.f32 %v2875_v5, %v1783_v27  ;;  %v1785_v36 = vmul.f32 -1.7484555e-07, %v1782_v60  ;;  %v2911_v14 = vmul.f32 2.0, %v1672_v34 }
 0x166   : > { %v1763_v33 = vmul.f32 %v1762_v24, %v2873_v22  ;;  %v1634_v51 = vmul.f32 %v2077_v58, %v2887_v3  ;;  %v1486_v42 = vfloor.f32 %v1485_v6  ;;  %v1283_v56 = vsub.f32 %v1277_v53, %v1281_v4  ;;  %v1313_v24 = vpop.permute.xlu0 %1312 }
 0x167   : > { %v1733_v49 = vmul.f32 %v2087_v32, %v2819_v21  ;;  %v1225_v8 = vsub.f32 %v2856_v48, %v1224_v52  ;;  %v2916_v9 = vmul.f32 0.5, %v1458_v62  ;;  %v1786_v2 = vsub.f32 %v1784_v20, %v1785_v36 }
 0x168   : > { %v1226_v43 = vmul.f32 -1.7484555e-07, %v1223_v17  ;;  %v1635_v19 = vadd.f32 0.008333334, %v1634_v51  ;;  %v1487_v57 = vmul.f32 6.2831855, %v1486_v42  ;;  %v1509_v5 = vsub.f32 %v2062_v59, %v2666_v35 }
 0x169   : > { %v1704_v40 = vmul.f32 %v1703_v63, %v1703_v63  ;;  %v2919_v37 = vmul.f32 0.5, %v1258_v55  ;;  %v2090_v34 = vadd.f32 -0.16666667, %v1763_v33  ;;  %v2921_v13 = vmul.f32 0.5, %v1786_v2 }
 0x16a   : > { %v1636_v21 = vmul.f32 %v1635_v19, %v2887_v3  ;;  %v1488_v38 = vsub.f32 %v1483_v29, %v1487_v57  ;;  %v1489_v48 = vmul.f32 -1.7484555e-07, %v1486_v42  ;;  %v1284_v44 = vmul.f32 0.15915494, %v1283_v56 }
 0x16b   : > { %v1734_v61 = vadd.f32 1.0, %v1733_v49  ;;  %v1227_v12 = vsub.f32 %v1225_v8, %v1226_v43  ;;  %v2926_v17 = vmul.f32 %v2916_v9, %v2916_v9  ;;  %v2930_v31 = vmul.f32 %v2921_v13, %v2921_v13  ;;  %v2065_v43 = vld [vmem:[%s2231_s20 + $0x170] sm:$0xff] }
 0x16c   : > { %v2078_v46 = vadd.f32 -0.16666667, %v1636_v21  ;;  %v1490_v10 = vsub.f32 %v1488_v38, %v1489_v48  ;;  %v1285_v41 = vadd.f32 0.5, %v1284_v44  ;;  %v1515_v0 = vsub.f32 %v1509_v5, %v1513_v7  ;;  %v1545_v21 = vpop.permute.xlu1 %1544 }
 0x16d   : > { %v1674_v23 = vsub.f32 1.0, %v2911_v14  ;;  %v2934_v11 = vmul.f32 2.0, %v1704_v40  ;;  %v1765_v29 = vmul.f32 %v2090_v34, %v2873_v22  ;;  %v1789_v54 = vmul.f32 -2.5052108e-08, %v2930_v31 }
 0x16e   : > { %v1638_v47 = vmul.f32 %v2078_v46, %v2887_v3  ;;  %v2939_v50 = vmul.f32 0.5, %v1490_v10  ;;  %v1286_v60 = vfloor.f32 %v1285_v41  ;;  %v1516_v52 = vmul.f32 0.15915494, %v1515_v0 }
 0x16f   : > { %v2943_v1 = vmul.f32 %v2919_v37, %v2919_v37  ;;  %v2945_v28 = vmul.f32 0.5, %v1227_v12  ;;  %v1790_v53 = vadd.f32 2.7557319e-06, %v1789_v54  ;;  %v1309_v32 = vsub.f32 %v2039_v15, %v2825_v16 }
 0x170   : > { %v1735_v22 = vmul.f32 %v1734_v61, %v2811_v25  ;;  %v1639_v62 = vadd.f32 1.0, %v1638_v47  ;;  %v1461_v27 = vmul.f32 -2.5052108e-08, %v2926_v17  ;;  %v1287_v3 = vmul.f32 6.2831855, %v1286_v60 }
 0x171   : > { %v1766_v4 = vadd.f32 1.0, %v1765_v29  ;;  %v1791_v63 = vmul.f32 %v1790_v53, %v2930_v31  ;;  %v2953_v58 = vmul.f32 %v2939_v50, %v2939_v50  ;;  %v1517_v6 = vadd.f32 0.5, %v1516_v52 }
 0x172   : > { %v1640_v55 = vmul.f32 %v1639_v62, %v2881_v45  ;;  %v1288_v33 = vsub.f32 %v1283_v56, %v1287_v3  ;;  %v1289_v20 = vmul.f32 -1.7484555e-07, %v1286_v60  ;;  %v1315_v36 = vsub.f32 %v1309_v32, %v1313_v24 }
 0x173   : > { %v1706_v25 = vsub.f32 1.0, %v2934_v11  ;;  %v1261_v59 = vmul.f32 -2.5052108e-08, %v2943_v1  ;;  %v2092_v14 = vadd.f32 -0.0001984127, %v1791_v63  ;;  %v1518_v51 = vfloor.f32 %v1517_v6 }
 0x174   : > { %v1736_v42 = vmul.f32 %v1735_v22, %v1735_v22  ;;  %v1641_v49 = vmul.f32 %v1640_v55, %v1640_v55  ;;  %v1290_v8 = vsub.f32 %v1288_v33, %v1289_v20  ;;  %v1316_v2 = vmul.f32 0.15915494, %v1315_v36 }
 0x175   : > { %v1767_v19 = vmul.f32 %v1766_v4, %v2867_v18  ;;  %v1462_v57 = vadd.f32 2.7557319e-06, %v1461_v27  ;;  %v1793_v5 = vmul.f32 %v2092_v14, %v2930_v31  ;;  %v1519_v45 = vmul.f32 6.2831855, %v1518_v51 }
 0x176   : > { %v1642_v56 = vmul.f32 2.0, %v1641_v49  ;;  %v1493_v40 = vmul.f32 -2.5052108e-08, %v2953_v58  ;;  %v1521_v34 = vmul.f32 -1.7484555e-07, %v1518_v51  ;;  %v1317_v7 = vadd.f32 0.5, %v1316_v2 }
 0x177   : > { %v1794_v38 = vadd.f32 0.008333334, %v1793_v5  ;;  %v2962_v48 = vmul.f32 0.5, %v1290_v8  ;;  %v1520_v44 = vsub.f32 %v1515_v0, %v1519_v45  ;;  %v1541_v61 = vsub.f32 %v2065_v43, %v2666_v35  ;;  %v1345_v5 = vpop.permute.xlu0 %1344 }
 0x178   : > { %v1737_v12 = vmul.f32 2.0, %v1736_v42  ;;  %v2967_v18 = vmul.f32 %v2945_v28, %v2945_v28  ;;  %v1643_v46 = vsub.f32 1.0, %v1642_v56  ;;  %v1318_v10 = vfloor.f32 %v1317_v7  ;;  %v2068_v7 = vld [vmem:[%s2231_s20 + $0x1b0] sm:$0xff] }
 0x179   : > { %v1463_v41 = vmul.f32 %v1462_v57, %v2926_v17  ;;  %v1795_v15 = vmul.f32 %v1794_v38, %v2930_v31  ;;  %v1522_v11 = vsub.f32 %v1520_v44, %v1521_v34  ;;  %v1547_v29 = vsub.f32 %v1541_v61, %v1545_v21 }
 0x17a   : > { %v1768_v54 = vmul.f32 %v1767_v19, %v1767_v19  ;;  %v1675_v47 = vadd.f32 %v1674_v23, %v1643_v46  ;;  %v1494_v60 = vadd.f32 2.7557319e-06, %v1493_v40  ;;  %v1319_v52 = vmul.f32 6.2831855, %v1318_v10 }
 0x17b   : > { %v1262_v0 = vadd.f32 2.7557319e-06, %v1261_v59  ;;  %v2093_v35 = vadd.f32 -0.16666667, %v1795_v15  ;;  %v2973_v53 = vmul.f32 %v2962_v48, %v2962_v48  ;;  %v2975_v32 = vmul.f32 0.5, %v1522_v11  ;;  %v2042_v59 = vld [vmem:[%s2231_s20 + $0x168] sm:$0xff] }
 0x17c   : > { %v1230_v24 = vmul.f32 -2.5052108e-08, %v2967_v18  ;;  %v1707_v22 = vadd.f32 %v1706_v25, %v1675_v47  ;;  %v1320_v62 = vsub.f32 %v1315_v36, %v1319_v52  ;;  %v1321_v27 = vmul.f32 -1.7484555e-07, %v1318_v10  ;;  %v2127_v47 = vld [vmem:[%s2231_s20 + $0x30] sm:$0xff] }
 0x17d   : > { %v2057_v3 = vadd.f32 -0.0001984127, %v1463_v41  ;;  %v1797_v4 = vmul.f32 %v2093_v35, %v2930_v31  ;;  %v2981_v23 = vmul.f32 %v2975_v32, %v2975_v32  ;;  %v1548_v63 = vmul.f32 0.15915494, %v1547_v29  ;;  %v1577_v41 = vpop.permute.xlu1 %1576 }
 0x17e   : > { %v1738_v6 = vsub.f32 1.0, %v1737_v12  ;;  %v1769_v55 = vmul.f32 2.0, %v1768_v54  ;;  %v1495_v33 = vmul.f32 %v1494_v60, %v2953_v58  ;;  %v1322_v20 = vsub.f32 %v1320_v62, %v1321_v27 }
 0x17f   : > { %v1798_v14 = vadd.f32 1.0, %v1797_v4  ;;  %v1293_v51 = vmul.f32 -2.5052108e-08, %v2973_v53  ;;  %v1525_v36 = vmul.f32 -2.5052108e-08, %v2981_v23  ;;  %v1549_v25 = vadd.f32 0.5, %v1548_v63 }
 0x180   : > { %v1263_v31 = vmul.f32 %v1262_v0, %v2943_v1  ;;  %v1231_v42 = vadd.f32 2.7557319e-06, %v1230_v24  ;;  %v1739_v49 = vadd.f32 %v1738_v6, %v1707_v22  ;;  %v2988_v8 = vmul.f32 0.5, %v1322_v20 }
 0x181   : > { %v1465_v2 = vmul.f32 %v2057_v3, %v2926_v17  ;;  %v1799_v43 = vmul.f32 %v1798_v14, %v2921_v13  ;;  %v1526_v19 = vadd.f32 2.7557319e-06, %v1525_v36  ;;  %v1550_v57 = vfloor.f32 %v1549_v25 }
 0x182   : > { %v1770_v45 = vsub.f32 1.0, %v1769_v55  ;;  %v2060_v56 = vadd.f32 -0.0001984127, %v1495_v33  ;;  %v2994_v40 = vmul.f32 %v2988_v8, %v2988_v8  ;;  %v1341_v34 = vsub.f32 %v2042_v59, %v2825_v16 }
 0x183   : > { %v1800_v21 = vmul.f32 %v1799_v43, %v1799_v43  ;;  %v1294_v38 = vadd.f32 2.7557319e-06, %v1293_v51  ;;  %v1527_v44 = vmul.f32 %v1526_v19, %v2981_v23  ;;  %v1551_v61 = vmul.f32 6.2831855, %v1550_v57 }
 0x184   : > { %v1771_v12 = vadd.f32 %v1770_v45, %v1739_v49  ;;  %v1325_v13 = vmul.f32 -2.5052108e-08, %v2994_v40  ;;  %v1553_v46 = vmul.f32 -1.7484555e-07, %v1550_v57  ;;  %v1347_v10 = vsub.f32 %v1341_v34, %v1345_v5 }
 0x185   : > { %v1801_v15 = vmul.f32 2.0, %v1800_v21  ;;  %v2063_v11 = vadd.f32 -0.0001984127, %v1527_v44  ;;  %v1552_v54 = vsub.f32 %v1547_v29, %v1551_v61  ;;  %v1573_v60 = vsub.f32 %v2068_v7, %v2127_v47  ;;  %v1377_v21 = vpop.permute.xlu0 %1376 }
 0x186   : > { %v2034_v52 = vadd.f32 -0.0001984127, %v1263_v31  ;;  %v1232_v0 = vmul.f32 %v1231_v42, %v2967_v18  ;;  %v1326_v35 = vadd.f32 2.7557319e-06, %v1325_v13  ;;  %v1348_v24 = vmul.f32 0.15915494, %v1347_v10 }
 0x187   : > { %v1802_v22 = vsub.f32 1.0, %v1801_v15  ;;  %v1497_v62 = vmul.f32 %v2060_v56, %v2953_v58  ;;  %v1554_v27 = vsub.f32 %v1552_v54, %v1553_v46  ;;  %v1579_v3 = vsub.f32 %v1573_v60, %v1577_v41  ;;  %v2045_v31 = vld [vmem:[%s2231_s20 + $0x1a8] sm:$0xff] }
 0x188   : > { %v1466_v4 = vadd.f32 0.008333334, %v1465_v2  ;;  %v1295_v63 = vmul.f32 %v1294_v38, %v2973_v53  ;;  %v1529_v6 = vmul.f32 %v2063_v11, %v2981_v23  ;;  %v1349_v55 = vadd.f32 0.5, %v1348_v24 }
 0x189   : > { %v1436_v29 = vmul.f32 %v2905_v26, %v2803_v39  ;;  %v1803_v33 = vadd.f32 %v1802_v22, %v1771_v12  ;;  %v3007_v20 = vmul.f32 0.5, %v1554_v27  ;;  %v1580_v59 = vmul.f32 0.15915494, %v1579_v3 }
 0x18a   : > { %v1265_v14 = vmul.f32 %v2034_v52, %v2943_v1  ;;  %v2031_v51 = vadd.f32 -0.0001984127, %v1232_v0  ;;  %v1327_v36 = vmul.f32 %v1326_v35, %v2994_v40  ;;  %v1350_v25 = vfloor.f32 %v1349_v55 }
 0x18b   : > { %v1804_v42 = vmul.f32 0.16666667, %v1803_v33  ;;  %v1498_v49 = vadd.f32 0.008333334, %v1497_v62  ;;  %v3014_v2 = vmul.f32 %v3007_v20, %v3007_v20  ;;  %v1581_v43 = vadd.f32 0.5, %v1580_v59 }
 0x18c   : > { %v1467_v26 = vmul.f32 %v1466_v4, %v2926_v17  ;;  %v2037_v19 = vadd.f32 -0.0001984127, %v1295_v63  ;;  %v1530_v57 = vadd.f32 0.008333334, %v1529_v6  ;;  %v1351_v5 = vmul.f32 6.2831855, %v1350_v25 }
 0x18d   : > { %v2055_v45 = vadd.f32 -0.16666667, %v1436_v29  ;;  %1805 = vst [vmem:[%s2464_s24 + $0x38] sm:$0xff] %v1804_v42  ;;  %v1557_v56 = vmul.f32 -2.5052108e-08, %v3014_v2  ;;  %v1582_v34 = vfloor.f32 %v1581_v43  ;;  %v1373_v7 = vsub.f32 %v2045_v31, %v2825_v16 }
 0x18e   : > { %v1266_v38 = vadd.f32 0.008333334, %v1265_v14  ;;  %v1234_v44 = vmul.f32 %v2031_v51, %v2967_v18  ;;  %v2040_v61 = vadd.f32 -0.0001984127, %v1327_v36  ;;  %v1352_v12 = vsub.f32 %v1347_v10, %v1351_v5 }
 0x18f   : > { %v1499_v13 = vmul.f32 %v1498_v49, %v2953_v58  ;;  %v1558_v46 = vadd.f32 2.7557319e-06, %v1557_v56  ;;  %v1353_v41 = vmul.f32 -1.7484555e-07, %v1350_v25  ;;  %v1583_v15 = vmul.f32 6.2831855, %v1582_v34 }
 0x190   : > { %v2058_v11 = vadd.f32 -0.16666667, %v1467_v26  ;;  %v1297_v54 = vmul.f32 %v2037_v19, %v2973_v53  ;;  %v1531_v47 = vmul.f32 %v1530_v57, %v2981_v23  ;;  %v1379_v60 = vsub.f32 %v1373_v7, %v1377_v21 }
 0x191   : > { %v1559_v52 = vmul.f32 %v1558_v46, %v3014_v2  ;;  %v1354_v16 = vsub.f32 %v1352_v12, %v1353_v41  ;;  %v1584_v0 = vsub.f32 %v1579_v3, %v1583_v15  ;;  %v1585_v35 = vmul.f32 -1.7484555e-07, %v1582_v34 }
 0x192   : > { %v1438_v24 = vmul.f32 %v2055_v45, %v2803_v39  ;;  %v1235_v22 = vadd.f32 0.008333334, %v1234_v44  ;;  %v1329_v10 = vmul.f32 %v2040_v61, %v2994_v40  ;;  %v1380_v62 = vmul.f32 0.15915494, %v1379_v60 }
 0x193   : > { %v2061_v27 = vadd.f32 -0.16666667, %v1499_v13  ;;  %v2066_v4 = vadd.f32 -0.0001984127, %v1559_v52  ;;  %v3027_v63 = vmul.f32 0.5, %v1354_v16  ;;  %v1586_v6 = vsub.f32 %v1584_v0, %v1585_v35 }
 0x194   : > { %v1267_v55 = vmul.f32 %v1266_v38, %v2943_v1  ;;  %v1469_v29 = vmul.f32 %v2058_v11, %v2926_v17  ;;  %v1298_v33 = vadd.f32 0.008333334, %v1297_v54  ;;  %v1381_v59 = vadd.f32 0.5, %v1380_v62 }
 0x195   : > { %v2064_v14 = vadd.f32 -0.16666667, %v1531_v47  ;;  %v1561_v3 = vmul.f32 %v2066_v4, %v3014_v2  ;;  %v3034_v39 = vmul.f32 %v3027_v63, %v3027_v63  ;;  %v3036_v51 = vmul.f32 0.5, %v1586_v6 }
 0x196   : > { %v1439_v36 = vadd.f32 1.0, %v1438_v24  ;;  %v1236_v25 = vmul.f32 %v1235_v22, %v2967_v18  ;;  %v1330_v31 = vadd.f32 0.008333334, %v1329_v10  ;;  %v1382_v42 = vfloor.f32 %v1381_v59 }
 0x197   : > { %v1501_v49 = vmul.f32 %v2061_v27, %v2953_v58  ;;  %v1562_v43 = vadd.f32 0.008333334, %v1561_v3  ;;  %v1357_v17 = vmul.f32 -2.5052108e-08, %v3034_v39  ;;  %v3043_v26 = vmul.f32 %v3036_v51, %v3036_v51 }
 0x198   : > { %v2035_v19 = vadd.f32 -0.16666667, %v1267_v55  ;;  %v1470_v57 = vadd.f32 1.0, %v1469_v29  ;;  %v1299_v5 = vmul.f32 %v1298_v33, %v2973_v53  ;;  %v1383_v45 = vmul.f32 6.2831855, %v1382_v42 }
 0x199   : > { %v1533_v56 = vmul.f32 %v2064_v14, %v2981_v23  ;;  %v1563_v34 = vmul.f32 %v1562_v43, %v3014_v2  ;;  %v1358_v7 = vadd.f32 2.7557319e-06, %v1357_v17  ;;  %v1589_v21 = vmul.f32 -2.5052108e-08, %v3043_v26 }
 0x19a   : > { %v2032_v58 = vadd.f32 -0.16666667, %v1236_v25  ;;  %v1331_v38 = vmul.f32 %v1330_v31, %v2994_v40  ;;  %v1384_v44 = vsub.f32 %v1379_v60, %v1383_v45  ;;  %v1385_v61 = vmul.f32 -1.7484555e-07, %v1382_v42 }
 0x19b   : > { %v1502_v12 = vadd.f32 1.0, %v1501_v49  ;;  %v2067_v13 = vadd.f32 -0.16666667, %v1563_v34  ;;  %v1359_v46 = vmul.f32 %v1358_v7, %v3034_v39  ;;  %v1590_v41 = vadd.f32 2.7557319e-06, %v1589_v21 }
 0x19c   : > { %v1440_v15 = vmul.f32 %v1439_v36, %v2788_v30  ;;  %v1471_v11 = vmul.f32 %v1470_v57, %v2916_v9  ;;  %v2038_v23 = vadd.f32 -0.16666667, %v1299_v5  ;;  %v1386_v54 = vsub.f32 %v1384_v44, %v1385_v61 }
 0x19d   : > { %v1534_v47 = vadd.f32 1.0, %v1533_v56  ;;  %v1565_v52 = vmul.f32 %v2067_v13, %v3014_v2  ;;  %v2043_v16 = vadd.f32 -0.0001984127, %v1359_v46  ;;  %v1591_v0 = vmul.f32 %v1590_v41, %v3043_v26 }
 0x19e   : > { %v1269_v60 = vmul.f32 %v2035_v19, %v2943_v1  ;;  %v1238_v35 = vmul.f32 %v2032_v58, %v2967_v18  ;;  %v2041_v24 = vadd.f32 -0.16666667, %v1331_v38  ;;  %v3057_v22 = vmul.f32 0.5, %v1386_v54 }
 0x19f   : > { %v1503_v10 = vmul.f32 %v1502_v12, %v2939_v50  ;;  %v1566_v30 = vadd.f32 1.0, %v1565_v52  ;;  %v1361_v9 = vmul.f32 %v2043_v16, %v3034_v39  ;;  %v2069_v62 = vadd.f32 -0.0001984127, %v1591_v0 }
 0x1a0   : > { %v1441_v27 = vmul.f32 %v1440_v15, %v1440_v15  ;;  %v1301_v4 = vmul.f32 %v2038_v23, %v2973_v53  ;;  %v3064_v2 = vmul.f32 %v3057_v22, %v3057_v22  ;;  %v1472_v6 = vmul.f32 %v1471_v11, %v1471_v11 }
 0x1a1   : > { %v1535_v1 = vmul.f32 %v1534_v47, %v2975_v32  ;;  %v1362_v18 = vadd.f32 0.008333334, %v1361_v9  ;;  %v1593_v55 = vmul.f32 %v2069_v62, %v3043_v26  ;;  %v1270_v29 = vadd.f32 1.0, %v1269_v60 }
 0x1a2   : > { %v1239_v33 = vadd.f32 1.0, %v1238_v35  ;;  %v1333_v50 = vmul.f32 %v2041_v24, %v2994_v40  ;;  %v1389_v59 = vmul.f32 -2.5052108e-08, %v3064_v2  ;;  %v1504_v14 = vmul.f32 %v1503_v10, %v1503_v10 }
 0x1a3   : > { %v1567_v3 = vmul.f32 %v1566_v30, %v3007_v20  ;;  %v1363_v53 = vmul.f32 %v1362_v18, %v3034_v39  ;;  %v1594_v36 = vadd.f32 0.008333334, %v1593_v55  ;;  %v1442_v25 = vmul.f32 2.0, %v1441_v27 }
 0x1a4   : > { %v1302_v31 = vadd.f32 1.0, %v1301_v4  ;;  %v1390_v42 = vadd.f32 2.7557319e-06, %v1389_v59  ;;  %v1473_v49 = vmul.f32 2.0, %v1472_v6  ;;  %v1536_v32 = vmul.f32 %v1535_v1, %v1535_v1 }
 0x1a5   : > { %v2044_v43 = vadd.f32 -0.16666667, %v1363_v53  ;;  %v1595_v17 = vmul.f32 %v1594_v36, %v3043_v26  ;;  %v1271_v19 = vmul.f32 %v1270_v29, %v2919_v37  ;;  %v1240_v40 = vmul.f32 %v1239_v33, %v2945_v28 }
 0x1a6   : > { %v1334_v57 = vadd.f32 1.0, %v1333_v50  ;;  %v1391_v5 = vmul.f32 %v1390_v42, %v3064_v2  ;;  %v1505_v45 = vmul.f32 2.0, %v1504_v14  ;;  %v1568_v20 = vmul.f32 %v1567_v3, %v1567_v3 }
 0x1a7   : > { %v1365_v56 = vmul.f32 %v2044_v43, %v3034_v39  ;;  %v2070_v34 = vadd.f32 -0.16666667, %v1595_v17  ;;  %v1303_v7 = vmul.f32 %v1302_v31, %v2962_v48  ;;  %v1474_v58 = vsub.f32 1.0, %v1473_v49 }
 0x1a8   : > { %v2046_v21 = vadd.f32 -0.0001984127, %v1391_v5  ;;  %v1537_v38 = vmul.f32 2.0, %v1536_v32  ;;  %v1272_v12 = vmul.f32 %v1271_v19, %v1271_v19  ;;  %v1241_v37 = vmul.f32 %v1240_v40, %v1240_v40 }
 0x1a9   : > { %v1366_v44 = vadd.f32 1.0, %v1365_v56  ;;  %v1597_v61 = vmul.f32 %v2070_v34, %v3043_v26  ;;  %v1335_v28 = vmul.f32 %v1334_v57, %v2988_v8  ;;  %v1443_v46 = vsub.f32 1.0, %v1442_v25 }
 0x1aa   : > { %v1393_v13 = vmul.f32 %v2046_v21, %v3064_v2  ;;  %v1506_v41 = vsub.f32 1.0, %v1505_v45  ;;  %v1569_v15 = vmul.f32 2.0, %v1568_v20  ;;  %v1304_v39 = vmul.f32 %v1303_v7, %v1303_v7 }
 0x1ab   : > { %v1598_v11 = vadd.f32 1.0, %v1597_v61  ;;  %v1367_v23 = vmul.f32 %v1366_v44, %v3027_v63  ;;  %v1475_v54 = vadd.f32 %v1474_v58, %v1443_v46  ;;  %v1538_v47 = vsub.f32 1.0, %v1537_v38 }
 0x1ac   : > { %v1394_v48 = vadd.f32 0.008333334, %v1393_v13  ;;  %v1273_v16 = vmul.f32 2.0, %v1272_v12  ;;  %v1242_v26 = vmul.f32 2.0, %v1241_v37  ;;  %v1336_v0 = vmul.f32 %v1335_v28, %v1335_v28 }
 0x1ad   : > { %v1599_v52 = vmul.f32 %v1598_v11, %v3036_v51  ;;  %v1507_v8 = vadd.f32 %v1506_v41, %v1475_v54  ;;  %v1570_v35 = vsub.f32 1.0, %v1569_v15  ;;  %v1305_v10 = vmul.f32 2.0, %v1304_v39 }
 0x1ae   : > { %v1395_v60 = vmul.f32 %v1394_v48, %v3064_v2  ;;  %v1368_v30 = vmul.f32 %v1367_v23, %v1367_v23  ;;  %v1274_v4 = vsub.f32 1.0, %v1273_v16  ;;  %v1243_v63 = vsub.f32 1.0, %v1242_v26 }
 0x1af   : > { %v1600_v24 = vmul.f32 %v1599_v52, %v1599_v52  ;;  %v1539_v62 = vadd.f32 %v1538_v47, %v1507_v8  ;;  %v1337_v6 = vmul.f32 2.0, %v1336_v0  ;;  %v1306_v55 = vsub.f32 1.0, %v1305_v10 }
 0x1b0   : > { %v2047_v9 = vadd.f32 -0.16666667, %v1395_v60  ;;  %v1369_v29 = vmul.f32 2.0, %v1368_v30  ;;  %v1275_v59 = vadd.f32 %v1274_v4, %v1243_v63 }
 0x1b1   : > { %v1601_v27 = vmul.f32 2.0, %v1600_v24  ;;  %v1571_v51 = vadd.f32 %v1570_v35, %v1539_v62  ;;  %v1338_v14 = vsub.f32 1.0, %v1337_v6 }
 0x1b2   : > { %v1397_v1 = vmul.f32 %v2047_v9, %v3064_v2  ;;  %v1307_v36 = vadd.f32 %v1306_v55, %v1275_v59  ;;  %v1370_v25 = vsub.f32 1.0, %v1369_v29 }
 0x1b3   : > { %v1602_v18 = vsub.f32 1.0, %v1601_v27 }
 0x1b4   : > { %v1398_v33 = vadd.f32 1.0, %v1397_v1  ;;  %v1339_v42 = vadd.f32 %v1338_v14, %v1307_v36 }
 0x1b5   : > { %v1603_v50 = vadd.f32 %v1602_v18, %v1571_v51 }
 0x1b6   : > { %v1399_v3 = vmul.f32 %v1398_v33, %v3057_v22  ;;  %v1371_v32 = vadd.f32 %v1370_v25, %v1339_v42 }
 0x1b7   : > { %v1604_v53 = vmul.f32 0.16666667, %v1603_v50 }
 0x1b8   : > { %v1400_v31 = vmul.f32 %v1399_v3, %v1399_v3 }
 0x1b9   : > { %1605 = vst [vmem:[%s2464_s24 + $0x30] sm:$0xff] %v1604_v53 }
 0x1ba   : > { %v1401_v49 = vmul.f32 2.0, %v1400_v31 }
 0x1bc   : > { %v1402_v2 = vsub.f32 1.0, %v1401_v49 }
 0x1be   : > { %v1403_v43 = vadd.f32 %v1402_v2, %v1371_v32 }
 0x1c0   : > { %v1404_v17 = vmul.f32 0.16666667, %v1403_v43 }
 0x1c2   : > { %1405 = vst [vmem:[%s2464_s24 + $0x28] sm:$0xff] %v1404_v17 }
 0x1c3 PF: > { %s12_s11 = sadd.s32 1, %s2150_s11   ;;  %s3100_s9 = smov %s2146_s10 }
 0x1c4   : > { %p9_p5 = scmp.ge.s32.totalorder %s12_s11, 4   ;;  %s3101_s10 = smov %s3103_s12 }
 0x1c6   :  { %11 = sbr.rel (!%p9_p5) target bundleno = 2 (0x2), region = 72 }

</bundles_post_ra>
